<compile_context>
chip_gen: v5e
topology: v5e:2x2
jax: 0.10.0
libtpu: 0.0.40
codegen_flags: <defaults>
</compile_context>

<pallas_src>
import functools

import jax
import jax.numpy as jnp
from jax.experimental import pallas as pl
from jax.experimental.pallas import tpu as pltpu


# ------------------------- fused transformer-stack kernel -------------------------


def _stack_kernel(x_ref,                       # (B_blk, T, E) f32
                  w_in_ref, b_in_ref,          # (E, D) bf16 ; (1, D) f32
                  ln1_g_ref, ln1_b_ref,        # (1, 1, D) f32 (depth-indexed)
                  wqkv_ref,                    # (1, D, 3*inner) bf16
                  wo_ref, bo_ref,              # (1, inner, D) bf16 ; (1, 1, D) f32
                  ln2_g_ref, ln2_b_ref,        # (1, 1, D) f32
                  wff1_ref, bff1_ref,          # (1, D, 2*ffi) bf16 ; (1, 1, 2*ffi) f32
                  wff2_ref, bff2_ref,          # (1, ffi, D) bf16 ; (1, 1, D) f32
                  fin_g_ref, fin_b_ref,        # (1, D) f32
                  w_out_ref, b_out_ref,        # (D, N) bf16 ; (1, N) f32
                  cos_ref, sin_ref,            # (T, dh) f32 (sin carries rotate-half sign)
                  o_ref,                       # (B_blk, T, N) f32
                  h_s,                         # VMEM scratch (B_blk*T, D) f32, depth-resident
                  *, heads, dim_head, b_blk, seq_len):
    l = pl.program_id(1)
    T = seq_len
    dh = dim_head
    inner = heads * dim_head
    rows = b_blk * T
    E = x_ref.shape[-1]
    D = h_s.shape[-1]

    def ln(x, g, b):
        mean = jnp.mean(x, axis=-1, keepdims=True)
        var = jnp.mean(jnp.square(x - mean), axis=-1, keepdims=True)
        return (x - mean) * jax.lax.rsqrt(var + 1e-5) * g + b

    # ---------- layer 0: project_in into the depth-resident activation scratch ----------
    @pl.when(l == 0)
    def _():
        x = x_ref[...].reshape(rows, E).astype(jnp.bfloat16)
        h_s[...] = (jnp.dot(x, w_in_ref[...], preferred_element_type=jnp.float32)
                    + b_in_ref[...])

    h = h_s[...]                                            # (rows, D) f32
    cos = cos_ref[...]                                      # (T, dh)
    sin = sin_ref[...]                                      # (T, dh), sign-baked

    half = dh // 2

    def rotate_half(x):
        # Sign is baked into `sin`, so this is a pure half-rotation.
        if dh % 128 == 0:
            return pltpu.roll(x, half, axis=-1)             # single XLU op when lane-dense
        return jnp.concatenate([x[:, half:], x[:, :half]], axis=-1)

    def rope(x):
        return x * cos + rotate_half(x) * sin

    scale = dh ** -0.5

    # ---------------- pre-LN multi-head attention + residual ----------------
    hn = ln(h, ln1_g_ref[0], ln1_b_ref[0]).astype(jnp.bfloat16)
    # fused QKV matmul over all blocked batch rows: (rows, D) @ (D, 3*inner)
    qkv = jnp.dot(hn, wqkv_ref[0], preferred_element_type=jnp.float32)
    wo = wo_ref[0]                                          # (inner, D) bf16

    attn_rows = []
    for b in range(b_blk):                                  # attention stays per-batch
        qkv_b = qkv[b * T:(b + 1) * T, :]                   # (T, 3*inner), sublane slice
        acc_b = jnp.zeros((T, D), jnp.float32)
        for hd in range(heads):
            # scale folded into q before the score matmul
            q = (rope(qkv_b[:, hd * dh:(hd + 1) * dh]) * scale).astype(jnp.bfloat16)
            k = rope(qkv_b[:, inner + hd * dh: inner + (hd + 1) * dh]).astype(jnp.bfloat16)
            v = qkv_b[:, 2 * inner + hd * dh: 2 * inner + (hd + 1) * dh].astype(jnp.bfloat16)
            s = jax.lax.dot_general(q, k, (((1,), (1,)), ((), ())),
                                    preferred_element_type=jnp.float32)      # (T, T)
            m = jnp.max(s, axis=-1, keepdims=True)
            p = jnp.exp(s - m)
            p = p * pl.reciprocal(jnp.sum(p, axis=-1, keepdims=True), approx=True)
            o_h = jnp.dot(p.astype(jnp.bfloat16), v,
                          preferred_element_type=jnp.float32)                # (T, dh)
            # per-head accumulation into the output projection (no lane concat)
            acc_b = acc_b + jnp.dot(o_h.astype(jnp.bfloat16), wo[hd * dh:(hd + 1) * dh, :],
                                    preferred_element_type=jnp.float32)      # (T, D)
        attn_rows.append(acc_b)
    attn = attn_rows[0] if b_blk == 1 else jnp.concatenate(attn_rows, axis=0)
    h = h + attn + bo_ref[0]                                # residual, f32

    # ---------------- pre-LN SwiGLU feed-forward + residual -----------------
    hn2 = ln(h, ln2_g_ref[0], ln2_b_ref[0]).astype(jnp.bfloat16)
    u = jnp.dot(hn2, wff1_ref[0], preferred_element_type=jnp.float32) + bff1_ref[0]
    ffi = u.shape[-1] // 2
    xg = u[:, :ffi]
    gate = u[:, ffi:]
    ff = (xg * (gate * jax.nn.sigmoid(gate))).astype(jnp.bfloat16)   # x * swish(gate)
    h = h + jnp.dot(ff, wff2_ref[0], preferred_element_type=jnp.float32) + bff2_ref[0]
    h_s[...] = h                                             # carry to next depth step

    # -------- last layer: fused final LayerNorm + project_out (512-wide store) --------
    @pl.when(l == pl.num_programs(1) - 1)
    def _():
        hn_f = ln(h, fin_g_ref[...], fin_b_ref[...]).astype(jnp.bfloat16)
        out = (jnp.dot(hn_f, w_out_ref[...], preferred_element_type=jnp.float32)
               + b_out_ref[...])
        o_ref[...] = out.reshape(b_blk, T, -1)


def _pick_b_blk(B, T, target_rows=256, max_rows=2048):
    """Smallest divisor of B whose blocked row count reaches ~target_rows (MXU-friendly M),
    capped by a VMEM-friendly row budget.  For v7x megacore you may prefer B//b_blk >= 2."""
    best = 1
    for d in range(1, B + 1):
        if B % d:
            continue
        if d * T <= max_rows:
            best = d
        if d * T >= target_rows:
            break
    return best


def label_encoder_stack(x, params, cos, sin_signed, *, heads, dim_head, b_blk=None):
    """project_in -> depth transformer layers -> final LN -> project_out, one pallas_call."""
    B, T, E = x.shape
    D = params["proj_in_w"].shape[1]
    depth = params["wqkv"].shape[0]
    inner = heads * dim_head
    two_ffi = params["wff1"].shape[-1]
    ffi = params["wff2"].shape[1]
    N = params["proj_out_w"].shape[1]
    if b_blk is None:
        b_blk = _pick_b_blk(B, T)
    assert B % b_blk == 0

    bf16 = jnp.bfloat16
    kernel = functools.partial(_stack_kernel, heads=heads, dim_head=dim_head,
                               b_blk=b_blk, seq_len=T)

    return pl.pallas_call(
        kernel,
        out_shape=jax.ShapeDtypeStruct((B, T, N), jnp.float32),
        grid=(B // b_blk, depth),
        in_specs=[
            pl.BlockSpec((b_blk, T, E), lambda b, l: (b, 0, 0)),       # x (fetched once per b)
            pl.BlockSpec((E, D), lambda b, l: (0, 0)),                 # proj_in w (bf16)
            pl.BlockSpec((1, D), lambda b, l: (0, 0)),                 # proj_in b
            pl.BlockSpec((1, 1, D), lambda b, l: (l, 0, 0)),           # ln1 gamma
            pl.BlockSpec((1, 1, D), lambda b, l: (l, 0, 0)),           # ln1 beta
            pl.BlockSpec((1, D, 3 * inner), lambda b, l: (l, 0, 0)),   # wqkv (bf16)
            pl.BlockSpec((1, inner, D), lambda b, l: (l, 0, 0)),       # wo (bf16)
            pl.BlockSpec((1, 1, D), lambda b, l: (l, 0, 0)),           # bo
            pl.BlockSpec((1, 1, D), lambda b, l: (l, 0, 0)),           # ln2 gamma
            pl.BlockSpec((1, 1, D), lambda b, l: (l, 0, 0)),           # ln2 beta
            pl.BlockSpec((1, D, two_ffi), lambda b, l: (l, 0, 0)),     # wff1 (bf16)
            pl.BlockSpec((1, 1, two_ffi), lambda b, l: (l, 0, 0)),     # bff1
            pl.BlockSpec((1, ffi, D), lambda b, l: (l, 0, 0)),         # wff2 (bf16)
            pl.BlockSpec((1, 1, D), lambda b, l: (l, 0, 0)),           # bff2
            pl.BlockSpec((1, D), lambda b, l: (0, 0)),                 # final LN gamma
            pl.BlockSpec((1, D), lambda b, l: (0, 0)),                 # final LN beta
            pl.BlockSpec((D, N), lambda b, l: (0, 0)),                 # proj_out w (bf16)
            pl.BlockSpec((1, N), lambda b, l: (0, 0)),                 # proj_out b
            pl.BlockSpec((T, dim_head), lambda b, l: (0, 0)),          # rotary cos
            pl.BlockSpec((T, dim_head), lambda b, l: (0, 0)),          # rotary sin (signed)
        ],
        out_specs=pl.BlockSpec((b_blk, T, N), lambda b, l: (b, 0, 0)),  # depth-resident
        scratch_shapes=[pltpu.VMEM((b_blk * T, D), jnp.float32)],       # activation carry
        compiler_params=pltpu.CompilerParams(
            dimension_semantics=("parallel", "arbitrary"),
            vmem_limit_bytes=64 * 1024 * 1024),                          # v7x physical ceiling
    )(x,
      params["proj_in_w"].astype(bf16), params["proj_in_b"].reshape(1, D),
      params["ln1_g"].reshape(depth, 1, D), params["ln1_b"].reshape(depth, 1, D),
      params["wqkv"].astype(bf16),
      params["wo"].astype(bf16), params["bo"].reshape(depth, 1, D),
      params["ln2_g"].reshape(depth, 1, D), params["ln2_b"].reshape(depth, 1, D),
      params["wff1"].astype(bf16), params["bff1"].reshape(depth, 1, two_ffi),
      params["wff2"].astype(bf16), params["bff2"].reshape(depth, 1, D),
      params["final_ln_g"].reshape(1, D), params["final_ln_b"].reshape(1, D),
      params["proj_out_w"].astype(bf16), params["proj_out_b"].reshape(1, N),
      cos, sin_signed)


# ------------------------------- parameters --------------------------------


def init_params(key, E, D, heads, dim_head, depth, ff_mult=4, out_dim=512):
    def nrm(k, shape, scale=0.02):
        return scale * jax.random.normal(k, shape, jnp.float32)

    inner = heads * dim_head
    ffi = ff_mult * D
    keys = iter(jax.random.split(key, 16 + 16 * depth))
    params = {
        "label_emb_w": nrm(next(keys), (4, E)),
        "label_emb_b": nrm(next(keys), (E,)),
        "proj_in_w": nrm(next(keys), (E, D)),
        "proj_in_b": nrm(next(keys), (D,)),
        "final_ln_g": jnp.ones((D,), jnp.float32),
        "final_ln_b": jnp.zeros((D,), jnp.float32),
        "proj_out_w": nrm(next(keys), (D, out_dim)),
        "proj_out_b": nrm(next(keys), (out_dim,)),
        "logits_w": nrm(next(keys), (out_dim, 1)),     # Conv1d(512, 1, 1) weight
        "logits_b": nrm(next(keys), (1,)),
    }
    wqkv, wo, bo, wff1, bff1, wff2, bff2 = [], [], [], [], [], [], []
    for _ in range(depth):
        wq = nrm(next(keys), (D, inner))
        wk = nrm(next(keys), (D, inner))
        wv = nrm(next(keys), (D, inner))
        wqkv.append(jnp.concatenate([wq, wk, wv], axis=1))     # fused QKV projection
        wo.append(nrm(next(keys), (inner, D)))
        bo.append(nrm(next(keys), (D,)))
        wff1.append(nrm(next(keys), (D, 2 * ffi)))
        bff1.append(nrm(next(keys), (2 * ffi,)))
        wff2.append(nrm(next(keys), (ffi, D)))
        bff2.append(nrm(next(keys), (D,)))
    # depth-stacked per-layer weights (leading axis = layer, streamed by the depth grid axis)
    params.update({
        "ln1_g": jnp.ones((depth, D), jnp.float32), "ln1_b": jnp.zeros((depth, D), jnp.float32),
        "ln2_g": jnp.ones((depth, D), jnp.float32), "ln2_b": jnp.zeros((depth, D), jnp.float32),
        "wqkv": jnp.stack(wqkv), "wo": jnp.stack(wo), "bo": jnp.stack(bo),
        "wff1": jnp.stack(wff1), "bff1": jnp.stack(bff1),
        "wff2": jnp.stack(wff2), "bff2": jnp.stack(bff2),
    })
    return params


# --------------------------------- forward ---------------------------------


def label_encoder_forward(params, encoded_support_audio, support_labels_downsampled,
                          encoded_query_audio, *, E, D, heads, dim_head):
    B, _, Ts = encoded_support_audio.shape
    Tq = encoded_query_audio.shape[2]
    T = Ts + Tq

    # one-hot labels, rearranged to (b, c, t) exactly as in the reference
    sup_oh = jnp.transpose(
        jax.nn.one_hot(support_labels_downsampled, 4, dtype=jnp.float32), (0, 2, 1))
    qry_oh = jnp.transpose(
        jax.nn.one_hot(jnp.full((B, Tq), 3, jnp.int32), 4, dtype=jnp.float32), (0, 2, 1))

    # label_embedding = Linear(4, E) applied via the exact reshape pattern of the
    # reference.  K=4 matmul is MXU-hostile, so it stays a plain XLA op (perf review).
    sup_emb = (sup_oh.reshape(-1, 4) @ params["label_emb_w"]
               + params["label_emb_b"]).reshape(B, E, Ts)
    qry_emb = (qry_oh.reshape(-1, 4) @ params["label_emb_w"]
               + params["label_emb_b"]).reshape(B, E, Tq)

    support_cat = encoded_support_audio + sup_emb
    query_cat = encoded_query_audio + qry_emb
    x = jnp.concatenate([support_cat, query_cat], axis=2)    # (B, E, T)
    x = jnp.transpose(x, (0, 2, 1))                          # (B, T, E)

    # rotary tables (rotate-half convention); the rotate-half sign is baked into sin so the
    # kernel needs only a half-rotation and two multiplies per q/k.
    pos = jnp.arange(T, dtype=jnp.float32)
    inv_freq = 1.0 / (10000.0 ** (jnp.arange(0, dim_head, 2, dtype=jnp.float32) / dim_head))
    freqs = pos[:, None] * inv_freq[None, :]                  # (T, dh//2)
    cos = jnp.concatenate([jnp.cos(freqs), jnp.cos(freqs)], axis=-1)        # (T, dh)
    sin_signed = jnp.concatenate([-jnp.sin(freqs), jnp.sin(freqs)], axis=-1)

    # ---- fused transformer stack: one pallas_call for proj_in + all layers + final proj ----
    out = label_encoder_stack(x, params, cos, sin_signed,
                              heads=heads, dim_head=dim_head)  # (B, T, 512)

    confidences = out[:, Ts:, :]                              # (B, Tq, 512)
    # logits_head = Conv1d(512, 1, 1): N=1 output is fully lane-masked on TPU,
    # so it stays a plain XLA contraction (perf review).
    logits = (confidences @ params["logits_w"])[..., 0] + params["logits_b"][0]   # (B, Tq)
    return logits, confidences


# ----------------------------------- main -----------------------------------

if __name__ == "__main__":
    # small synthetic config: embedding_dim=32, label_encoder_dim=64, depth=2, heads=2
    # support_dur_sec*sr/scale_factor = 16, query_dur_sec*sr/scale_factor = 16
    E, D, heads, depth = 32, 64, 2, 2
    dim_head = D // heads
    B, Ts, Tq = 2, 16, 16

    key = jax.random.PRNGKey(0)
    kp, ks, kq, kl = jax.random.split(key, 4)
    params = init_params(kp, E, D, heads, dim_head, depth)

    encoded_support_audio = jax.random.normal(ks, (B, E, Ts), jnp.float32)
    encoded_query_audio = jax.random.normal(kq, (B, E, Tq), jnp.float32)
    support_labels_downsampled = jax.random.randint(kl, (B, Ts), 0, 4)

    fwd = jax.jit(functools.partial(
        label_encoder_forward, E=E, D=D, heads=heads, dim_head=dim_head))
    logits, confidences = fwd(params, encoded_support_audio,
                              support_labels_downsampled, encoded_query_audio)
    jax.block_until_ready((logits, confidences))

    assert logits.shape == (B, Tq), logits.shape
    assert confidences.shape == (B, Tq, 512), confidences.shape
    assert bool(jnp.all(jnp.isfinite(logits))), "non-finite logits"
    print("KERNEL_OK")
</pallas_src>

<mosaic_0001>
module attributes {stable_mosaic.version = 11 : i64} {
  func.func @_stack_kernel(%arg0: i32, %arg1: i32, %arg2: memref<2x32x32xf32, #tpu.memory_space<vmem>>, %arg3: memref<32x64xbf16, #tpu.memory_space<vmem>>, %arg4: memref<1x64xf32, #tpu.memory_space<vmem>>, %arg5: memref<1x1x64xf32, #tpu.memory_space<vmem>>, %arg6: memref<1x1x64xf32, #tpu.memory_space<vmem>>, %arg7: memref<1x64x192xbf16, #tpu.memory_space<vmem>>, %arg8: memref<1x64x64xbf16, #tpu.memory_space<vmem>>, %arg9: memref<1x1x64xf32, #tpu.memory_space<vmem>>, %arg10: memref<1x1x64xf32, #tpu.memory_space<vmem>>, %arg11: memref<1x1x64xf32, #tpu.memory_space<vmem>>, %arg12: memref<1x64x512xbf16, #tpu.memory_space<vmem>>, %arg13: memref<1x1x512xf32, #tpu.memory_space<vmem>>, %arg14: memref<1x256x64xbf16, #tpu.memory_space<vmem>>, %arg15: memref<1x1x64xf32, #tpu.memory_space<vmem>>, %arg16: memref<1x64xf32, #tpu.memory_space<vmem>>, %arg17: memref<1x64xf32, #tpu.memory_space<vmem>>, %arg18: memref<64x512xbf16, #tpu.memory_space<vmem>>, %arg19: memref<1x512xf32, #tpu.memory_space<vmem>>, %arg20: memref<32x32xf32, #tpu.memory_space<vmem>>, %arg21: memref<32x32xf32, #tpu.memory_space<vmem>>, %arg22: memref<2x32x512xf32, #tpu.memory_space<vmem>>, %arg23: memref<64x64xf32, #tpu.memory_space<vmem>>) attributes {dimension_semantics = [#tpu.dimension_semantics<parallel>, #tpu.dimension_semantics<arbitrary>], iteration_bounds = array<i64: 1, 2>, scalar_prefetch = 0 : i64, scratch_operands = 1 : i64, tpu.core_type = #tpu.core_type<tc>, window_params = [{transform_indices = @transform_0, window_bounds = array<i64: 2, 32, 32>}, {pipeline_mode = #tpu.pipeline_mode<synchronous>, transform_indices = @transform_1, window_bounds = array<i64: 32, 64>}, {pipeline_mode = #tpu.pipeline_mode<synchronous>, transform_indices = @transform_2, window_bounds = array<i64: 1, 64>}, {transform_indices = @transform_3, window_bounds = array<i64: 1, 1, 64>}, {transform_indices = @transform_4, window_bounds = array<i64: 1, 1, 64>}, {transform_indices = @transform_5, window_bounds = array<i64: 1, 64, 192>}, {transform_indices = @transform_6, window_bounds = array<i64: 1, 64, 64>}, {transform_indices = @transform_7, window_bounds = array<i64: 1, 1, 64>}, {transform_indices = @transform_8, window_bounds = array<i64: 1, 1, 64>}, {transform_indices = @transform_9, window_bounds = array<i64: 1, 1, 64>}, {transform_indices = @transform_10, window_bounds = array<i64: 1, 64, 512>}, {transform_indices = @transform_11, window_bounds = array<i64: 1, 1, 512>}, {transform_indices = @transform_12, window_bounds = array<i64: 1, 256, 64>}, {transform_indices = @transform_13, window_bounds = array<i64: 1, 1, 64>}, {pipeline_mode = #tpu.pipeline_mode<synchronous>, transform_indices = @transform_14, window_bounds = array<i64: 1, 64>}, {pipeline_mode = #tpu.pipeline_mode<synchronous>, transform_indices = @transform_15, window_bounds = array<i64: 1, 64>}, {pipeline_mode = #tpu.pipeline_mode<synchronous>, transform_indices = @transform_16, window_bounds = array<i64: 64, 512>}, {pipeline_mode = #tpu.pipeline_mode<synchronous>, transform_indices = @transform_17, window_bounds = array<i64: 1, 512>}, {pipeline_mode = #tpu.pipeline_mode<synchronous>, transform_indices = @transform_18, window_bounds = array<i64: 32, 32>}, {pipeline_mode = #tpu.pipeline_mode<synchronous>, transform_indices = @transform_19, window_bounds = array<i64: 32, 32>}, {transform_indices = @transform_20, window_bounds = array<i64: 2, 32, 512>}]} {
    %c0_i32 = arith.constant 0 : i32
    %0 = arith.cmpi eq, %arg1, %c0_i32 : i32
    %1 = arith.extui %0 : i1 to i32
    %c0_i32_0 = arith.constant 0 : i32
    %2 = arith.cmpi ne, %1, %c0_i32_0 : i32
    scf.if %2 {
      %c0_81 = arith.constant 0 : index
      %c0_82 = arith.constant 0 : index
      %c0_83 = arith.constant 0 : index
      %252 = vector.load %arg2[%c0_81, %c0_82, %c0_83] : memref<2x32x32xf32, #tpu.memory_space<vmem>>, vector<2x32x32xf32>
      %253 = vector.shape_cast %252 : vector<2x32x32xf32> to vector<64x32xf32>
      %254 = arith.truncf %253 : vector<64x32xf32> to vector<64x32xbf16>
      %c0_84 = arith.constant 0 : index
      %c0_85 = arith.constant 0 : index
      %255 = vector.load %arg3[%c0_84, %c0_85] : memref<32x64xbf16, #tpu.memory_space<vmem>>, vector<32x64xbf16>
      %cst_86 = arith.constant dense<0.000000e+00> : vector<64x64xf32>
      %256 = tpu.matmul %254, %255, %cst_86 {dimension_numbers = #tpu.dot_dimension_numbers<[1], [0], [0], [1], [0, 0, 1, 1], [], []>} : vector<64x32xbf16>, vector<32x64xbf16>, vector<64x64xf32> -> vector<64x64xf32>
      %c0_87 = arith.constant 0 : index
      %c0_88 = arith.constant 0 : index
      %257 = vector.load %arg4[%c0_87, %c0_88] : memref<1x64xf32, #tpu.memory_space<vmem>>, vector<1x64xf32>
      %258 = vector.broadcast %257 : vector<1x64xf32> to vector<64x64xf32>
      %259 = arith.addf %256, %258 : vector<64x64xf32>
      %c0_89 = arith.constant 0 : index
      %c0_90 = arith.constant 0 : index
      %260 = vector.load %arg23[%c0_89, %c0_90] : memref<64x64xf32, #tpu.memory_space<vmem>>, vector<64x64xf32>
      tpu.vector_store %arg23[%c0_89, %c0_90], %259 {strides = array<i32>} : memref<64x64xf32, #tpu.memory_space<vmem>>, vector<64x64xf32>,
    } else {
    }
    %c0 = arith.constant 0 : index
    %c0_1 = arith.constant 0 : index
    %3 = vector.load %arg23[%c0, %c0_1] : memref<64x64xf32, #tpu.memory_space<vmem>>, vector<64x64xf32>
    %c0_2 = arith.constant 0 : index
    %c0_3 = arith.constant 0 : index
    %4 = vector.load %arg20[%c0_2, %c0_3] : memref<32x32xf32, #tpu.memory_space<vmem>>, vector<32x32xf32>
    %c0_4 = arith.constant 0 : index
    %c0_5 = arith.constant 0 : index
    %5 = vector.load %arg21[%c0_4, %c0_5] : memref<32x32xf32, #tpu.memory_space<vmem>>, vector<32x32xf32>
    %c0_6 = arith.constant 0 : index
    %c0_7 = arith.constant 0 : index
    %c0_8 = arith.constant 0 : index
    %6 = vector.load %arg5[%c0_6, %c0_7, %c0_8] : memref<1x1x64xf32, #tpu.memory_space<vmem>>, vector<1x1x64xf32>
    %7 = vector.shape_cast %6 : vector<1x1x64xf32> to vector<1x64xf32>
    %c0_9 = arith.constant 0 : index
    %c0_10 = arith.constant 0 : index
    %c0_11 = arith.constant 0 : index
    %8 = vector.load %arg6[%c0_9, %c0_10, %c0_11] : memref<1x1x64xf32, #tpu.memory_space<vmem>>, vector<1x1x64xf32>
    %9 = vector.shape_cast %8 : vector<1x1x64xf32> to vector<1x64xf32>
    %cst = arith.constant dense<0.000000e+00> : vector<64xf32>
    %10 = vector.multi_reduction <add>, %3, %cst [1] : vector<64x64xf32> to vector<64xf32>
    %11 = vector.shape_cast %10 : vector<64xf32> to vector<64x1xf32>
    %cst_12 = arith.constant 6.400000e+01 : f32
    %12 = vector.broadcast %cst_12 : f32 to vector<64x1xf32>
    %13 = arith.divf %11, %12 : vector<64x1xf32>
    %14 = vector.broadcast %13 : vector<64x1xf32> to vector<64x64xf32>
    %15 = arith.subf %3, %14 : vector<64x64xf32>
    %16 = arith.mulf %15, %15 : vector<64x64xf32>
    %cst_13 = arith.constant dense<0.000000e+00> : vector<64xf32>
    %17 = vector.multi_reduction <add>, %16, %cst_13 [1] : vector<64x64xf32> to vector<64xf32>
    %18 = vector.shape_cast %17 : vector<64xf32> to vector<64x1xf32>
    %cst_14 = arith.constant 6.400000e+01 : f32
    %19 = vector.broadcast %cst_14 : f32 to vector<64x1xf32>
    %20 = arith.divf %18, %19 : vector<64x1xf32>
    %21 = vector.broadcast %13 : vector<64x1xf32> to vector<64x64xf32>
    %22 = arith.subf %3, %21 : vector<64x64xf32>
    %cst_15 = arith.constant 9.99999974E-6 : f32
    %23 = vector.broadcast %cst_15 : f32 to vector<64x1xf32>
    %24 = arith.addf %20, %23 : vector<64x1xf32>
    %25 = math.rsqrt %24 : vector<64x1xf32>
    %26 = vector.broadcast %25 : vector<64x1xf32> to vector<64x64xf32>
    %27 = arith.mulf %22, %26 : vector<64x64xf32>
    %28 = vector.broadcast %7 : vector<1x64xf32> to vector<64x64xf32>
    %29 = arith.mulf %27, %28 : vector<64x64xf32>
    %30 = vector.broadcast %9 : vector<1x64xf32> to vector<64x64xf32>
    %31 = arith.addf %29, %30 : vector<64x64xf32>
    %32 = arith.truncf %31 : vector<64x64xf32> to vector<64x64xbf16>
    %c0_16 = arith.constant 0 : index
    %c0_17 = arith.constant 0 : index
    %c0_18 = arith.constant 0 : index
    %33 = vector.load %arg7[%c0_16, %c0_17, %c0_18] : memref<1x64x192xbf16, #tpu.memory_space<vmem>>, vector<1x64x192xbf16>
    %34 = vector.shape_cast %33 : vector<1x64x192xbf16> to vector<64x192xbf16>
    %cst_19 = arith.constant dense<0.000000e+00> : vector<64x192xf32>
    %35 = tpu.matmul %32, %34, %cst_19 {dimension_numbers = #tpu.dot_dimension_numbers<[1], [0], [0], [1], [0, 0, 1, 1], [], []>} : vector<64x64xbf16>, vector<64x192xbf16>, vector<64x192xf32> -> vector<64x192xf32>
    %c0_20 = arith.constant 0 : index
    %c0_21 = arith.constant 0 : index
    %c0_22 = arith.constant 0 : index
    %36 = vector.load %arg8[%c0_20, %c0_21, %c0_22] : memref<1x64x64xbf16, #tpu.memory_space<vmem>>, vector<1x64x64xbf16>
    %37 = vector.shape_cast %36 : vector<1x64x64xbf16> to vector<64x64xbf16>
    %38 = vector.extract_strided_slice %35 {offsets = [0, 0], sizes = [32, 192], strides = [1, 1]} : vector<64x192xf32> to vector<32x192xf32>
    %cst_23 = arith.constant 0.000000e+00 : f32
    %39 = vector.broadcast %cst_23 : f32 to vector<32x64xf32>
    %40 = vector.extract_strided_slice %38 {offsets = [0, 0], sizes = [32, 32], strides = [1, 1]} : vector<32x192xf32> to vector<32x32xf32>
    %41 = arith.mulf %40, %4 : vector<32x32xf32>
    %42 = vector.extract_strided_slice %40 {offsets = [0, 16], sizes = [32, 16], strides = [1, 1]} : vector<32x32xf32> to vector<32x16xf32>
    %43 = vector.extract_strided_slice %40 {offsets = [0, 0], sizes = [32, 16], strides = [1, 1]} : vector<32x32xf32> to vector<32x16xf32>
    %44 = tpu.concatenate %42, %43 in 1 : vector<32x16xf32>, vector<32x16xf32> -> vector<32x32xf32>
    %45 = arith.mulf %44, %5 : vector<32x32xf32>
    %46 = arith.addf %41, %45 : vector<32x32xf32>
    %cst_24 = arith.constant 0.176776692 : f32
    %47 = vector.broadcast %cst_24 : f32 to vector<32x32xf32>
    %48 = arith.mulf %46, %47 : vector<32x32xf32>
    %49 = arith.truncf %48 : vector<32x32xf32> to vector<32x32xbf16>
    %50 = vector.extract_strided_slice %38 {offsets = [0, 64], sizes = [32, 32], strides = [1, 1]} : vector<32x192xf32> to vector<32x32xf32>
    %51 = arith.mulf %50, %4 : vector<32x32xf32>
    %52 = vector.extract_strided_slice %50 {offsets = [0, 16], sizes = [32, 16], strides = [1, 1]} : vector<32x32xf32> to vector<32x16xf32>
    %53 = vector.extract_strided_slice %50 {offsets = [0, 0], sizes = [32, 16], strides = [1, 1]} : vector<32x32xf32> to vector<32x16xf32>
    %54 = tpu.concatenate %52, %53 in 1 : vector<32x16xf32>, vector<32x16xf32> -> vector<32x32xf32>
    %55 = arith.mulf %54, %5 : vector<32x32xf32>
    %56 = arith.addf %51, %55 : vector<32x32xf32>
    %57 = arith.truncf %56 : vector<32x32xf32> to vector<32x32xbf16>
    %58 = vector.extract_strided_slice %38 {offsets = [0, 128], sizes = [32, 32], strides = [1, 1]} : vector<32x192xf32> to vector<32x32xf32>
    %59 = arith.truncf %58 : vector<32x32xf32> to vector<32x32xbf16>
    %cst_25 = arith.constant dense<0.000000e+00> : vector<32x32xf32>
    %60 = tpu.matmul %49, %57, %cst_25 {dimension_numbers = #tpu.dot_dimension_numbers<[1], [1], [0], [0], [0, 0, 1, 0], [], []>} : vector<32x32xbf16>, vector<32x32xbf16>, vector<32x32xf32> -> vector<32x32xf32>
    %cst_26 = arith.constant dense<0xFF800000> : vector<32xf32>
    %61 = vector.multi_reduction <maximumf>, %60, %cst_26 [1] : vector<32x32xf32> to vector<32xf32>
    %62 = vector.shape_cast %61 : vector<32xf32> to vector<32x1xf32>
    %63 = vector.broadcast %62 : vector<32x1xf32> to vector<32x32xf32>
    %64 = arith.subf %60, %63 : vector<32x32xf32>
    %65 = math.exp %64 : vector<32x32xf32>
    %cst_27 = arith.constant dense<0.000000e+00> : vector<32xf32>
    %66 = vector.multi_reduction <add>, %65, %cst_27 [1] : vector<32x32xf32> to vector<32xf32>
    %67 = vector.shape_cast %66 : vector<32xf32> to vector<32x1xf32>
    %68 = tpu.reciprocal %67 {approx = true} : vector<32x1xf32> -> vector<32x1xf32>
    %69 = vector.broadcast %68 : vector<32x1xf32> to vector<32x32xf32>
    %70 = arith.mulf %65, %69 : vector<32x32xf32>
    %71 = arith.truncf %70 : vector<32x32xf32> to vector<32x32xbf16>
    %cst_28 = arith.constant dense<0.000000e+00> : vector<32x32xf32>
    %72 = tpu.matmul %71, %59, %cst_28 {dimension_numbers = #tpu.dot_dimension_numbers<[1], [0], [0], [1], [0, 0, 1, 1], [], []>} : vector<32x32xbf16>, vector<32x32xbf16>, vector<32x32xf32> -> vector<32x32xf32>
    %73 = arith.truncf %72 : vector<32x32xf32> to vector<32x32xbf16>
    %74 = vector.extract_strided_slice %37 {offsets = [0, 0], sizes = [32, 64], strides = [1, 1]} : vector<64x64xbf16> to vector<32x64xbf16>
    %cst_29 = arith.constant dense<0.000000e+00> : vector<32x64xf32>
    %75 = tpu.matmul %73, %74, %cst_29 {dimension_numbers = #tpu.dot_dimension_numbers<[1], [0], [0], [1], [0, 0, 1, 1], [], []>} : vector<32x32xbf16>, vector<32x64xbf16>, vector<32x64xf32> -> vector<32x64xf32>
    %76 = arith.addf %39, %75 : vector<32x64xf32>
    %77 = vector.extract_strided_slice %38 {offsets = [0, 32], sizes = [32, 32], strides = [1, 1]} : vector<32x192xf32> to vector<32x32xf32>
    %78 = arith.mulf %77, %4 : vector<32x32xf32>
    %79 = vector.extract_strided_slice %77 {offsets = [0, 16], sizes = [32, 16], strides = [1, 1]} : vector<32x32xf32> to vector<32x16xf32>
    %80 = vector.extract_strided_slice %77 {offsets = [0, 0], sizes = [32, 16], strides = [1, 1]} : vector<32x32xf32> to vector<32x16xf32>
    %81 = tpu.concatenate %79, %80 in 1 : vector<32x16xf32>, vector<32x16xf32> -> vector<32x32xf32>
    %82 = arith.mulf %81, %5 : vector<32x32xf32>
    %83 = arith.addf %78, %82 : vector<32x32xf32>
    %cst_30 = arith.constant 0.176776692 : f32
    %84 = vector.broadcast %cst_30 : f32 to vector<32x32xf32>
    %85 = arith.mulf %83, %84 : vector<32x32xf32>
    %86 = arith.truncf %85 : vector<32x32xf32> to vector<32x32xbf16>
    %87 = vector.extract_strided_slice %38 {offsets = [0, 96], sizes = [32, 32], strides = [1, 1]} : vector<32x192xf32> to vector<32x32xf32>
    %88 = arith.mulf %87, %4 : vector<32x32xf32>
    %89 = vector.extract_strided_slice %87 {offsets = [0, 16], sizes = [32, 16], strides = [1, 1]} : vector<32x32xf32> to vector<32x16xf32>
    %90 = vector.extract_strided_slice %87 {offsets = [0, 0], sizes = [32, 16], strides = [1, 1]} : vector<32x32xf32> to vector<32x16xf32>
    %91 = tpu.concatenate %89, %90 in 1 : vector<32x16xf32>, vector<32x16xf32> -> vector<32x32xf32>
    %92 = arith.mulf %91, %5 : vector<32x32xf32>
    %93 = arith.addf %88, %92 : vector<32x32xf32>
    %94 = arith.truncf %93 : vector<32x32xf32> to vector<32x32xbf16>
    %95 = vector.extract_strided_slice %38 {offsets = [0, 160], sizes = [32, 32], strides = [1, 1]} : vector<32x192xf32> to vector<32x32xf32>
    %96 = arith.truncf %95 : vector<32x32xf32> to vector<32x32xbf16>
    %cst_31 = arith.constant dense<0.000000e+00> : vector<32x32xf32>
    %97 = tpu.matmul %86, %94, %cst_31 {dimension_numbers = #tpu.dot_dimension_numbers<[1], [1], [0], [0], [0, 0, 1, 0], [], []>} : vector<32x32xbf16>, vector<32x32xbf16>, vector<32x32xf32> -> vector<32x32xf32>
    %cst_32 = arith.constant dense<0xFF800000> : vector<32xf32>
    %98 = vector.multi_reduction <maximumf>, %97, %cst_32 [1] : vector<32x32xf32> to vector<32xf32>
    %99 = vector.shape_cast %98 : vector<32xf32> to vector<32x1xf32>
    %100 = vector.broadcast %99 : vector<32x1xf32> to vector<32x32xf32>
    %101 = arith.subf %97, %100 : vector<32x32xf32>
    %102 = math.exp %101 : vector<32x32xf32>
    %cst_33 = arith.constant dense<0.000000e+00> : vector<32xf32>
    %103 = vector.multi_reduction <add>, %102, %cst_33 [1] : vector<32x32xf32> to vector<32xf32>
    %104 = vector.shape_cast %103 : vector<32xf32> to vector<32x1xf32>
    %105 = tpu.reciprocal %104 {approx = true} : vector<32x1xf32> -> vector<32x1xf32>
    %106 = vector.broadcast %105 : vector<32x1xf32> to vector<32x32xf32>
    %107 = arith.mulf %102, %106 : vector<32x32xf32>
    %108 = arith.truncf %107 : vector<32x32xf32> to vector<32x32xbf16>
    %cst_34 = arith.constant dense<0.000000e+00> : vector<32x32xf32>
    %109 = tpu.matmul %108, %96, %cst_34 {dimension_numbers = #tpu.dot_dimension_numbers<[1], [0], [0], [1], [0, 0, 1, 1], [], []>} : vector<32x32xbf16>, vector<32x32xbf16>, vector<32x32xf32> -> vector<32x32xf32>
    %110 = arith.truncf %109 : vector<32x32xf32> to vector<32x32xbf16>
    %111 = vector.extract_strided_slice %37 {offsets = [32, 0], sizes = [32, 64], strides = [1, 1]} : vector<64x64xbf16> to vector<32x64xbf16>
    %cst_35 = arith.constant dense<0.000000e+00> : vector<32x64xf32>
    %112 = tpu.matmul %110, %111, %cst_35 {dimension_numbers = #tpu.dot_dimension_numbers<[1], [0], [0], [1], [0, 0, 1, 1], [], []>} : vector<32x32xbf16>, vector<32x64xbf16>, vector<32x64xf32> -> vector<32x64xf32>
    %113 = arith.addf %76, %112 : vector<32x64xf32>
    %114 = vector.extract_strided_slice %35 {offsets = [32, 0], sizes = [32, 192], strides = [1, 1]} : vector<64x192xf32> to vector<32x192xf32>
    %cst_36 = arith.constant 0.000000e+00 : f32
    %115 = vector.broadcast %cst_36 : f32 to vector<32x64xf32>
    %116 = vector.extract_strided_slice %114 {offsets = [0, 0], sizes = [32, 32], strides = [1, 1]} : vector<32x192xf32> to vector<32x32xf32>
    %117 = arith.mulf %116, %4 : vector<32x32xf32>
    %118 = vector.extract_strided_slice %116 {offsets = [0, 16], sizes = [32, 16], strides = [1, 1]} : vector<32x32xf32> to vector<32x16xf32>
    %119 = vector.extract_strided_slice %116 {offsets = [0, 0], sizes = [32, 16], strides = [1, 1]} : vector<32x32xf32> to vector<32x16xf32>
    %120 = tpu.concatenate %118, %119 in 1 : vector<32x16xf32>, vector<32x16xf32> -> vector<32x32xf32>
    %121 = arith.mulf %120, %5 : vector<32x32xf32>
    %122 = arith.addf %117, %121 : vector<32x32xf32>
    %cst_37 = arith.constant 0.176776692 : f32
    %123 = vector.broadcast %cst_37 : f32 to vector<32x32xf32>
    %124 = arith.mulf %122, %123 : vector<32x32xf32>
    %125 = arith.truncf %124 : vector<32x32xf32> to vector<32x32xbf16>
    %126 = vector.extract_strided_slice %114 {offsets = [0, 64], sizes = [32, 32], strides = [1, 1]} : vector<32x192xf32> to vector<32x32xf32>
    %127 = arith.mulf %126, %4 : vector<32x32xf32>
    %128 = vector.extract_strided_slice %126 {offsets = [0, 16], sizes = [32, 16], strides = [1, 1]} : vector<32x32xf32> to vector<32x16xf32>
    %129 = vector.extract_strided_slice %126 {offsets = [0, 0], sizes = [32, 16], strides = [1, 1]} : vector<32x32xf32> to vector<32x16xf32>
    %130 = tpu.concatenate %128, %129 in 1 : vector<32x16xf32>, vector<32x16xf32> -> vector<32x32xf32>
    %131 = arith.mulf %130, %5 : vector<32x32xf32>
    %132 = arith.addf %127, %131 : vector<32x32xf32>
    %133 = arith.truncf %132 : vector<32x32xf32> to vector<32x32xbf16>
    %134 = vector.extract_strided_slice %114 {offsets = [0, 128], sizes = [32, 32], strides = [1, 1]} : vector<32x192xf32> to vector<32x32xf32>
    %135 = arith.truncf %134 : vector<32x32xf32> to vector<32x32xbf16>
    %cst_38 = arith.constant dense<0.000000e+00> : vector<32x32xf32>
    %136 = tpu.matmul %125, %133, %cst_38 {dimension_numbers = #tpu.dot_dimension_numbers<[1], [1], [0], [0], [0, 0, 1, 0], [], []>} : vector<32x32xbf16>, vector<32x32xbf16>, vector<32x32xf32> -> vector<32x32xf32>
    %cst_39 = arith.constant dense<0xFF800000> : vector<32xf32>
    %137 = vector.multi_reduction <maximumf>, %136, %cst_39 [1] : vector<32x32xf32> to vector<32xf32>
    %138 = vector.shape_cast %137 : vector<32xf32> to vector<32x1xf32>
    %139 = vector.broadcast %138 : vector<32x1xf32> to vector<32x32xf32>
    %140 = arith.subf %136, %139 : vector<32x32xf32>
    %141 = math.exp %140 : vector<32x32xf32>
    %cst_40 = arith.constant dense<0.000000e+00> : vector<32xf32>
    %142 = vector.multi_reduction <add>, %141, %cst_40 [1] : vector<32x32xf32> to vector<32xf32>
    %143 = vector.shape_cast %142 : vector<32xf32> to vector<32x1xf32>
    %144 = tpu.reciprocal %143 {approx = true} : vector<32x1xf32> -> vector<32x1xf32>
    %145 = vector.broadcast %144 : vector<32x1xf32> to vector<32x32xf32>
    %146 = arith.mulf %141, %145 : vector<32x32xf32>
    %147 = arith.truncf %146 : vector<32x32xf32> to vector<32x32xbf16>
    %cst_41 = arith.constant dense<0.000000e+00> : vector<32x32xf32>
    %148 = tpu.matmul %147, %135, %cst_41 {dimension_numbers = #tpu.dot_dimension_numbers<[1], [0], [0], [1], [0, 0, 1, 1], [], []>} : vector<32x32xbf16>, vector<32x32xbf16>, vector<32x32xf32> -> vector<32x32xf32>
    %149 = arith.truncf %148 : vector<32x32xf32> to vector<32x32xbf16>
    %150 = vector.extract_strided_slice %37 {offsets = [0, 0], sizes = [32, 64], strides = [1, 1]} : vector<64x64xbf16> to vector<32x64xbf16>
    %cst_42 = arith.constant dense<0.000000e+00> : vector<32x64xf32>
    %151 = tpu.matmul %149, %150, %cst_42 {dimension_numbers = #tpu.dot_dimension_numbers<[1], [0], [0], [1], [0, 0, 1, 1], [], []>} : vector<32x32xbf16>, vector<32x64xbf16>, vector<32x64xf32> -> vector<32x64xf32>
    %152 = arith.addf %115, %151 : vector<32x64xf32>
    %153 = vector.extract_strided_slice %114 {offsets = [0, 32], sizes = [32, 32], strides = [1, 1]} : vector<32x192xf32> to vector<32x32xf32>
    %154 = arith.mulf %153, %4 : vector<32x32xf32>
    %155 = vector.extract_strided_slice %153 {offsets = [0, 16], sizes = [32, 16], strides = [1, 1]} : vector<32x32xf32> to vector<32x16xf32>
    %156 = vector.extract_strided_slice %153 {offsets = [0, 0], sizes = [32, 16], strides = [1, 1]} : vector<32x32xf32> to vector<32x16xf32>
    %157 = tpu.concatenate %155, %156 in 1 : vector<32x16xf32>, vector<32x16xf32> -> vector<32x32xf32>
    %158 = arith.mulf %157, %5 : vector<32x32xf32>
    %159 = arith.addf %154, %158 : vector<32x32xf32>
    %cst_43 = arith.constant 0.176776692 : f32
    %160 = vector.broadcast %cst_43 : f32 to vector<32x32xf32>
    %161 = arith.mulf %159, %160 : vector<32x32xf32>
    %162 = arith.truncf %161 : vector<32x32xf32> to vector<32x32xbf16>
    %163 = vector.extract_strided_slice %114 {offsets = [0, 96], sizes = [32, 32], strides = [1, 1]} : vector<32x192xf32> to vector<32x32xf32>
    %164 = arith.mulf %163, %4 : vector<32x32xf32>
    %165 = vector.extract_strided_slice %163 {offsets = [0, 16], sizes = [32, 16], strides = [1, 1]} : vector<32x32xf32> to vector<32x16xf32>
    %166 = vector.extract_strided_slice %163 {offsets = [0, 0], sizes = [32, 16], strides = [1, 1]} : vector<32x32xf32> to vector<32x16xf32>
    %167 = tpu.concatenate %165, %166 in 1 : vector<32x16xf32>, vector<32x16xf32> -> vector<32x32xf32>
    %168 = arith.mulf %167, %5 : vector<32x32xf32>
    %169 = arith.addf %164, %168 : vector<32x32xf32>
    %170 = arith.truncf %169 : vector<32x32xf32> to vector<32x32xbf16>
    %171 = vector.extract_strided_slice %114 {offsets = [0, 160], sizes = [32, 32], strides = [1, 1]} : vector<32x192xf32> to vector<32x32xf32>
    %172 = arith.truncf %171 : vector<32x32xf32> to vector<32x32xbf16>
    %cst_44 = arith.constant dense<0.000000e+00> : vector<32x32xf32>
    %173 = tpu.matmul %162, %170, %cst_44 {dimension_numbers = #tpu.dot_dimension_numbers<[1], [1], [0], [0], [0, 0, 1, 0], [], []>} : vector<32x32xbf16>, vector<32x32xbf16>, vector<32x32xf32> -> vector<32x32xf32>
    %cst_45 = arith.constant dense<0xFF800000> : vector<32xf32>
    %174 = vector.multi_reduction <maximumf>, %173, %cst_45 [1] : vector<32x32xf32> to vector<32xf32>
    %175 = vector.shape_cast %174 : vector<32xf32> to vector<32x1xf32>
    %176 = vector.broadcast %175 : vector<32x1xf32> to vector<32x32xf32>
    %177 = arith.subf %173, %176 : vector<32x32xf32>
    %178 = math.exp %177 : vector<32x32xf32>
    %cst_46 = arith.constant dense<0.000000e+00> : vector<32xf32>
    %179 = vector.multi_reduction <add>, %178, %cst_46 [1] : vector<32x32xf32> to vector<32xf32>
    %180 = vector.shape_cast %179 : vector<32xf32> to vector<32x1xf32>
    %181 = tpu.reciprocal %180 {approx = true} : vector<32x1xf32> -> vector<32x1xf32>
    %182 = vector.broadcast %181 : vector<32x1xf32> to vector<32x32xf32>
    %183 = arith.mulf %178, %182 : vector<32x32xf32>
    %184 = arith.truncf %183 : vector<32x32xf32> to vector<32x32xbf16>
    %cst_47 = arith.constant dense<0.000000e+00> : vector<32x32xf32>
    %185 = tpu.matmul %184, %172, %cst_47 {dimension_numbers = #tpu.dot_dimension_numbers<[1], [0], [0], [1], [0, 0, 1, 1], [], []>} : vector<32x32xbf16>, vector<32x32xbf16>, vector<32x32xf32> -> vector<32x32xf32>
    %186 = arith.truncf %185 : vector<32x32xf32> to vector<32x32xbf16>
    %187 = vector.extract_strided_slice %37 {offsets = [32, 0], sizes = [32, 64], strides = [1, 1]} : vector<64x64xbf16> to vector<32x64xbf16>
    %cst_48 = arith.constant dense<0.000000e+00> : vector<32x64xf32>
    %188 = tpu.matmul %186, %187, %cst_48 {dimension_numbers = #tpu.dot_dimension_numbers<[1], [0], [0], [1], [0, 0, 1, 1], [], []>} : vector<32x32xbf16>, vector<32x64xbf16>, vector<32x64xf32> -> vector<32x64xf32>
    %189 = arith.addf %152, %188 : vector<32x64xf32>
    %190 = tpu.concatenate %113, %189 in 0 : vector<32x64xf32>, vector<32x64xf32> -> vector<64x64xf32>
    %191 = arith.addf %3, %190 : vector<64x64xf32>
    %c0_49 = arith.constant 0 : index
    %c0_50 = arith.constant 0 : index
    %c0_51 = arith.constant 0 : index
    %192 = vector.load %arg9[%c0_49, %c0_50, %c0_51] : memref<1x1x64xf32, #tpu.memory_space<vmem>>, vector<1x1x64xf32>
    %193 = vector.shape_cast %192 : vector<1x1x64xf32> to vector<1x64xf32>
    %194 = vector.broadcast %193 : vector<1x64xf32> to vector<64x64xf32>
    %195 = arith.addf %191, %194 : vector<64x64xf32>
    %c0_52 = arith.constant 0 : index
    %c0_53 = arith.constant 0 : index
    %c0_54 = arith.constant 0 : index
    %196 = vector.load %arg10[%c0_52, %c0_53, %c0_54] : memref<1x1x64xf32, #tpu.memory_space<vmem>>, vector<1x1x64xf32>
    %197 = vector.shape_cast %196 : vector<1x1x64xf32> to vector<1x64xf32>
    %c0_55 = arith.constant 0 : index
    %c0_56 = arith.constant 0 : index
    %c0_57 = arith.constant 0 : index
    %198 = vector.load %arg11[%c0_55, %c0_56, %c0_57] : memref<1x1x64xf32, #tpu.memory_space<vmem>>, vector<1x1x64xf32>
    %199 = vector.shape_cast %198 : vector<1x1x64xf32> to vector<1x64xf32>
    %cst_58 = arith.constant dense<0.000000e+00> : vector<64xf32>
    %200 = vector.multi_reduction <add>, %195, %cst_58 [1] : vector<64x64xf32> to vector<64xf32>
    %201 = vector.shape_cast %200 : vector<64xf32> to vector<64x1xf32>
    %cst_59 = arith.constant 6.400000e+01 : f32
    %202 = vector.broadcast %cst_59 : f32 to vector<64x1xf32>
    %203 = arith.divf %201, %202 : vector<64x1xf32>
    %204 = vector.broadcast %203 : vector<64x1xf32> to vector<64x64xf32>
    %205 = arith.subf %195, %204 : vector<64x64xf32>
    %206 = arith.mulf %205, %205 : vector<64x64xf32>
    %cst_60 = arith.constant dense<0.000000e+00> : vector<64xf32>
    %207 = vector.multi_reduction <add>, %206, %cst_60 [1] : vector<64x64xf32> to vector<64xf32>
    %208 = vector.shape_cast %207 : vector<64xf32> to vector<64x1xf32>
    %cst_61 = arith.constant 6.400000e+01 : f32
    %209 = vector.broadcast %cst_61 : f32 to vector<64x1xf32>
    %210 = arith.divf %208, %209 : vector<64x1xf32>
    %211 = vector.broadcast %203 : vector<64x1xf32> to vector<64x64xf32>
    %212 = arith.subf %195, %211 : vector<64x64xf32>
    %cst_62 = arith.constant 9.99999974E-6 : f32
    %213 = vector.broadcast %cst_62 : f32 to vector<64x1xf32>
    %214 = arith.addf %210, %213 : vector<64x1xf32>
    %215 = math.rsqrt %214 : vector<64x1xf32>
    %216 = vector.broadcast %215 : vector<64x1xf32> to vector<64x64xf32>
    %217 = arith.mulf %212, %216 : vector<64x64xf32>
    %218 = vector.broadcast %197 : vector<1x64xf32> to vector<64x64xf32>
    %219 = arith.mulf %217, %218 : vector<64x64xf32>
    %220 = vector.broadcast %199 : vector<1x64xf32> to vector<64x64xf32>
    %221 = arith.addf %219, %220 : vector<64x64xf32>
    %222 = arith.truncf %221 : vector<64x64xf32> to vector<64x64xbf16>
    %c0_63 = arith.constant 0 : index
    %c0_64 = arith.constant 0 : index
    %c0_65 = arith.constant 0 : index
    %223 = vector.load %arg12[%c0_63, %c0_64, %c0_65] : memref<1x64x512xbf16, #tpu.memory_space<vmem>>, vector<1x64x512xbf16>
    %224 = vector.shape_cast %223 : vector<1x64x512xbf16> to vector<64x512xbf16>
    %cst_66 = arith.constant dense<0.000000e+00> : vector<64x512xf32>
    %225 = tpu.matmul %222, %224, %cst_66 {dimension_numbers = #tpu.dot_dimension_numbers<[1], [0], [0], [1], [0, 0, 1, 1], [], []>} : vector<64x64xbf16>, vector<64x512xbf16>, vector<64x512xf32> -> vector<64x512xf32>
    %c0_67 = arith.constant 0 : index
    %c0_68 = arith.constant 0 : index
    %c0_69 = arith.constant 0 : index
    %226 = vector.load %arg13[%c0_67, %c0_68, %c0_69] : memref<1x1x512xf32, #tpu.memory_space<vmem>>, vector<1x1x512xf32>
    %227 = vector.shape_cast %226 : vector<1x1x512xf32> to vector<1x512xf32>
    %228 = vector.broadcast %227 : vector<1x512xf32> to vector<64x512xf32>
    %229 = arith.addf %225, %228 : vector<64x512xf32>
    %230 = vector.extract_strided_slice %229 {offsets = [0, 0], sizes = [64, 256], strides = [1, 1]} : vector<64x512xf32> to vector<64x256xf32>
    %231 = vector.extract_strided_slice %229 {offsets = [0, 256], sizes = [64, 256], strides = [1, 1]} : vector<64x512xf32> to vector<64x256xf32>
    %232 = arith.negf %231 : vector<64x256xf32>
    %233 = math.exp %232 : vector<64x256xf32>
    %cst_70 = arith.constant 1.000000e+00 : f32
    %234 = vector.broadcast %cst_70 : f32 to vector<64x256xf32>
    %235 = arith.addf %234, %233 : vector<64x256xf32>
    %236 = arith.divf %234, %235 : vector<64x256xf32>
    %237 = arith.mulf %231, %236 : vector<64x256xf32>
    %238 = arith.mulf %230, %237 : vector<64x256xf32>
    %239 = arith.truncf %238 : vector<64x256xf32> to vector<64x256xbf16>
    %c0_71 = arith.constant 0 : index
    %c0_72 = arith.constant 0 : index
    %c0_73 = arith.constant 0 : index
    %240 = vector.load %arg14[%c0_71, %c0_72, %c0_73] : memref<1x256x64xbf16, #tpu.memory_space<vmem>>, vector<1x256x64xbf16>
    %241 = vector.shape_cast %240 : vector<1x256x64xbf16> to vector<256x64xbf16>
    %cst_74 = arith.constant dense<0.000000e+00> : vector<64x64xf32>
    %242 = tpu.matmul %239, %241, %cst_74 {dimension_numbers = #tpu.dot_dimension_numbers<[1], [0], [0], [1], [0, 0, 1, 1], [], []>} : vector<64x256xbf16>, vector<256x64xbf16>, vector<64x64xf32> -> vector<64x64xf32>
    %243 = arith.addf %195, %242 : vector<64x64xf32>
    %c0_75 = arith.constant 0 : index
    %c0_76 = arith.constant 0 : index
    %c0_77 = arith.constant 0 : index
    %244 = vector.load %arg15[%c0_75, %c0_76, %c0_77] : memref<1x1x64xf32, #tpu.memory_space<vmem>>, vector<1x1x64xf32>
    %245 = vector.shape_cast %244 : vector<1x1x64xf32> to vector<1x64xf32>
    %246 = vector.broadcast %245 : vector<1x64xf32> to vector<64x64xf32>
    %247 = arith.addf %243, %246 : vector<64x64xf32>
    %c0_78 = arith.constant 0 : index
    %c0_79 = arith.constant 0 : index
    %248 = vector.load %arg23[%c0_78, %c0_79] : memref<64x64xf32, #tpu.memory_space<vmem>>, vector<64x64xf32>
    tpu.vector_store %arg23[%c0_78, %c0_79], %247 {strides = array<i32>} : memref<64x64xf32, #tpu.memory_space<vmem>>, vector<64x64xf32>,
    %c1_i32 = arith.constant 1 : i32
    %249 = arith.cmpi eq, %arg1, %c1_i32 : i32
    %250 = arith.extui %249 : i1 to i32
    %c0_i32_80 = arith.constant 0 : i32
    %251 = arith.cmpi ne, %250, %c0_i32_80 : i32
    scf.if %251 {
      %c0_81 = arith.constant 0 : index
      %c0_82 = arith.constant 0 : index
      %252 = vector.load %arg16[%c0_81, %c0_82] : memref<1x64xf32, #tpu.memory_space<vmem>>, vector<1x64xf32>
      %c0_83 = arith.constant 0 : index
      %c0_84 = arith.constant 0 : index
      %253 = vector.load %arg17[%c0_83, %c0_84] : memref<1x64xf32, #tpu.memory_space<vmem>>, vector<1x64xf32>
      %cst_85 = arith.constant dense<0.000000e+00> : vector<64xf32>
      %254 = vector.multi_reduction <add>, %247, %cst_85 [1] : vector<64x64xf32> to vector<64xf32>
      %255 = vector.shape_cast %254 : vector<64xf32> to vector<64x1xf32>
      %cst_86 = arith.constant 6.400000e+01 : f32
      %256 = vector.broadcast %cst_86 : f32 to vector<64x1xf32>
      %257 = arith.divf %255, %256 : vector<64x1xf32>
      %258 = vector.broadcast %257 : vector<64x1xf32> to vector<64x64xf32>
      %259 = arith.subf %247, %258 : vector<64x64xf32>
      %260 = arith.mulf %259, %259 : vector<64x64xf32>
      %cst_87 = arith.constant dense<0.000000e+00> : vector<64xf32>
      %261 = vector.multi_reduction <add>, %260, %cst_87 [1] : vector<64x64xf32> to vector<64xf32>
      %262 = vector.shape_cast %261 : vector<64xf32> to vector<64x1xf32>
      %cst_88 = arith.constant 6.400000e+01 : f32
      %263 = vector.broadcast %cst_88 : f32 to vector<64x1xf32>
      %264 = arith.divf %262, %263 : vector<64x1xf32>
      %265 = vector.broadcast %257 : vector<64x1xf32> to vector<64x64xf32>
      %266 = arith.subf %247, %265 : vector<64x64xf32>
      %cst_89 = arith.constant 9.99999974E-6 : f32
      %267 = vector.broadcast %cst_89 : f32 to vector<64x1xf32>
      %268 = arith.addf %264, %267 : vector<64x1xf32>
      %269 = math.rsqrt %268 : vector<64x1xf32>
      %270 = vector.broadcast %269 : vector<64x1xf32> to vector<64x64xf32>
      %271 = arith.mulf %266, %270 : vector<64x64xf32>
      %272 = vector.broadcast %252 : vector<1x64xf32> to vector<64x64xf32>
      %273 = arith.mulf %271, %272 : vector<64x64xf32>
      %274 = vector.broadcast %253 : vector<1x64xf32> to vector<64x64xf32>
      %275 = arith.addf %273, %274 : vector<64x64xf32>
      %276 = arith.truncf %275 : vector<64x64xf32> to vector<64x64xbf16>
      %c0_90 = arith.constant 0 : index
      %c0_91 = arith.constant 0 : index
      %277 = vector.load %arg18[%c0_90, %c0_91] : memref<64x512xbf16, #tpu.memory_space<vmem>>, vector<64x512xbf16>
      %cst_92 = arith.constant dense<0.000000e+00> : vector<64x512xf32>
      %278 = tpu.matmul %276, %277, %cst_92 {dimension_numbers = #tpu.dot_dimension_numbers<[1], [0], [0], [1], [0, 0, 1, 1], [], []>} : vector<64x64xbf16>, vector<64x512xbf16>, vector<64x512xf32> -> vector<64x512xf32>
      %c0_93 = arith.constant 0 : index
      %c0_94 = arith.constant 0 : index
      %279 = vector.load %arg19[%c0_93, %c0_94] : memref<1x512xf32, #tpu.memory_space<vmem>>, vector<1x512xf32>
      %280 = vector.broadcast %279 : vector<1x512xf32> to vector<64x512xf32>
      %281 = arith.addf %278, %280 : vector<64x512xf32>
      %282 = vector.shape_cast %281 : vector<64x512xf32> to vector<2x32x512xf32>
      %c0_95 = arith.constant 0 : index
      %c0_96 = arith.constant 0 : index
      %c0_97 = arith.constant 0 : index
      %283 = vector.load %arg22[%c0_95, %c0_96, %c0_97] : memref<2x32x512xf32, #tpu.memory_space<vmem>>, vector<2x32x512xf32>
      tpu.vector_store %arg22[%c0_95, %c0_96, %c0_97], %282 {strides = array<i32>} : memref<2x32x512xf32, #tpu.memory_space<vmem>>, vector<2x32x512xf32>,
    } else {
    }
    return
  }
  func.func @transform_0(%arg0: i32, %arg1: i32) -> (i32, i32, i32) {
    %c0_i32 = arith.constant 0 : i32
    %c0_i32_0 = arith.constant 0 : i32
    %c0_i32_1 = arith.constant 0 : i32
    return %arg0, %c0_i32, %c0_i32_0 : i32, i32, i32
  }
  func.func @transform_1(%arg0: i32, %arg1: i32) -> (i32, i32) {
    %c0_i32 = arith.constant 0 : i32
    %c0_i32_0 = arith.constant 0 : i32
    %c0_i32_1 = arith.constant 0 : i32
    return %c0_i32, %c0_i32_0 : i32, i32
  }
  func.func @transform_2(%arg0: i32, %arg1: i32) -> (i32, i32) {
    %c0_i32 = arith.constant 0 : i32
    %c0_i32_0 = arith.constant 0 : i32
    %c0_i32_1 = arith.constant 0 : i32
    return %c0_i32, %c0_i32_0 : i32, i32
  }
  func.func @transform_3(%arg0: i32, %arg1: i32) -> (i32, i32, i32) {
    %c0_i32 = arith.constant 0 : i32
    %c0_i32_0 = arith.constant 0 : i32
    %c0_i32_1 = arith.constant 0 : i32
    return %arg1, %c0_i32, %c0_i32_0 : i32, i32, i32
  }
  func.func @transform_4(%arg0: i32, %arg1: i32) -> (i32, i32, i32) {
    %c0_i32 = arith.constant 0 : i32
    %c0_i32_0 = arith.constant 0 : i32
    %c0_i32_1 = arith.constant 0 : i32
    return %arg1, %c0_i32, %c0_i32_0 : i32, i32, i32
  }
  func.func @transform_5(%arg0: i32, %arg1: i32) -> (i32, i32, i32) {
    %c0_i32 = arith.constant 0 : i32
    %c0_i32_0 = arith.constant 0 : i32
    %c0_i32_1 = arith.constant 0 : i32
    return %arg1, %c0_i32, %c0_i32_0 : i32, i32, i32
  }
  func.func @transform_6(%arg0: i32, %arg1: i32) -> (i32, i32, i32) {
    %c0_i32 = arith.constant 0 : i32
    %c0_i32_0 = arith.constant 0 : i32
    %c0_i32_1 = arith.constant 0 : i32
    return %arg1, %c0_i32, %c0_i32_0 : i32, i32, i32
  }
  func.func @transform_7(%arg0: i32, %arg1: i32) -> (i32, i32, i32) {
    %c0_i32 = arith.constant 0 : i32
    %c0_i32_0 = arith.constant 0 : i32
    %c0_i32_1 = arith.constant 0 : i32
    return %arg1, %c0_i32, %c0_i32_0 : i32, i32, i32
  }
  func.func @transform_8(%arg0: i32, %arg1: i32) -> (i32, i32, i32) {
    %c0_i32 = arith.constant 0 : i32
    %c0_i32_0 = arith.constant 0 : i32
    %c0_i32_1 = arith.constant 0 : i32
    return %arg1, %c0_i32, %c0_i32_0 : i32, i32, i32
  }
  func.func @transform_9(%arg0: i32, %arg1: i32) -> (i32, i32, i32) {
    %c0_i32 = arith.constant 0 : i32
    %c0_i32_0 = arith.constant 0 : i32
    %c0_i32_1 = arith.constant 0 : i32
    return %arg1, %c0_i32, %c0_i32_0 : i32, i32, i32
  }
  func.func @transform_10(%arg0: i32, %arg1: i32) -> (i32, i32, i32) {
    %c0_i32 = arith.constant 0 : i32
    %c0_i32_0 = arith.constant 0 : i32
    %c0_i32_1 = arith.constant 0 : i32
    return %arg1, %c0_i32, %c0_i32_0 : i32, i32, i32
  }
  func.func @transform_11(%arg0: i32, %arg1: i32) -> (i32, i32, i32) {
    %c0_i32 = arith.constant 0 : i32
    %c0_i32_0 = arith.constant 0 : i32
    %c0_i32_1 = arith.constant 0 : i32
    return %arg1, %c0_i32, %c0_i32_0 : i32, i32, i32
  }
  func.func @transform_12(%arg0: i32, %arg1: i32) -> (i32, i32, i32) {
    %c0_i32 = arith.constant 0 : i32
    %c0_i32_0 = arith.constant 0 : i32
    %c0_i32_1 = arith.constant 0 : i32
    return %arg1, %c0_i32, %c0_i32_0 : i32, i32, i32
  }
  func.func @transform_13(%arg0: i32, %arg1: i32) -> (i32, i32, i32) {
    %c0_i32 = arith.constant 0 : i32
    %c0_i32_0 = arith.constant 0 : i32
    %c0_i32_1 = arith.constant 0 : i32
    return %arg1, %c0_i32, %c0_i32_0 : i32, i32, i32
  }
  func.func @transform_14(%arg0: i32, %arg1: i32) -> (i32, i32) {
    %c0_i32 = arith.constant 0 : i32
    %c0_i32_0 = arith.constant 0 : i32
    %c0_i32_1 = arith.constant 0 : i32
    return %c0_i32, %c0_i32_0 : i32, i32
  }
  func.func @transform_15(%arg0: i32, %arg1: i32) -> (i32, i32) {
    %c0_i32 = arith.constant 0 : i32
    %c0_i32_0 = arith.constant 0 : i32
    %c0_i32_1 = arith.constant 0 : i32
    return %c0_i32, %c0_i32_0 : i32, i32
  }
  func.func @transform_16(%arg0: i32, %arg1: i32) -> (i32, i32) {
    %c0_i32 = arith.constant 0 : i32
    %c0_i32_0 = arith.constant 0 : i32
    %c0_i32_1 = arith.constant 0 : i32
    return %c0_i32, %c0_i32_0 : i32, i32
  }
  func.func @transform_17(%arg0: i32, %arg1: i32) -> (i32, i32) {
    %c0_i32 = arith.constant 0 : i32
    %c0_i32_0 = arith.constant 0 : i32
    %c0_i32_1 = arith.constant 0 : i32
    return %c0_i32, %c0_i32_0 : i32, i32
  }
  func.func @transform_18(%arg0: i32, %arg1: i32) -> (i32, i32) {
    %c0_i32 = arith.constant 0 : i32
    %c0_i32_0 = arith.constant 0 : i32
    %c0_i32_1 = arith.constant 0 : i32
    return %c0_i32, %c0_i32_0 : i32, i32
  }
  func.func @transform_19(%arg0: i32, %arg1: i32) -> (i32, i32) {
    %c0_i32 = arith.constant 0 : i32
    %c0_i32_0 = arith.constant 0 : i32
    %c0_i32_1 = arith.constant 0 : i32
    return %c0_i32, %c0_i32_0 : i32, i32
  }
  func.func @transform_20(%arg0: i32, %arg1: i32) -> (i32, i32, i32) {
    %c0_i32 = arith.constant 0 : i32
    %c0_i32_0 = arith.constant 0 : i32
    %c0_i32_1 = arith.constant 0 : i32
    return %arg0, %c0_i32, %c0_i32_0 : i32, i32, i32
  }
}

</mosaic_0001>

<bundles_post_ra>
// kernel: label_encoder_forward.1
= control target key start
LH: loop header
LB: loop body
LE: loop exit
PB: predicated region body
PF: predicated region fallthrough
CT: control target
= control target key end

     0   :  { %s4740_s22 = smov 0   ;;  %s4742_s23 = smov 0   ;;  %s6509_s0 = inlined_call_operand.vmem [shape: f32[2,32,32], index: 0, kind: input, shape index: {}]   ;;  %s6510_s1 = inlined_call_operand.vmem [shape: bf16[32,64], index: 1, kind: input, shape index: {}]   ;;  %s6511_s2 = inlined_call_operand.vmem [shape: f32[1,64], index: 2, kind: input, shape index: {}]   ;;  %s6512_s3 = inlined_call_operand.vmem [shape: f32[2,1,64], index: 3, kind: input, shape index: {}]   ;;  %s6513_s4 = inlined_call_operand.vmem [shape: f32[2,1,64], index: 4, kind: input, shape index: {}]   ;;  %s6514_s5 = inlined_call_operand.vmem [shape: bf16[2,64,192], index: 5, kind: input, shape index: {}]   ;;  %s6515_s6 = inlined_call_operand.vmem [shape: bf16[2,64,64], index: 6, kind: input, shape index: {}]   ;;  %s6516_s7 = inlined_call_operand.vmem [shape: f32[2,1,64], index: 7, kind: input, shape index: {}]   ;;  %s6517_s8 = inlined_call_operand.vmem [shape: f32[2,1,64], index: 8, kind: input, shape index: {}]   ;;  %s6518_s9 = inlined_call_operand.vmem [shape: f32[2,1,64], index: 9, kind: input, shape index: {}]   ;;  %s6519_s10 = inlined_call_operand.vmem [shape: bf16[2,64,512], index: 10, kind: input, shape index: {}]   ;;  %s6520_s11 = inlined_call_operand.vmem [shape: f32[2,1,512], index: 11, kind: input, shape index: {}]   ;;  %s6521_s12 = inlined_call_operand.vmem [shape: bf16[2,256,64], index: 12, kind: input, shape index: {}]   ;;  %s6522_s13 = inlined_call_operand.vmem [shape: f32[2,1,64], index: 13, kind: input, shape index: {}]   ;;  %s6523_s14 = inlined_call_operand.vmem [shape: f32[1,64], index: 14, kind: input, shape index: {}]   ;;  %s6524_s15 = inlined_call_operand.vmem [shape: f32[1,64], index: 15, kind: input, shape index: {}]   ;;  %s6525_s16 = inlined_call_operand.vmem [shape: bf16[64,512], index: 16, kind: input, shape index: {}]   ;;  %s6526_s17 = inlined_call_operand.vmem [shape: f32[1,512], index: 17, kind: input, shape index: {}]   ;;  %s6527_s18 = inlined_call_operand.vmem [shape: f32[32,32], index: 18, kind: input, shape index: {}]   ;;  %s6528_s19 = inlined_call_operand.vmem [shape: f32[32,32], index: 19, kind: input, shape index: {}]   ;;  %s6529_s20 = inlined_call_operand.vmem [shape: f32[2,32,512], index: 20, kind: output, shape index: {}]  }
   0x1   :  { %6535 = sst [smem:[#allocation6_spill]] %s6509_s0 }
   0x2   :  { %6536 = sst [smem:[#allocation7_spill]] %s6510_s1  ;;  %s4738_s1 = smov 0  }
   0x3   :  { %6537 = sst [smem:[#allocation8_spill]] %s6511_s2 }
   0x4   :  { %6538 = sst [smem:[#allocation9_spill]] %s6512_s3 }
   0x5   :  { %6539 = sst [smem:[#allocation10_spill]] %s6513_s4 }
   0x6   :  { %6540 = sst [smem:[#allocation11_spill]] %s6514_s5 }
   0x7   :  { %6541 = sst [smem:[#allocation12_spill]] %s6523_s14 }
   0x8   :  { %6542 = sst [smem:[#allocation13_spill]] %s6524_s15 }
   0x9   :  { %6543 = sst [smem:[#allocation14_spill]] %s6526_s17 }
   0xa   :  { %6544 = sst [smem:[#allocation15_spill]] %s6529_s20 }
   0xb LB: > { %6545 = sst [smem:[#allocation3_spill]] %s4619_s22  ;;  %s39_s24 = sadd.s32 1, %s4619_s22  ;;  %s4623_s23 = sphi %s4742_s23, %s30_s23   ;;  %s4619_s22 = sphi %s4740_s22, %s6588_s22   ;;  %s4615_s1 = sphi %s4738_s1, %s6587_s1  }
   0xc   : > { %6546 = sst [smem:[#allocation4_spill]] %s4623_s23  ;;  %p3946_p0 = scmp.ge.s32.totalorder %s4623_s23, 1 }
   0xd   : > { %p40_p1 = scmp.ge.s32.totalorder %s39_s24, 2  ;;  %p673_p2 = scmp.lt.s32.totalorder %s4623_s23, 3 }
   0xf   : > { %s6590_s24 = smov (%p40_p1, %s39_s24), 0  ;;  %p674_p3 = pnand %p3946_p0, %p673_p2 }
  0x10   : > { %6547 = sst [smem:[#allocation5_spill]] %s6590_s24  ;;  %p782_p4 = scmp.lt.s32.totalorder (!%p674_p3), %s4615_s1, 1 }
  0x11   : > { %677 = sbr.rel (%p674_p3) target bundleno = 3576 (0xdf8), region = 100  ;;  %s6550_s5 = sld [smem:[#allocation11_spill]] (!%p674_p3) }
  0x12   : > { %p3956_p5 = scmp.ne.s32.totalorder (!%p674_p3), %s4615_s1, 0 }
  0x16   : > { %s4760_s2 = scalar_select %p782_p4, %s4615_s1, 1 }
  0x17   : > { %s6551_s30 = sld [smem:[#allocation7_spill]] (!%p3956_p5) }
  0x18   : > { %s4294_s0 = sshll.u32 %s4760_s2, 6  ;;  %s4295_s21 = sshll.u32 %s4760_s2, 5 }
  0x19   : > { %s4775_s25 = scalar_lea.vmem %s6550_s5, %s4294_s0  ;;  %s4780_s20 = scalar_lea.vmem %s6515_s6, %s4295_s21 }
  0x1a   : > { %s4296_s22 = sshll.u32 %s4760_s2, 7  ;;  %s3953_s23 = sshll.u32 %s4760_s2, 2 }
  0x1b   : > { %s4798_s5 = scalar_lea.vmem %s6519_s10, %s4296_s22  ;;  %s4804_s15 = scalar_lea.vmem %s6520_s11, %s3953_s23 }
  0x1c   : > { %s4809_s14 = scalar_lea.vmem %s6521_s12, %s4296_s22  ;;  %s823_s29 = scalar_lea.vmem %s6522_s13, %s4760_s2 }
  0x1d   : > { %835 = sbr.rel (%p3956_p5) target bundleno = 187 (0xbb), region = 104  ;;  %s6552_s26 = sld [smem:[#allocation6_spill]] (!%p3956_p5) }
  0x1e   : > { %s6553_s28 = sld [smem:[#allocation8_spill]] (!%p3956_p5) }
  0x22   : > { %v4299_v0 = vld [vmem:[%s6551_s30 + $0x8] sm:$0xff]  ;;  %v4298_v1 = vld [vmem:[%s6551_s30] sm:$0xff]  ;;  %vm868_vm0 = vcmask 261120   ;;  %vm910_vm1 = vcmask 523264  }
  0x23   : > { %v836_v2 = vld [vmem:[%s6552_s26] sm:$0xff]  ;;  %v837_v3 = vld [vmem:[%s6552_s26 + $0x8] sm:$0xff]  ;;  %v838_v4 = vld [vmem:[%s6552_s26 + $0x10] sm:$0xff]  ;;  %887 = vmatpush.bf16.msra.mxu0 %v4299_v0  ;;  %4360 = vmatpush.bf16.msra.mxu1 %v4299_v0 }
  0x24   : > { %v839_v5 = vld [vmem:[%s6552_s26 + $0x18] sm:$0xff]  ;;  %v840_v6 = vld [vmem:[%s6552_s26 + $0x20] sm:$0xff]  ;;  %v841_v7 = vld [vmem:[%s6552_s26 + $0x28] sm:$0xff]  ;;  %4361 = vmatpush.bf16.msra.mxu2 %v4299_v0  ;;  %4362 = vmatpush.bf16.msra.mxu3 %v4299_v0  ;;  %v844_v10 = vpack.c.bf16 %v837_v3, %v836_v2 }
  0x25   : > { %v842_v8 = vld [vmem:[%s6552_s26 + $0x30] sm:$0xff]  ;;  %v843_v9 = vld [vmem:[%s6552_s26 + $0x38] sm:$0xff]  ;;  %v845_v11 = vpack.c.bf16 %v839_v5, %v838_v4  ;;  %v846_v12 = vpack.c.bf16 %v841_v7, %v840_v6  ;;  %v4402_v14 = vld [vmem:[%s6553_s28] ss:$0 sm:$0xff] }
  0x26   : > { %v847_v13 = vpack.c.bf16 %v843_v9, %v842_v8 }
  0x27   : > { %888 = vmatpush.bf16.msra.mxu0 %v4298_v1  ;;  %4363 = vmatpush.bf16.msra.mxu1 %v4298_v1 }
  0x28   : > { %4364 = vmatpush.bf16.msra.mxu2 %v4298_v1  ;;  %4365 = vmatpush.bf16.msra.mxu3 %v4298_v1 }
  0x2a   : > { %3965 = vmatmul.msk.bf16.vlgmr.msra.gmra.mxu0 %vm868_vm0, %v844_v10  ;;  %3966 = vmatmul.msk.bf16.vlgmr.msra.gmra.mxu1 %vm868_vm0, %v845_v11 }
  0x2b   : > { %3967 = vmatmul.msk.bf16.vlgmr.msra.gmra.mxu2 %vm868_vm0, %v846_v12  ;;  %3968 = vmatmul.msk.bf16.vlgmr.msra.gmra.mxu3 %vm868_vm0, %v847_v13 }
  0xa7   : > { %v890_v15 = vpop.f32.mrf.mxu0  ;;  %v895_v16 = vpop.f32.mrf.mxu1 }
  0xa8   : > { %v891_v17 = vadd.f32 %v4402_v14, %v890_v15  ;;  %v896_v18 = vadd.f32 %v4402_v14, %v895_v16 }
  0xaa   : > { %911 = vst.msk [vmem:[#allocation2] sm:$0xff] %vm910_vm1, %v891_v17 }
  0xab   : > { %913 = vst.msk [vmem:[#allocation2 + $0x10] sm:$0xff] %vm910_vm1, %v896_v18 }
  0xae   : > { %v900_v19 = vpop.f32.mrf.mxu2  ;;  %v905_v20 = vpop.f32.mrf.mxu3 }
  0xaf   : > { %v901_v21 = vadd.f32 %v4402_v14, %v900_v19  ;;  %v906_v22 = vadd.f32 %v4402_v14, %v905_v20  ;;  %v892_v23 = vpop.f32.mrf.mxu0  ;;  %v897_v24 = vpop.f32.mrf.mxu1 }
  0xb0   : > { %v893_v25 = vadd.f32 %v4402_v14, %v892_v23  ;;  %v898_v26 = vadd.f32 %v4402_v14, %v897_v24 }
  0xb1   : > { %915 = vst.msk [vmem:[#allocation2 + $0x20] sm:$0xff] %vm910_vm1, %v901_v21 }
  0xb2   : > { %917 = vst.msk [vmem:[#allocation2 + $0x30] sm:$0xff] %vm910_vm1, %v906_v22 }
  0xb3   : > { %912 = vst.msk [vmem:[#allocation2 + $0x8] sm:$0xff] %vm910_vm1, %v893_v25 }
  0xb4   : > { %914 = vst.msk [vmem:[#allocation2 + $0x18] sm:$0xff] %vm910_vm1, %v898_v26 }
  0xb6   : > { %v902_v27 = vpop.f32.mrf.mxu2  ;;  %v907_v28 = vpop.f32.mrf.mxu3 }
  0xb7   : > { %v903_v29 = vadd.f32 %v4402_v14, %v902_v27  ;;  %v908_v30 = vadd.f32 %v4402_v14, %v907_v28 }
  0xb9   : > { %916 = vst.msk [vmem:[#allocation2 + $0x28] sm:$0xff] %vm910_vm1, %v903_v29 }
  0xba   : > { %918 = vst.msk [vmem:[#allocation2 + $0x38] sm:$0xff] %vm910_vm1, %v908_v30 }
  0xbb PF: > { %v921_v31 = vld [vmem:[#allocation2 + $0x10] sm:$0xff]  ;;  %vm937_vm2 = vcmask 523264   ;;  %v919_v32 = vld [vmem:[#allocation2] sm:$0xff]  ;;  %v922_v35 = vld [vmem:[#allocation2 + $0x18] sm:$0xff]  ;;  %v4625_v39 = vmov 64.0   ;;  %s4626_s17 = smov 64  }
  0xbc   : > { %v944_v33 = vsel %vm937_vm2, %v921_v31, 0.0  ;;  %v938_v34 = vsel %vm937_vm2, %v919_v32, 0.0  ;;  %v920_v36 = vld [vmem:[#allocation2 + $0x8] sm:$0xff]  ;;  %v947_v37 = vsel %vm937_vm2, %v922_v35, 0.0  ;;  %4409 = vrcp.f32 %v4625_v39  ;;  %v3995_v2 = vld [vmem:[%s4775_s25 + $0x30] sm:$0xf] }
  0xbd   : > { %945 = vadd.xlane.f32.xlu1 %v944_v33  ;;  %939 = vadd.xlane.f32.xlu0 %v938_v34  ;;  %v941_v38 = vsel %vm937_vm2, %v920_v36, 0.0  ;;  %v4307_v3 = vld [vmem:[%s4775_s25 + $0x34] sm:$0xf0]  ;;  %v3987_v5 = vld [vmem:[%s4775_s25 + $0x20] sm:$0xf]  ;;  %v4902_v22 = vld [vmem:[%s6527_s18 + $0x10] sm:$0xff] }
  0xbe   : > { %v3996_v4 = vor.u32 %v4307_v3, %v3995_v2  ;;  %v4305_v6 = vld [vmem:[%s4775_s25 + $0x24] sm:$0xf0]  ;;  %v3979_v8 = vld [vmem:[%s4775_s25 + $0x10] sm:$0xf]  ;;  %v4303_v9 = vld [vmem:[%s4775_s25 + $0x14] sm:$0xf0] }
  0xbf   : > { %v3988_v7 = vor.u32 %v4305_v6, %v3987_v5  ;;  %v3980_v10 = vor.u32 %v4303_v9, %v3979_v8  ;;  %v3971_v11 = vld [vmem:[%s4775_s25] sm:$0xf]  ;;  %v4301_v12 = vld [vmem:[%s4775_s25 + $0x4] sm:$0xf0]  ;;  %v4907_v23 = vld [vmem:[%s6527_s18 + $0x18] sm:$0xff]  ;;  %s6554_s23 = sld [smem:[#allocation9_spill]] }
  0xc0   : > { %1211 = vmatpush.bf16.msra.mxu0 %v3996_v4  ;;  %4366 = vmatpush.bf16.msra.mxu1 %v3996_v4  ;;  %v3972_v16 = vor.u32 %v4301_v12, %v3971_v11  ;;  %s6556_s4 = sld [smem:[#allocation10_spill]]  ;;  %v4962_v12 = vld [vmem:[#allocation2 + $0x20] sm:$0xff]  ;;  %s4627_s0 = smov 80   ;;  %vm1305_vm0 = vcmask 130048   ;;  %vm1406_vm1 = vcmask 261120  }
  0xc1   : > { %s4628_s28 = smov 48   ;;  %s4629_s21 = smov 16  }
  0xc2   : > { %v4410_v40 = vpop.eup %4409  ;;  %s4632_s22 = smov 32   ;;  %p4209_p6 = scmp.ne.s32.totalorder %s4615_s1, 1 }
  0xc3   : > { %v963_v41 = vmul.f32 64.0, %v4410_v40  ;;  %vm967_vm3 = vweird.f32 %v4410_v40  ;;  %s6583_s1 = sld [smem:[#allocation14_spill]] (!%p4209_p6) }
  0xc4   : > { %1212 = vmatpush.bf16.msra.mxu0 %v3988_v7  ;;  %4367 = vmatpush.bf16.msra.mxu1 %v3988_v7 }
  0xc5   : > { %948 = vadd.xlane.f32.xlu1 %v947_v37  ;;  %942 = vadd.xlane.f32.xlu0 %v941_v38  ;;  %v964_v42 = vsub.f32 1.0, %v963_v41  ;;  %s6555_s3 = scalar_lea.vmem %s6554_s23, %s4760_s2  ;;  %s4630_s23 = smov 112  }
  0xc6   : > { %s6557_s24 = scalar_lea.vmem %s6556_s4, %s4760_s2 }
  0xc7   : > { %v965_v43 = vmul.f32 %v4410_v40, %v964_v42 }
  0xc8   : > { %1213 = vmatpush.bf16.msra.mxu0 %v3980_v10  ;;  %4368 = vmatpush.bf16.msra.mxu1 %v3980_v10 }
  0xc9   : > { %v966_v44 = vadd.f32 %v4410_v40, %v965_v43  ;;  %v4927_v43 = vld [vmem:[%s6527_s18 + $0x8] sm:$0xff] }
  0xcb   : > { %v4861_v45 = vsel %vm967_vm3, %v4410_v40, %v966_v44 }
  0xcc   : > { %1214 = vmatpush.bf16.msra.mxu0 %v3972_v16  ;;  %4369 = vmatpush.bf16.msra.mxu1 %v3972_v16 }
 0x130   : > { %v946_v46 = vpop.xlane.xlu1 %945  ;;  %v940_v47 = vpop.xlane.xlu0 %939 }
 0x131   : > { %v971_v48 = vmul.f32 %v4861_v45, %v946_v46  ;;  %v969_v49 = vmul.f32 %v4861_v45, %v940_v47 }
 0x133   : > { %v4865_v50 = vsub.f32 %v921_v31, %v971_v48  ;;  %v4867_v51 = vsub.f32 %v919_v32, %v969_v49  ;;  %v4919_v31 = vld [vmem:[%s6527_s18] sm:$0xff] }
 0x135   : > { %v987_v52 = vmul.f32 %v4865_v50, %v4865_v50  ;;  %v985_v53 = vmul.f32 %v4867_v51, %v4867_v51 }
 0x137   : > { %v999_v54 = vsel %vm937_vm2, %v987_v52, 0.0  ;;  %v993_v55 = vsel %vm937_vm2, %v985_v53, 0.0  ;;  %v4937_v53 = vld [vmem:[%s6555_s3] ss:$0 sm:$0xff]  ;;  %s4631_s3 = smov 96  }
 0x138   : > { %v949_v56 = vpop.xlane.xlu1 %948  ;;  %1000 = vadd.xlane.f32.xlu0 %v999_v54  ;;  %994 = vadd.xlane.f32.xlu2 %v993_v55  ;;  %v943_v57 = vpop.xlane.xlu0 %942 }
 0x139   : > { %v972_v58 = vmul.f32 %v4861_v45, %v949_v56  ;;  %v970_v59 = vmul.f32 %v4861_v45, %v943_v57 }
 0x13b   : > { %v4877_v60 = vsub.f32 %v922_v35, %v972_v58  ;;  %v4879_v61 = vsub.f32 %v920_v36, %v970_v59 }
 0x13d   : > { %v988_v62 = vmul.f32 %v4877_v60, %v4877_v60  ;;  %v986_v63 = vmul.f32 %v4879_v61, %v4879_v61 }
 0x13f   : > { %v1002_v0 = vsel %vm937_vm2, %v988_v62, 0.0  ;;  %v996_v1 = vsel %vm937_vm2, %v986_v63, 0.0 }
 0x140   : > { %1003 = vadd.xlane.f32.xlu1 %v1002_v0  ;;  %997 = vadd.xlane.f32.xlu2 %v996_v1 }
 0x14c   : > { %1334 = vrot.lane.b32.xlu0 %v4907_v23, %s4626_s17 }
 0x154   : > { %1330 = vrot.lane.b32.xlu0 %v4927_v43, %s4626_s17 }
 0x159   : > { %1332 = vrot.lane.b32.xlu1 %v4902_v22, %s4626_s17 }
 0x161   : > { %1328 = vrot.lane.b32.xlu1 %v4919_v31, %s4626_s17 }
 0x1ab   : > { %v995_v13 = vpop.xlane.xlu2 %994  ;;  %v1001_v15 = vpop.xlane.xlu0 %1000 }
 0x1ac   : > { %v1017_v14 = vmul.f32 %v995_v13, %v4861_v45  ;;  %v1019_v18 = vmul.f32 %v1001_v15, %v4861_v45 }
 0x1ae   : > { %v1025_v17 = vadd.f32 1e-05, %v1017_v14  ;;  %v4897_v19 = vadd.f32 1e-05, %v1019_v18 }
 0x1b0   : > { %4411 = vrsqrt.f32 %v1025_v17  ;;  %vm1039_vm5 = vweird.f32 %v1025_v17  ;;  %vm1059_vm12 = vweird.f32 %v4897_v19 }
 0x1b1   : > { %4413 = vrsqrt.f32 %v4897_v19 }
 0x1b3   : > { %v1004_v20 = vpop.xlane.xlu1 %1003  ;;  %v998_v21 = vpop.xlane.xlu2 %997 }
 0x1b4   : > { %v1020_v24 = vmul.f32 %v1004_v20, %v4861_v45  ;;  %v1018_v25 = vmul.f32 %v998_v21, %v4861_v45 }
 0x1b6   : > { %v4412_v26 = vpop.eup %4411  ;;  %v1028_v27 = vadd.f32 1e-05, %v1020_v24  ;;  %v1026_v28 = vadd.f32 1e-05, %v1018_v25 }
 0x1b7   : > { %v1034_v29 = vmul.f32 %v4412_v26, %v1025_v17  ;;  %v4414_v33 = vpop.eup %4413  ;;  %vm1040_vm4 = vweird.f32 %v4412_v26  ;;  %v5016_v17 = vld [vmem:[#allocation2 + $0x28] sm:$0xff] }
 0x1b8   : > { %4415 = vrsqrt.f32 %v1028_v27  ;;  %v1054_v39 = vmul.f32 %v4414_v33, %v4897_v19  ;;  %vm1041_vm6 = vmor %vm1039_vm5, %vm1040_vm4  ;;  %vm1049_vm8 = vweird.f32 %v1026_v28  ;;  %vm1069_vm10 = vweird.f32 %v1028_v27 }
 0x1b9   : > { %v1035_v30 = vmul.f32 %v4412_v26, %v1034_v29  ;;  %4417 = vrsqrt.f32 %v1026_v28  ;;  %vm1060_vm13 = vweird.f32 %v4414_v33  ;;  %v953_v18 = vsel %vm937_vm2, %v5016_v17, 0.0 }
 0x1ba   : > { %v1055_v46 = vmul.f32 %v4414_v33, %v1054_v39  ;;  %vm1061_vm15 = vmor %vm1059_vm12, %vm1060_vm13 }
 0x1bb   : > { %v1036_v32 = vmul.f32 0.5, %v1035_v30  ;;  %v5041_v30 = vld [vmem:[%s6528_s19] sm:$0xff] }
 0x1bc   : > { %v1056_v54 = vmul.f32 0.5, %v1055_v46 }
 0x1bd   : > { %v1037_v34 = vsub.f32 1.5, %v1036_v32 }
 0x1be   : > { %v4416_v35 = vpop.eup %4415  ;;  %v1057_v62 = vsub.f32 1.5, %v1056_v54  ;;  %v5026_v21 = vpop.permute.xlu0 %1334 }
 0x1bf   : > { %v4418_v36 = vpop.eup %4417  ;;  %v1064_v37 = vmul.f32 %v4416_v35, %v1028_v27  ;;  %v1038_v38 = vmul.f32 %v4412_v26, %v1037_v34  ;;  %vm1070_vm11 = vweird.f32 %v4416_v35 }
 0x1c0   : > { %v1044_v40 = vmul.f32 %v4418_v36, %v1026_v28  ;;  %vm1050_vm7 = vweird.f32 %v4418_v36  ;;  %vm1071_vm14 = vmor %vm1069_vm10, %vm1070_vm11  ;;  %v1058_v2 = vmul.f32 %v4414_v33, %v1057_v62 }
 0x1c1   : > { %v1065_v41 = vmul.f32 %v4416_v35, %v1064_v37  ;;  %v1042_v44 = vsel %vm1041_vm6, %v4412_v26, %v1038_v38  ;;  %vm1051_vm9 = vmor %vm1049_vm8, %vm1050_vm7 }
 0x1c2   : > { %v1045_v42 = vmul.f32 %v4418_v36, %v1044_v40  ;;  %v1113_v52 = vmul.f32 %v1042_v44, %v4867_v51  ;;  %v4946_v51 = vld [vmem:[%s6557_s24] ss:$0 sm:$0xff]  ;;  %v1062_v5 = vsel %vm1061_vm15, %v4414_v33, %v1058_v2 }
 0x1c3   : > { %v1066_v48 = vmul.f32 0.5, %v1065_v41  ;;  %v1115_v7 = vmul.f32 %v1062_v5, %v4865_v50 }
 0x1c4   : > { %v1046_v47 = vmul.f32 0.5, %v1045_v42  ;;  %v1124_v59 = vmul.f32 %v4937_v53, %v1113_v52  ;;  %v5062_v42 = vld [vmem:[%s6528_s19 + $0x10] sm:$0xff] }
 0x1c5   : > { %v1067_v56 = vsub.f32 1.5, %v1066_v48  ;;  %v1126_v9 = vmul.f32 %v4937_v53, %v1115_v7 }
 0x1c6   : > { %v1047_v49 = vsub.f32 1.5, %v1046_v47  ;;  %v5032_v27 = vpop.permute.xlu0 %1330 }
 0x1c7   : > { %v1068_v0 = vmul.f32 %v4416_v35, %v1067_v56  ;;  %v1137_v11 = vadd.f32 %v4946_v51, %v1126_v9  ;;  %v5093_v9 = vld [vmem:[#allocation2 + $0x38] sm:$0xff] }
 0x1c8   : > { %v1048_v55 = vmul.f32 %v4418_v36, %v1047_v49 }
 0x1c9   : > { %v1072_v4 = vsel %vm1071_vm14, %v4416_v35, %v1068_v0 }
 0x1ca   : > { %v1052_v57 = vsel %vm1051_vm9, %v4418_v36, %v1048_v55  ;;  %v1116_v6 = vmul.f32 %v1072_v4, %v4877_v60  ;;  %v950_v60 = vsel %vm937_vm2, %v4962_v12, 0.0  ;;  %v5052_v36 = vld [vmem:[%s6528_s19 + $0x8] sm:$0xff] }
 0x1cb   : > { %v1114_v58 = vmul.f32 %v1052_v57, %v4879_v61  ;;  %v1135_v61 = vadd.f32 %v4946_v51, %v1124_v59  ;;  %951 = vadd.xlane.f32.xlu1 %v950_v60  ;;  %v5022_v19 = vpop.permute.xlu1 %1332  ;;  %v959_v60 = vsel %vm937_vm2, %v5093_v9, 0.0 }
 0x1cc   : > { %v1127_v8 = vmul.f32 %v4937_v53, %v1116_v6 }
 0x1cd   : > { %v1125_v63 = vmul.f32 %v4937_v53, %v1114_v58 }
 0x1ce   : > { %v1138_v10 = vadd.f32 %v4946_v51, %v1127_v8 }
 0x1cf   : > { %v1136_v1 = vadd.f32 %v4946_v51, %v1125_v63 }
 0x1d0   : > { %v4964_v13 = vpack.c.bf16 %v1138_v10, %v1137_v11 }
 0x1d1   : > { %v4952_v3 = vpack.c.bf16 %v1136_v1, %v1135_v61  ;;  %v5087_v1 = vld [vmem:[%s6528_s19 + $0x18] sm:$0xff] }
 0x1d3   : > { %4001 = vmatmul.msk.bf16.vlgmr.msra.gmra.mxu0 %vm937_vm2, %v4952_v3  ;;  %v5024_v20 = vpop.permute.xlu1 %1328 }
 0x1e3   : > { %4002 = vmatmul.msk.bf16.gmra.mxu0 %vm937_vm2, %v4964_v13 }
 0x23e   : > { %v5028_v25 = vpop.xlane.xlu1 %951 }
 0x250   : > { %v4970_v50 = vpop.f32.mrf.mxu0 }
 0x251   : > { %1356 = vrot.lane.b32.xlu1 %v4970_v50, %s4627_s0  ;;  %1344 = vrot.lane.b32.xlu0 %v4970_v50, %s4628_s28 }
 0x258   : > { %v4976_v14 = vpop.f32.mrf.mxu0 }
 0x259   : > { %1293 = vrot.lane.b32.xlu0 %v4970_v50, %s4629_s21  ;;  %1346 = vrot.lane.b32.xlu2 %v4976_v14, %s4628_s28 }
 0x260   : > { %v4982_v15 = vpop.f32.mrf.mxu0 }
 0x261   : > { %1281 = vrot.lane.b32.xlu0 %v4970_v50, %s4630_s23  ;;  %1295 = vrot.lane.b32.xlu2 %v4976_v14, %s4629_s21 }
 0x262   : > { %1360 = vrot.lane.b32.xlu1 %v4982_v15, %s4627_s0 }
 0x268   : > { %v4996_v16 = vpop.f32.mrf.mxu0 }
 0x269   : > { %1358 = vrot.lane.b32.xlu0 %v4976_v14, %s4627_s0  ;;  %1283 = vrot.lane.b32.xlu2 %v4976_v14, %s4630_s23 }
 0x26a   : > { %1563 = vrot.lane.b32.xlu1 %v4927_v43, %s4631_s3 }
 0x271   : > { %1285 = vrot.lane.b32.xlu0 %v4982_v15, %s4630_s23  ;;  %1348 = vrot.lane.b32.xlu2 %v4982_v15, %s4628_s28 }
 0x272   : > { %1299 = vrot.lane.b32.xlu1 %v4996_v16, %s4629_s21 }
 0x279   : > { %1297 = vrot.lane.b32.xlu2 %v4982_v15, %s4629_s21  ;;  %1350 = vrot.lane.b32.xlu0 %v4996_v16, %s4628_s28 }
 0x281   : > { %1565 = vrot.lane.b32.xlu2 %v4902_v22, %s4631_s3 }
 0x289   : > { %1567 = vrot.lane.b32.xlu2 %v4907_v23, %s4631_s3 }
 0x291   : > { %1561 = vrot.lane.b32.xlu2 %v4919_v31, %s4631_s3 }
 0x299   : > { %1362 = vrot.lane.b32.xlu2 %v4996_v16, %s4627_s0 }
 0x2a1   : > { %1287 = vrot.lane.b32.xlu2 %v4996_v16, %s4630_s23 }
 0x2a3   : > { %954 = vadd.xlane.f32.xlu0 %v953_v18 }
 0x2b3   : > { %v1347_v24 = vpop.permute.xlu2 %1346 }
 0x2bb   : > { %v5030_v26 = vpop.permute.xlu2 %1295 }
 0x2bc   : > { %v1578_v35 = vsel %vm1305_vm0, %v5030_v26, %v1347_v24 }
 0x2bd   : > { %v1582_v41 = vmul.f32 %v1578_v35, %v5052_v36  ;;  %v1276_v35 = vmul.f32 %v4996_v16, %v4907_v23 }
 0x2c3   : > { %v5034_v28 = vpop.permute.xlu1 %1356  ;;  %v5036_v29 = vpop.permute.xlu2 %1283 }
 0x2c4   : > { %v1345_v32 = vpop.permute.xlu0 %1344 }
 0x2c5   : > { %v1368_v33 = vsel %vm1305_vm0, %v1345_v32, %v5034_v28 }
 0x2c6   : > { %v1372_v34 = vmul.f32 %v1368_v33, %v5041_v30 }
 0x2c8   : > { %1380 = vrot.lane.b32.xlu2 %v1372_v34, %s4626_s17 }
 0x2cb   : > { %v1349_v37 = vpop.permute.xlu2 %1348 }
 0x2cc   : > { %v1294_v38 = vpop.permute.xlu0 %1293 }
 0x2cd   : > { %v1577_v39 = vsel %vm1305_vm0, %v1294_v38, %v1345_v32 }
 0x2ce   : > { %v1581_v40 = vmul.f32 %v1577_v39, %v5041_v30 }
 0x2d0   : > { %1591 = vrot.lane.b32.xlu2 %v1582_v41, %s4631_s3  ;;  %1589 = vrot.lane.b32.xlu0 %v1581_v40, %s4631_s3 }
 0x2d3   : > { %v1298_v44 = vpop.permute.xlu2 %1297 }
 0x2d4   : > { %v1361_v46 = vpop.permute.xlu1 %1360  ;;  %v1282_v47 = vpop.permute.xlu0 %1281  ;;  %v1579_v54 = vsel %vm1305_vm0, %v1298_v44, %v1349_v37 }
 0x2d5   : > { %v1370_v48 = vsel %vm1305_vm0, %v1349_v37, %v1361_v46  ;;  %v5066_v49 = vsel %vm1305_vm0, %v1282_v47, %v1294_v38  ;;  %v1583_v59 = vmul.f32 %v1579_v54, %v5062_v42 }
 0x2d6   : > { %v1374_v52 = vmul.f32 %v1370_v48, %v5062_v42 }
 0x2d8   : > { %1384 = vrot.lane.b32.xlu2 %v1374_v52, %s4626_s17  ;;  %v5123_v52 = vld [vmem:[#allocation2 + $0x30] sm:$0xff] }
 0x2d9   : > { %v956_v54 = vsel %vm937_vm2, %v5123_v52, 0.0 }
 0x2db   : > { %v5071_v55 = vpop.permute.xlu2 %1565 }
 0x2dc   : > { %v1359_v56 = vpop.permute.xlu0 %1358  ;;  %v5078_v62 = vpop.permute.xlu1 %1563 }
 0x2dd   : > { %v1369_v57 = vsel %vm1305_vm0, %v1347_v24, %v1359_v56  ;;  %v1275_v24 = vmul.f32 %v4982_v15, %v4902_v22 }
 0x2de   : > { %v1373_v58 = vmul.f32 %v1369_v57, %v5052_v36 }
 0x2e0   : > { %1593 = vrot.lane.b32.xlu2 %v1583_v59, %s4631_s3  ;;  %1382 = vrot.lane.b32.xlu1 %v1373_v58, %s4626_s17  ;;  %v1528_v59 = vsel %vm1305_vm0, %v1359_v56, %v5036_v29 }
 0x2e3   : > { %v5080_v63 = vpop.permute.xlu2 %1567 }
 0x2e4   : > { %v1286_v0 = vpop.permute.xlu0 %1285  ;;  %v1300_v2 = vpop.permute.xlu1 %1299 }
 0x2e5   : > { %v1308_v11 = vsel %vm1305_vm0, %v1286_v0, %v1298_v44  ;;  %v1527_v44 = vsel %vm1305_vm0, %v5034_v28, %v1282_v47  ;;  %v1529_v57 = vsel %vm1305_vm0, %v1361_v46, %v1286_v0 }
 0x2e6   : > { %v1312_v18 = vmul.f32 %v1308_v11, %v5062_v42  ;;  %v1531_v48 = vmul.f32 %v1527_v44, %v5041_v30  ;;  %v1533_v28 = vmul.f32 %v1529_v57, %v5062_v42  ;;  %v1340_v57 = vmul.f32 %v5024_v20, %v4970_v50 }
 0x2e8   : > { %v1316_v34 = vadd.f32 %v1312_v18, %v1275_v24 }
 0x2ea   : > { %v5109_v39 = vmul.f32 0.17677669, %v1316_v34  ;;  %v1576_v34 = vmul.f32 %v5080_v63, %v4996_v16 }
 0x2eb   : > { %v5082_v61 = vpop.permute.xlu2 %1561 }
 0x2ec   : > { %v1351_v4 = vpop.permute.xlu0 %1350 }
 0x2ed   : > { %v1580_v5 = vsel %vm1305_vm0, %v1300_v2, %v1351_v4 }
 0x2ee   : > { %v1584_v6 = vmul.f32 %v1580_v5, %v5087_v1 }
 0x2f0   : > { %1595 = vrot.lane.b32.xlu2 %v1584_v6, %s4631_s3 }
 0x2f3   : > { %v1363_v7 = vpop.permute.xlu2 %1362 }
 0x2f4   : > { %v1371_v8 = vsel %vm1305_vm0, %v1351_v4, %v1363_v7 }
 0x2f5   : > { %v1375_v10 = vmul.f32 %v1371_v8, %v5087_v1 }
 0x2f7   : > { %1386 = vrot.lane.b32.xlu1 %v1375_v10, %s4626_s17  ;;  %v1574_v10 = vmul.f32 %v5078_v62, %v4976_v14 }
 0x2fa   : > { %960 = vadd.xlane.f32.xlu0 %v959_v60 }
 0x2fb   : > { %v1288_v32 = vpop.permute.xlu2 %1287 }
 0x2fc   : > { %v1309_v33 = vsel %vm1305_vm0, %v1288_v32, %v1300_v2  ;;  %v1530_v0 = vsel %vm1305_vm0, %v1363_v7, %v1288_v32  ;;  %v1573_v7 = vmul.f32 %v5082_v61, %v4970_v50 }
 0x2fd   : > { %v1313_v37 = vmul.f32 %v1309_v33, %v5087_v1  ;;  %v1534_v6 = vmul.f32 %v1530_v0, %v5087_v1 }
 0x2ff   : > { %v1317_v38 = vadd.f32 %v1313_v37, %v1276_v35  ;;  %1511 = vrot.lane.b32.xlu1 %v4919_v31, %s4632_s22 }
 0x301   : > { %v5111_v40 = vmul.f32 0.17677669, %v1317_v38 }
 0x303   : > { %v1323_v41 = vpack.c.bf16 %v5111_v40, %v5109_v39 }
 0x307   : > { %1513 = vrot.lane.b32.xlu1 %v4927_v43, %s4632_s22 }
 0x30e   : > { %1515 = vrot.lane.b32.xlu0 %v4902_v22, %s4632_s22 }
 0x30f   : > { %1539 = vrot.lane.b32.xlu1 %v1531_v48, %s4632_s22 }
 0x316   : > { %v955_v58 = vpop.xlane.xlu0 %954 }
 0x317   : > { %1517 = vrot.lane.b32.xlu1 %v4907_v23, %s4632_s22  ;;  %v974_v22 = vmul.f32 %v4861_v45, %v955_v58  ;;  %v1532_v23 = vmul.f32 %v1528_v59, %v5052_v36  ;;  %v1342_v59 = vmul.f32 %v5022_v19, %v4982_v15 }
 0x319   : > { %957 = vadd.xlane.f32.xlu2 %v956_v54  ;;  %v5136_v2 = vsub.f32 %v5016_v17, %v974_v22  ;;  %v973_v17 = vmul.f32 %v4861_v45, %v5028_v25  ;;  %v1341_v54 = vmul.f32 %v5032_v27, %v4976_v14 }
 0x31b   : > { %v990_v46 = vmul.f32 %v5136_v2, %v5136_v2  ;;  %v5149_v56 = vsub.f32 %v4962_v12, %v973_v17  ;;  %v1575_v12 = vmul.f32 %v5071_v55, %v4982_v15 }
 0x31d   : > { %v1008_v5 = vsel %vm937_vm2, %v990_v46, 0.0  ;;  %v989_v32 = vmul.f32 %v5149_v56, %v5149_v56 }
 0x31f   : > { %1543 = vrot.lane.b32.xlu1 %v1533_v28, %s4632_s22  ;;  %v1005_v25 = vsel %vm937_vm2, %v989_v32, 0.0 }
 0x322   : > { %v1381_v47 = vpop.permute.xlu2 %1380 }
 0x323   : > { %v1392_v58 = vadd.f32 %v1381_v47, %v1340_v57 }
 0x32a   : > { %v1592_v4 = vpop.permute.xlu2 %1591 }
 0x32b   : > { %v1602_v18 = vadd.f32 %v1592_v4, %v1574_v10  ;;  %v1343_v4 = vmul.f32 %v5026_v21, %v4996_v16 }
 0x331   : > { %1541 = vrot.lane.b32.xlu2 %v1532_v23, %s4632_s22 }
 0x332   : > { %v1385_v8 = vpop.permute.xlu2 %1384 }
 0x333   : > { %v1394_v46 = vadd.f32 %v1385_v8, %v1342_v59 }
 0x338   : > { %1009 = vadd.xlane.f32.xlu0 %v1008_v5 }
 0x339   : > { %1545 = vrot.lane.b32.xlu2 %v1534_v6, %s4632_s22 }
 0x33a   : > { %v1594_v11 = vpop.permute.xlu2 %1593 }
 0x33b   : > { %v1603_v37 = vadd.f32 %v1594_v11, %v1575_v12 }
 0x342   : > { %v1590_v60 = vpop.permute.xlu0 %1589 }
 0x343   : > { %v1601_v24 = vadd.f32 %v1590_v60, %v1573_v7 }
 0x345   : > { %v1605_v33 = vpack.c.bf16 %v1602_v18, %v1601_v24 }
 0x347   : > { %1615 = vrot.lane.b32.xlu2 %v1605_v33, %s4632_s22 }
 0x349   : > { %1006 = vadd.xlane.f32.xlu1 %v1005_v25 }
 0x34a   : > { %v1596_v35 = vpop.permute.xlu2 %1595 }
 0x34b   : > { %v1604_v38 = vadd.f32 %v1596_v35, %v1576_v34 }
 0x34d   : > { %v1606_v44 = vpack.c.bf16 %v1604_v38, %v1603_v37 }
 0x34f   : > { %1617 = vrot.lane.b32.xlu2 %v1606_v44, %s4632_s22 }
 0x352   : > { %v1383_v48 = vpop.permute.xlu1 %1382 }
 0x353   : > { %v1393_v28 = vadd.f32 %v1383_v48, %v1341_v54 }
 0x355   : > { %v1396_v22 = vpack.c.bf16 %v1393_v28, %v1392_v58 }
 0x362   : > { %1402 = vrot.lane.b32.xlu1 %v1396_v22, %s4626_s17 }
 0x369   : > { %v1387_v23 = vpop.permute.xlu1 %1386 }
 0x36a   : > { %v1395_v0 = vadd.f32 %v1387_v23, %v1343_v4 }
 0x36c   : > { %v1397_v5 = vpack.c.bf16 %v1395_v0, %v1394_v46 }
 0x36d   : > { %v961_v47 = vpop.xlane.xlu0 %960 }
 0x36e   : > { %1404 = vrot.lane.b32.xlu1 %v1397_v5, %s4626_s17  ;;  %v976_v10 = vmul.f32 %v4861_v45, %v961_v47 }
 0x370   : > { %v5180_v11 = vsub.f32 %v5093_v9, %v976_v10 }
 0x371   : > { %v5174_v6 = vpop.permute.xlu1 %1511 }
 0x372   : > { %v1523_v24 = vmul.f32 %v5174_v6, %v4970_v50  ;;  %v992_v33 = vmul.f32 %v5180_v11, %v5180_v11 }
 0x374   : > { %v1014_v35 = vsel %vm937_vm2, %v992_v33, 0.0 }
 0x379   : > { %v5176_v17 = vpop.permute.xlu1 %1513 }
 0x37a   : > { %v1524_v25 = vmul.f32 %v5176_v17, %v4976_v14 }
 0x380   : > { %v5199_v57 = vpop.permute.xlu0 %1515 }
 0x381   : > { %v1540_v8 = vpop.permute.xlu1 %1539  ;;  %v1525_v59 = vmul.f32 %v5199_v57, %v4982_v15 }
 0x382   : > { %v1551_v9 = vadd.f32 %v1540_v8, %v1523_v24 }
 0x384   : > { %v1555_v37 = vmul.f32 0.17677669, %v1551_v9 }
 0x389   : > { %v5197_v48 = vpop.permute.xlu1 %1517 }
 0x38a   : > { %v1526_v58 = vmul.f32 %v5197_v48, %v4996_v16 }
 0x38c   : > { %v958_v7 = vpop.xlane.xlu2 %957 }
 0x38d   : > { %v975_v60 = vmul.f32 %v4861_v45, %v958_v7 }
 0x38f   : > { %v5184_v18 = vsub.f32 %v5123_v52, %v975_v60 }
 0x391   : > { %v991_v32 = vmul.f32 %v5184_v18, %v5184_v18  ;;  %v1544_v22 = vpop.permute.xlu1 %1543 }
 0x392   : > { %v1553_v23 = vadd.f32 %v1544_v22, %v1525_v59 }
 0x393   : > { %v1011_v12 = vsel %vm937_vm2, %v991_v32, 0.0 }
 0x394   : > { %v1542_v34 = vpop.permute.xlu2 %1541  ;;  %1012 = vadd.xlane.f32.xlu2 %v1011_v12  ;;  %v1557_v10 = vmul.f32 0.17677669, %v1553_v23 }
 0x395   : > { %v1552_v52 = vadd.f32 %v1542_v34, %v1524_v25 }
 0x397   : > { %v1556_v38 = vmul.f32 0.17677669, %v1552_v52 }
 0x398   : > { %1015 = vadd.xlane.f32.xlu1 %v1014_v35 }
 0x399   : > { %v1559_v44 = vpack.c.bf16 %v1556_v38, %v1555_v37 }
 0x39b   : > { %1609 = vrot.lane.b32.xlu0 %v1559_v44, %s4631_s3 }
 0x39c   : > { %v1546_v54 = vpop.permute.xlu2 %1545 }
 0x39d   : > { %v1554_v4 = vadd.f32 %v1546_v54, %v1526_v58 }
 0x39f   : > { %v1558_v46 = vmul.f32 0.17677669, %v1554_v4 }
 0x3a1   : > { %v1560_v8 = vpack.c.bf16 %v1558_v46, %v1557_v10 }
 0x3a4   : > { %v1616_v28 = vpop.permute.xlu2 %1615 }
 0x3a5   : > { %v1626_v16 = vsel %vm1406_vm1, %v1616_v28, 0 }
 0x3ab   : > { %v1010_v0 = vpop.xlane.xlu0 %1009 }
 0x3ac   : > { %v1022_v5 = vmul.f32 %v1010_v0, %v4861_v45  ;;  %v1618_v47 = vpop.permute.xlu2 %1617 }
 0x3ad   : > { %v1629_v7 = vsel %vm1406_vm1, %v1618_v47, 0 }
 0x3ae   : > { %v1030_v60 = vadd.f32 1e-05, %v1022_v5  ;;  %1637 = vmatpush.bf16.xpose.msra.mxu3 %v1629_v7 }
 0x3b0   : > { %4419 = vrsqrt.f32 %v1030_v60  ;;  %vm1089_vm3 = vweird.f32 %v1030_v60 }
 0x3b1   : > { %1611 = vrot.lane.b32.xlu1 %v1560_v8, %s4631_s3 }
 0x3b6   : > { %v4420_v15 = vpop.eup %4419  ;;  %1638 = vmatpush.bf16.xpose.msra.mxu3 %v1626_v16  ;;  %v1273_v16 = vmul.f32 %v4970_v50, %v4919_v31  ;;  %v4306_v50 = vld [vmem:[%s4775_s25 + $0x34] sm:$0xf] }
 0x3b7   : > { %v1084_v24 = vmul.f32 %v4420_v15, %v1030_v60  ;;  %vm1090_vm4 = vweird.f32 %v4420_v15  ;;  %v1310_v60 = vmul.f32 %v5066_v49, %v5041_v30 }
 0x3b8   : > { %vm1091_vm5 = vmor %vm1089_vm3, %vm1090_vm4 }
 0x3b9   : > { %v1085_v32 = vmul.f32 %v4420_v15, %v1084_v24  ;;  %v1274_v24 = vmul.f32 %v4976_v14, %v4927_v43  ;;  %v3997_v14 = vld [vmem:[%s4775_s25 + $0x38] sm:$0xf0] }
 0x3bb   : > { %v1086_v12 = vmul.f32 0.5, %v1085_v32 }
 0x3bc   : > { %v1007_v33 = vpop.xlane.xlu1 %1006 }
 0x3bd   : > { %v1021_v25 = vmul.f32 %v1007_v33, %v4861_v45  ;;  %v1087_v34 = vsub.f32 1.5, %v1086_v12  ;;  %v4304_v12 = vld [vmem:[%s4775_s25 + $0x24] sm:$0xf] }
 0x3bf   : > { %v1029_v9 = vadd.f32 1e-05, %v1021_v25  ;;  %v1088_v35 = vmul.f32 %v4420_v15, %v1087_v34  ;;  %v3989_v34 = vld [vmem:[%s4775_s25 + $0x28] sm:$0xf0] }
 0x3c0   : > { %v3992_v39 = vor.u32 %v4304_v12, %v3989_v34 }
 0x3c1   : > { %4421 = vrsqrt.f32 %v1029_v9  ;;  %v1092_v44 = vsel %vm1091_vm5, %v4420_v15, %v1088_v35  ;;  %vm1079_vm7 = vweird.f32 %v1029_v9  ;;  %v1314_v15 = vadd.f32 %v1310_v60, %v1273_v16 }
 0x3c2   : > { %v1118_v58 = vmul.f32 %v1092_v44, %v5136_v2 }
 0x3c4   : > { %v1129_v23 = vmul.f32 %v4937_v53, %v1118_v58 }
 0x3c6   : > { %v1140_v5 = vadd.f32 %v4946_v51, %v1129_v23 }
 0x3c7   : > { %v4422_v52 = vpop.eup %4421 }
 0x3c8   : > { %v1074_v37 = vmul.f32 %v4422_v52, %v1029_v9  ;;  %vm1080_vm6 = vweird.f32 %v4422_v52  ;;  %v4000_v9 = vor.u32 %v4306_v50, %v3997_v14 }
 0x3c9   : > { %vm1081_vm8 = vmor %vm1079_vm7, %vm1080_vm6 }
 0x3ca   : > { %v1075_v38 = vmul.f32 %v4422_v52, %v1074_v37  ;;  %1240 = vmatpush.bf16.msrb.mxu1 %v4000_v9  ;;  %v3981_v37 = vld [vmem:[%s4775_s25 + $0x18] sm:$0xf0] }
 0x3cc   : > { %v1076_v54 = vmul.f32 0.5, %v1075_v38 }
 0x3ce   : > { %v1077_v28 = vsub.f32 1.5, %v1076_v54  ;;  %1241 = vmatpush.bf16.msrb.mxu1 %v3992_v39  ;;  %v4300_v54 = vld [vmem:[%s4775_s25 + $0x4] sm:$0xf] }
 0x3d0   : > { %v1078_v22 = vmul.f32 %v4422_v52, %v1077_v28  ;;  %v3973_v28 = vld [vmem:[%s4775_s25 + $0x8] sm:$0xf0] }
 0x3d2   : > { %v1082_v59 = vsel %vm1081_vm8, %v4422_v52, %v1078_v22 }
 0x3d3   : > { %v1117_v4 = vmul.f32 %v1082_v59, %v5149_v56  ;;  %v1307_v56 = vsel %vm1305_vm0, %v5036_v29, %v5030_v26  ;;  %v1318_v29 = vmul.f32 0.17677669, %v1314_v15  ;;  %v3976_v59 = vor.u32 %v4300_v54, %v3973_v28 }
 0x3d4   : > { %v1403_v47 = vpop.permute.xlu1 %1402  ;;  %v1311_v8 = vmul.f32 %v1307_v56, %v5052_v36 }
 0x3d5   : > { %v1128_v46 = vmul.f32 %v4937_v53, %v1117_v4  ;;  %v1414_v32 = vsel %vm1406_vm1, %v1403_v47, 0 }
 0x3d6   : > { %v1315_v26 = vadd.f32 %v1311_v8, %v1274_v24 }
 0x3d7   : > { %v1139_v0 = vadd.f32 %v4946_v51, %v1128_v46 }
 0x3d8   : > { %v1319_v33 = vmul.f32 0.17677669, %v1315_v26 }
 0x3d9   : > { %v5216_v10 = vpack.c.bf16 %v1140_v5, %v1139_v0 }
 0x3da   : > { %v1322_v25 = vpack.c.bf16 %v1319_v33, %v1318_v29 }
 0x3db   : > { %4003 = vmatmul.msk.bf16.vlgmr.msra.gmra.mxu1 %vm937_vm2, %v5216_v10 }
 0x3e0   : > { %v1405_v2 = vpop.permute.xlu1 %1404 }
 0x3e1   : > { %v1417_v7 = vsel %vm1406_vm1, %v1405_v2, 0 }
 0x3e2   : > { %1425 = vmatpush.bf16.xpose.msra.mxu2 %v1417_v7 }
 0x3ea   : > { %1426 = vmatpush.bf16.xpose.msra.mxu2 %v1414_v32 }
 0x3f1   : > { %4009 = vmatmul.msk.bf16.vlgmr.msra.gmra.mxu2 %vm1406_vm1, %v1322_v25 }
 0x401   : > { %4010 = vmatmul.msk.bf16.gmra.mxu2 %vm1406_vm1, %v1323_v41  ;;  %v4302_v41 = vld [vmem:[%s4775_s25 + $0x14] sm:$0xf]  ;;  %s6559_s25 = scalar_lea.vmem %s6517_s8, %s4760_s2 }
 0x402   : > { %v3984_v44 = vor.u32 %v4302_v41, %v3981_v37 }
 0x404   : > { %1242 = vmatpush.bf16.msrb.mxu1 %v3984_v44 }
 0x407   : > { %v1013_v31 = vpop.xlane.xlu2 %1012 }
 0x408   : > { %v1023_v43 = vmul.f32 %v1013_v31, %v4861_v45  ;;  %1243 = vmatpush.bf16.msrb.mxu1 %v3976_v59 }
 0x40a   : > { %v1031_v49 = vadd.f32 1e-05, %v1023_v43 }
 0x40b   : > { %v1016_v52 = vpop.xlane.xlu1 %1015 }
 0x40c   : > { %4423 = vrsqrt.f32 %v1031_v49  ;;  %v1024_v35 = vmul.f32 %v1016_v52, %v4861_v45  ;;  %vm1099_vm9 = vweird.f32 %v1031_v49 }
 0x40d   : > { %v1610_v40 = vpop.permute.xlu0 %1609 }
 0x40e   : > { %v1032_v38 = vadd.f32 1e-05, %v1024_v35  ;;  %4013 = vmatmul.msk.bf16.vlgmr.msra.gmra.mxu3 %vm1406_vm1, %v1610_v40 }
 0x410   : > { %4425 = vrsqrt.f32 %v1032_v38  ;;  %vm1109_vm13 = vweird.f32 %v1032_v38 }
 0x412   : > { %v4424_v58 = vpop.eup %4423 }
 0x413   : > { %v1094_v22 = vmul.f32 %v4424_v58, %v1031_v49  ;;  %vm1100_vm10 = vweird.f32 %v4424_v58 }
 0x414   : > { %vm1101_vm11 = vmor %vm1099_vm9, %vm1100_vm10 }
 0x415   : > { %v1095_v4 = vmul.f32 %v4424_v58, %v1094_v22 }
 0x416   : > { %v4426_v23 = vpop.eup %4425 }
 0x417   : > { %v1096_v46 = vmul.f32 0.5, %v1095_v4  ;;  %v1104_v0 = vmul.f32 %v4426_v23, %v1032_v38  ;;  %vm1110_vm12 = vweird.f32 %v4426_v23 }
 0x418   : > { %vm1111_vm14 = vmor %vm1109_vm13, %vm1110_vm12 }
 0x419   : > { %v1097_v5 = vsub.f32 1.5, %v1096_v46  ;;  %v1105_v47 = vmul.f32 %v4426_v23, %v1104_v0 }
 0x41b   : > { %v1098_v2 = vmul.f32 %v4424_v58, %v1097_v5  ;;  %v1106_v7 = vmul.f32 0.5, %v1105_v47 }
 0x41d   : > { %v1102_v56 = vsel %vm1101_vm11, %v4424_v58, %v1098_v2  ;;  %v1107_v60 = vsub.f32 1.5, %v1106_v7 }
 0x41e   : > { %v1119_v8 = vmul.f32 %v1102_v56, %v5184_v18 }
 0x41f   : > { %v1108_v16 = vmul.f32 %v4426_v23, %v1107_v60 }
 0x420   : > { %v1130_v32 = vmul.f32 %v4937_v53, %v1119_v8 }
 0x421   : > { %v1112_v15 = vsel %vm1111_vm14, %v4426_v23, %v1108_v16 }
 0x422   : > { %v1120_v24 = vmul.f32 %v1112_v15, %v5180_v11  ;;  %v1141_v33 = vadd.f32 %v4946_v51, %v1130_v32 }
 0x423   : > { %v1612_v26 = vpop.permute.xlu1 %1611 }
 0x424   : > { %4014 = vmatmul.msk.bf16.gmra.mxu3 %vm1406_vm1, %v1612_v26  ;;  %v1131_v29 = vmul.f32 %v4937_v53, %v1120_v24 }
 0x426   : > { %v1142_v25 = vadd.f32 %v4946_v51, %v1131_v29 }
 0x428   : > { %v1146_v31 = vpack.c.bf16 %v1142_v25, %v1141_v33 }
 0x42a   : > { %4004 = vmatmul.msk.bf16.gmra.mxu1 %vm937_vm2, %v1146_v31 }
 0x43a   : > { %4005 = vmatmul.msk.bf16.vlgmr.msrb.gmra.mxu1 %vm937_vm2, %v4952_v3 }
 0x44a   : > { %4006 = vmatmul.msk.bf16.gmra.mxu1 %vm937_vm2, %v4964_v13 }
 0x458   : > { %v5268_v49 = vpop.f32.mrf.mxu1 }
 0x45a   : > { %4007 = vmatmul.msk.bf16.gmra.mxu1 %vm937_vm2, %v5216_v10 }
 0x460   : > { %v5271_v34 = vpop.f32.mrf.mxu1 }
 0x46a   : > { %4008 = vmatmul.msk.bf16.gmra.mxu1 %vm937_vm2, %v1146_v31 }
 0x474   : > { %v1428_v11 = vpop.f32.mrf.mxu2 }
 0x475   : > { %v1438_v53 = vsel %vm1406_vm1, %v1428_v11, -inf }
 0x476   : > { %1439 = vmax.xlane.f32.xlu2 %v1438_v53 }
 0x47c   : > { %v1430_v18 = vpop.f32.mrf.mxu2 }
 0x47d   : > { %v1441_v51 = vsel %vm1406_vm1, %v1430_v18, -inf }
 0x47e   : > { %1442 = vmax.xlane.f32.xlu0 %v1441_v51 }
 0x484   : > { %v1433_v43 = vpop.f32.mrf.mxu2 }
 0x485   : > { %v1444_v50 = vsel %vm1406_vm1, %v1433_v43, -inf }
 0x486   : > { %1445 = vmax.xlane.f32.xlu2 %v1444_v50 }
 0x48c   : > { %v1435_v3 = vpop.f32.mrf.mxu2 }
 0x48d   : > { %v1447_v13 = vsel %vm1406_vm1, %v1435_v3, -inf }
 0x48e   : > { %1448 = vmax.xlane.f32.xlu1 %v1447_v13 }
 0x491   : > { %v1640_v14 = vpop.f32.mrf.mxu3 }
 0x492   : > { %v1650_v10 = vsel %vm1406_vm1, %v1640_v14, -inf }
 0x493   : > { %1651 = vmax.xlane.f32.xlu2 %v1650_v10 }
 0x499   : > { %v1642_v9 = vpop.f32.mrf.mxu3 }
 0x49a   : > { %v1653_v12 = vsel %vm1406_vm1, %v1642_v9, -inf }
 0x49b   : > { %1654 = vmax.xlane.f32.xlu2 %v1653_v12 }
 0x4a7   : > { %v5273_v52 = vpop.f32.mrf.mxu1  ;;  %v1645_v35 = vpop.f32.mrf.mxu3 }
 0x4a8   : > { %v1656_v39 = vsel %vm1406_vm1, %v1645_v35, -inf }
 0x4a9   : > { %1657 = vmax.xlane.f32.xlu2 %v1656_v39 }
 0x4af   : > { %v5276_v40 = vpop.f32.mrf.mxu1  ;;  %v1647_v41 = vpop.f32.mrf.mxu3 }
 0x4b0   : > { %v1659_v37 = vsel %vm1406_vm1, %v1647_v41, -inf }
 0x4b1   : > { %1660 = vmax.xlane.f32.xlu2 %v1659_v37 }
 0x4b7   : > { %v1245_v38 = vpop.f32.mrf.mxu1 }
 0x4bf   : > { %v1247_v44 = vpop.f32.mrf.mxu1 }
 0x4c0   : > { %v1398_v22 = vpack.c.bf16 %v1247_v44, %v1245_v38 }
 0x4c7   : > { %v1250_v54 = vpop.f32.mrf.mxu1 }
 0x4cf   : > { %v1252_v28 = vpop.f32.mrf.mxu1 }
 0x4d0   : > { %v1399_v58 = vpack.c.bf16 %v1252_v28, %v1250_v54 }
 0x4d2   : > { %1496 = vmatpush.bf16.msrb.mxu2 %v1399_v58 }
 0x4d6   : > { %1497 = vmatpush.bf16.msrb.mxu2 %v1398_v22 }
 0x4e9   : > { %v1440_v59 = vpop.xlane.xlu2 %1439 }
 0x4ea   : > { %v1450_v4 = vsub.f32 %v1428_v11, %v1440_v59 }
 0x4ec   : > { %v1454_v23 = vmul.f32 1.442695, %v1450_v4 }
 0x4ee   : > { %4427 = vpow2.f32 %v1454_v23 }
 0x4f1   : > { %v1443_v46 = vpop.xlane.xlu0 %1442 }
 0x4f2   : > { %v1451_v0 = vsub.f32 %v1430_v18, %v1443_v46 }
 0x4f4   : > { %v5279_v5 = vpop.eup %4427  ;;  %v1456_v47 = vmul.f32 1.442695, %v1451_v0  ;;  %v1255_v0 = vpop.f32.mrf.mxu1 }
 0x4f5   : > { %v1462_v2 = vsel %vm1406_vm1, %v5279_v5, 0.0 }
 0x4f6   : > { %4429 = vpow2.f32 %v1456_v47  ;;  %1463 = vadd.xlane.f32.xlu0 %v1462_v2 }
 0x4f9   : > { %v1446_v7 = vpop.xlane.xlu2 %1445 }
 0x4fa   : > { %v1452_v56 = vsub.f32 %v1433_v43, %v1446_v7 }
 0x4fc   : > { %v5283_v60 = vpop.eup %4429  ;;  %v1458_v8 = vmul.f32 1.442695, %v1452_v56  ;;  %v1257_v56 = vpop.f32.mrf.mxu1 }
 0x4fd   : > { %v1465_v16 = vsel %vm1406_vm1, %v5283_v60, 0.0 }
 0x4fe   : > { %4431 = vpow2.f32 %v1458_v8  ;;  %1466 = vadd.xlane.f32.xlu2 %v1465_v16 }
 0x501   : > { %v1449_v15 = vpop.xlane.xlu1 %1448 }
 0x502   : > { %v1453_v24 = vsub.f32 %v1435_v3, %v1449_v15 }
 0x504   : > { %v5287_v32 = vpop.eup %4431  ;;  %v1460_v26 = vmul.f32 1.442695, %v1453_v24 }
 0x505   : > { %v1468_v29 = vsel %vm1406_vm1, %v5287_v32, 0.0 }
 0x506   : > { %4433 = vpow2.f32 %v1460_v26  ;;  %v1652_v33 = vpop.xlane.xlu2 %1651  ;;  %1469 = vadd.xlane.f32.xlu0 %v1468_v29  ;;  %v1260_v29 = vpop.f32.mrf.mxu1 }
 0x507   : > { %v1662_v25 = vsub.f32 %v1640_v14, %v1652_v33 }
 0x509   : > { %v1666_v31 = vmul.f32 1.442695, %v1662_v25 }
 0x50b   : > { %4435 = vpow2.f32 %v1666_v31 }
 0x50c   : > { %v5291_v11 = vpop.eup %4433 }
 0x50d   : > { %v1471_v53 = vsel %vm1406_vm1, %v5291_v11, 0.0 }
 0x50e   : > { %v1655_v18 = vpop.xlane.xlu2 %1654  ;;  %1472 = vadd.xlane.f32.xlu1 %v1471_v53 }
 0x50f   : > { %v1663_v51 = vsub.f32 %v1642_v9, %v1655_v18  ;;  %v1262_v18 = vpop.f32.mrf.mxu1 }
 0x511   : > { %v5295_v43 = vpop.eup %4435  ;;  %v1668_v50 = vmul.f32 1.442695, %v1663_v51 }
 0x512   : > { %v1674_v3 = vsel %vm1406_vm1, %v5295_v43, 0.0 }
 0x513   : > { %4437 = vpow2.f32 %v1668_v50  ;;  %1675 = vadd.xlane.f32.xlu2 %v1674_v3  ;;  %v5354_v50 = vpack.c.bf16 %v1262_v18, %v1260_v29 }
 0x519   : > { %v5299_v13 = vpop.eup %4437 }
 0x51a   : > { %v1677_v14 = vsel %vm1406_vm1, %v5299_v13, 0.0 }
 0x51b   : > { %1678 = vadd.xlane.f32.xlu0 %v1677_v14 }
 0x51c   : > { %v1658_v10 = vpop.xlane.xlu2 %1657 }
 0x51d   : > { %v1664_v12 = vsub.f32 %v1645_v35, %v1658_v10  ;;  %v5358_v10 = vpack.c.bf16 %v1257_v56, %v1255_v0 }
 0x51f   : > { %v1670_v39 = vmul.f32 1.442695, %v1664_v12 }
 0x521   : > { %4439 = vpow2.f32 %v1670_v39 }
 0x524   : > { %v1661_v37 = vpop.xlane.xlu2 %1660 }
 0x525   : > { %v1665_v9 = vsub.f32 %v1647_v41, %v1661_v37 }
 0x527   : > { %v5303_v38 = vpop.eup %4439  ;;  %v1672_v44 = vmul.f32 1.442695, %v1665_v9  ;;  %1700 = vrot.lane.b32.xlu1 %v1399_v58, %s4631_s3 }
 0x528   : > { %v1680_v54 = vsel %vm1406_vm1, %v5303_v38, 0.0 }
 0x529   : > { %4441 = vpow2.f32 %v1672_v44  ;;  %1681 = vadd.xlane.f32.xlu0 %v1680_v54 }
 0x52b   : > { %1698 = vrot.lane.b32.xlu2 %v1398_v22, %s4631_s3 }
 0x52f   : > { %v5309_v28 = vpop.eup %4441  ;;  %1865 = vrot.lane.b32.xlu1 %v5276_v40, %s4628_s28 }
 0x530   : > { %v1683_v35 = vsel %vm1406_vm1, %v5309_v28, 0.0 }
 0x531   : > { %1684 = vadd.xlane.f32.xlu0 %v1683_v35 }
 0x533   : > { %1875 = vrot.lane.b32.xlu2 %v5273_v52, %s4627_s0 }
 0x537   : > { %1877 = vrot.lane.b32.xlu1 %v5276_v40, %s4627_s0 }
 0x53b   : > { %1829 = vrot.lane.b32.xlu2 %v5273_v52, %s4629_s21 }
 0x53f   : > { %1831 = vrot.lane.b32.xlu1 %v5276_v40, %s4629_s21 }
 0x543   : > { %1859 = vrot.lane.b32.xlu2 %v5268_v49, %s4628_s28 }
 0x545   : > { %1863 = vrot.lane.b32.xlu0 %v5273_v52, %s4628_s28 }
 0x547   : > { %1871 = vrot.lane.b32.xlu1 %v5268_v49, %s4627_s0 }
 0x54b   : > { %1873 = vrot.lane.b32.xlu2 %v5271_v34, %s4627_s0 }
 0x54d   : > { %1861 = vrot.lane.b32.xlu0 %v5271_v34, %s4628_s28 }
 0x54f   : > { %1827 = vrot.lane.b32.xlu1 %v5271_v34, %s4629_s21 }
 0x553   : > { %1813 = vrot.lane.b32.xlu2 %v5268_v49, %s4630_s23 }
 0x555   : > { %1825 = vrot.lane.b32.xlu0 %v5268_v49, %s4629_s21  ;;  %s6560_s21 = scalar_lea.vmem %s6518_s9, %s4760_s2 }
 0x557   : > { %1817 = vrot.lane.b32.xlu1 %v5273_v52, %s4630_s23 }
 0x55b   : > { %1819 = vrot.lane.b32.xlu2 %v5276_v40, %s4630_s23 }
 0x55d   : > { %1815 = vrot.lane.b32.xlu0 %v5271_v34, %s4630_s23  ;;  %s6584_s23 = sld [smem:[#allocation15_spill]] (!%p4209_p6) }
 0x563   : > { %s6585_s27 = smov (!%p4209_p6), %s6584_s23 }
 0x569   : > { %v1464_v41 = vpop.xlane.xlu0 %1463 }
 0x56a   : > { %4443 = vrcp.f32 %v1464_v41 }
 0x570   : > { %v4444_v22 = vpop.eup %4443 }
 0x571   : > { %v1467_v58 = vpop.xlane.xlu2 %1466  ;;  %v1478_v4 = vmul.f32 %v4444_v22, %v5279_v5 }
 0x572   : > { %4445 = vrcp.f32 %v1467_v58 }
 0x578   : > { %v4446_v59 = vpop.eup %4445 }
 0x579   : > { %v1479_v23 = vmul.f32 %v4446_v59, %v5283_v60  ;;  %v1470_v47 = vpop.xlane.xlu0 %1469 }
 0x57a   : > { %4447 = vrcp.f32 %v1470_v47 }
 0x57b   : > { %v1482_v46 = vpack.c.bf16 %v1479_v23, %v1478_v4 }
 0x57d   : > { %4011 = vmatmul.msk.bf16.vlgmr.msrb.gmra.mxu2 %vm1406_vm1, %v1482_v46 }
 0x580   : > { %v4448_v7 = vpop.eup %4447 }
 0x581   : > { %v1473_v2 = vpop.xlane.xlu1 %1472  ;;  %v1480_v15 = vmul.f32 %v4448_v7, %v5287_v32 }
 0x582   : > { %4449 = vrcp.f32 %v1473_v2 }
 0x586   : > { %v1676_v8 = vpop.xlane.xlu2 %1675 }
 0x588   : > { %v4450_v16 = vpop.eup %4449 }
 0x589   : > { %v1481_v24 = vmul.f32 %v4450_v16, %v5291_v11 }
 0x58b   : > { %v1483_v26 = vpack.c.bf16 %v1481_v24, %v1480_v15 }
 0x58d   : > { %4012 = vmatmul.msk.bf16.gmra.mxu2 %vm1406_vm1, %v1483_v26 }
 0x58e   : > { %v1699_v5 = vpop.permute.xlu2 %1698  ;;  %v1679_v60 = vpop.xlane.xlu0 %1678 }
 0x58f   : > { %4451 = vrcp.f32 %v1679_v60 }
 0x590   : > { %4453 = vrcp.f32 %v1676_v8 }
 0x595   : > { %v4452_v25 = vpop.eup %4451 }
 0x596   : > { %v5351_v33 = vpop.permute.xlu2 %1875  ;;  %v4454_v53 = vpop.eup %4453  ;;  %v1691_v51 = vmul.f32 %v4452_v25, %v5299_v13 }
 0x597   : > { %v1690_v11 = vmul.f32 %v4454_v53, %v5295_v43 }
 0x599   : > { %v1701_v31 = vpop.permute.xlu1 %1700  ;;  %v1694_v14 = vpack.c.bf16 %v1691_v51, %v1690_v11 }
 0x59a   : > { %1716 = vmatpush.bf16.msra.mxu2 %v1701_v31 }
 0x59c   : > { %v1682_v32 = vpop.xlane.xlu0 %1681 }
 0x59d   : > { %4455 = vrcp.f32 %v1682_v32 }
 0x59e   : > { %v1830_v3 = vpop.permute.xlu2 %1829  ;;  %1717 = vmatpush.bf16.msra.mxu2 %v1699_v5 }
 0x5a1   : > { %v1866_v12 = vpop.permute.xlu1 %1865  ;;  %4015 = vmatmul.msk.bf16.vlgmr.msra.gmra.mxu2 %vm1406_vm1, %v1694_v14  ;;  %v4571_v14 = vld [vmem:[%s6527_s18 + $0x18] sm:$0xff] }
 0x5a2   : > { %2010 = vmatpush.bf16.msrb.mxu2 %v5354_v50 }
 0x5a3   : > { %v4456_v37 = vpop.eup %4455 }
 0x5a4   : > { %v1685_v39 = vpop.xlane.xlu0 %1684  ;;  %v1692_v35 = vmul.f32 %v4456_v37, %v5303_v38 }
 0x5a5   : > { %4457 = vrcp.f32 %v1685_v39 }
 0x5a6   : > { %2011 = vmatpush.bf16.msrb.mxu2 %v5358_v10  ;;  %v1860_v13 = vpop.permute.xlu2 %1859 }
 0x5a9   : > { %v1878_v9 = vpop.permute.xlu1 %1877 }
 0x5aa   : > { %v1886_v43 = vsel %vm1305_vm0, %v1866_v12, %v1878_v9 }
 0x5ab   : > { %v4458_v44 = vpop.eup %4457  ;;  %v1890_v54 = vmul.f32 %v1886_v43, %v5087_v1  ;;  %v4572_v43 = vld [vmem:[%s6527_s18 + $0x10] sm:$0xff] }
 0x5ac   : > { %v1693_v41 = vmul.f32 %v4458_v44, %v5309_v28  ;;  %v1807_v44 = vmul.f32 %v4572_v43, %v5273_v52 }
 0x5ad   : > { %1901 = vrot.lane.b32.xlu1 %v1890_v54, %s4626_s17 }
 0x5ae   : > { %v1874_v58 = vpop.permute.xlu2 %1873  ;;  %v1695_v22 = vpack.c.bf16 %v1693_v41, %v1692_v35 }
 0x5b1   : > { %v1832_v59 = vpop.permute.xlu1 %1831  ;;  %4016 = vmatmul.msk.bf16.gmra.mxu2 %vm1406_vm1, %v1695_v22 }
 0x5b2   : > { %v2070_v56 = vsel %vm1305_vm0, %v1832_v59, %v1866_v12  ;;  %v1808_v12 = vmul.f32 %v4571_v14, %v5276_v40 }
 0x5b3   : > { %v2074_v15 = vmul.f32 %v2070_v56, %v5087_v1 }
 0x5b6   : > { %v1814_v4 = vpop.permute.xlu2 %1813 }
 0x5b7   : > { %v1864_v23 = vpop.permute.xlu0 %1863 }
 0x5b8   : > { %v1885_v46 = vsel %vm1305_vm0, %v1864_v23, %v5351_v33  ;;  %v2069_v0 = vsel %vm1305_vm0, %v1830_v3, %v1864_v23 }
 0x5b9   : > { %v1889_v47 = vmul.f32 %v1885_v46, %v5062_v42  ;;  %v2073_v38 = vmul.f32 %v2069_v0, %v5062_v42  ;;  %v1872_v2 = vpop.permute.xlu1 %1871 }
 0x5ba   : > { %v1883_v28 = vsel %vm1305_vm0, %v1860_v13, %v1872_v2  ;;  %v2029_v31 = vsel %vm1305_vm0, %v1872_v2, %v1814_v4 }
 0x5bb   : > { %v1887_v7 = vmul.f32 %v1883_v28, %v5041_v30  ;;  %2083 = vrot.lane.b32.xlu2 %v2073_v38, %s4631_s3  ;;  %1899 = vrot.lane.b32.xlu0 %v1889_v47, %s4626_s17  ;;  %v2033_v11 = vmul.f32 %v2029_v31, %v5041_v30 }
 0x5bd   : > { %1895 = vrot.lane.b32.xlu1 %v1887_v7, %s4626_s17 }
 0x5be   : > { %v1820_v24 = vpop.permute.xlu2 %1819 }
 0x5bf   : > { %v1862_v8 = vpop.permute.xlu0 %1861  ;;  %v1840_v25 = vsel %vm1305_vm0, %v1820_v24, %v1832_v59  ;;  %v2032_v59 = vsel %vm1305_vm0, %v1878_v9, %v1820_v24  ;;  %v4309_v24 = vld [vmem:[%s4780_s20 + $0x8] sm:$0xff] }
 0x5c0   : > { %v1884_v16 = vsel %vm1305_vm0, %v1862_v8, %v1874_v58  ;;  %v1844_v53 = vmul.f32 %v1840_v25, %v5087_v1  ;;  %v2036_v47 = vmul.f32 %v2032_v59, %v5087_v1  ;;  %1792 = vmatpush.bf16.msrb.mxu0 %v4309_v24  ;;  %2258 = vmatpush.bf16.msra.mxu2 %v4309_v24  ;;  %v5447_v25 = vld [vmem:[%s4780_s20 + $0x10] sm:$0xff] }
 0x5c1   : > { %v1888_v26 = vmul.f32 %v1884_v16, %v5052_v36  ;;  %v1828_v5 = vpop.permute.xlu1 %1827 }
 0x5c2   : > { %v2068_v60 = vsel %vm1305_vm0, %v1828_v5, %v1862_v8  ;;  %v1848_v35 = vadd.f32 %v1844_v53, %v1808_v12  ;;  %v1858_v12 = vmul.f32 %v5026_v21, %v5276_v40 }
 0x5c3   : > { %v2072_v29 = vmul.f32 %v2068_v60, %v5052_v36  ;;  %2085 = vrot.lane.b32.xlu0 %v2074_v15, %s4631_s3  ;;  %1897 = vrot.lane.b32.xlu2 %v1888_v26, %s4626_s17 }
 0x5c5   : > { %2081 = vrot.lane.b32.xlu1 %v2072_v29, %s4631_s3 }
 0x5c7   : > { %v1826_v18 = vpop.permute.xlu0 %1825 }
 0x5c8   : > { %v1837_v51 = vsel %vm1305_vm0, %v1814_v4, %v1826_v18  ;;  %v2067_v32 = vsel %vm1305_vm0, %v1826_v18, %v1860_v13 }
 0x5c9   : > { %v2071_v39 = vmul.f32 %v2067_v32, %v5041_v30  ;;  %v1818_v37 = vpop.permute.xlu1 %1817  ;;  %v1841_v4 = vmul.f32 %v1837_v51, %v5041_v30  ;;  %v4574_v30 = vld [vmem:[%s6527_s18 + $0x8] sm:$0xff] }
 0x5ca   : > { %v1839_v54 = vsel %vm1305_vm0, %v1818_v37, %v1830_v3  ;;  %v2031_v13 = vsel %vm1305_vm0, %v5351_v33, %v1818_v37  ;;  %v5412_v3 = vmul.f32 0.17677669, %v1848_v35  ;;  %v4573_v33 = vld [vmem:[%s6527_s18] sm:$0xff]  ;;  %v1806_v9 = vmul.f32 %v4574_v30, %v5271_v34 }
 0x5cb   : > { %v1843_v41 = vmul.f32 %v1839_v54, %v5062_v42  ;;  %v2035_v22 = vmul.f32 %v2031_v13, %v5062_v42  ;;  %2041 = vrot.lane.b32.xlu2 %v2033_v11, %s4632_s22  ;;  %2079 = vrot.lane.b32.xlu0 %v2071_v39, %s4631_s3  ;;  %v1805_v46 = vmul.f32 %v4573_v33, %v5268_v49 }
 0x5cc   : > { %v1857_v37 = vmul.f32 %v5022_v19, %v5273_v52  ;;  %v1856_v54 = vmul.f32 %v5032_v27, %v5271_v34  ;;  %v2065_v19 = vmul.f32 %v5071_v55, %v5273_v52  ;;  %v2066_v27 = vmul.f32 %v5080_v63, %v5276_v40 }
 0x5cd   : > { %v1847_v23 = vadd.f32 %v1843_v41, %v1807_v44  ;;  %2045 = vrot.lane.b32.xlu1 %v2035_v22, %s4632_s22  ;;  %v1845_v28 = vadd.f32 %v1841_v4, %v1805_v46  ;;  %v1855_v41 = vmul.f32 %v5024_v20, %v5268_v49  ;;  %v2064_v55 = vmul.f32 %v5078_v62, %v5271_v34 }
 0x5ce   : > { %v2025_v62 = vmul.f32 %v5174_v6, %v5268_v49 }
 0x5cf   : > { %v5418_v42 = vmul.f32 0.17677669, %v1847_v23  ;;  %v1816_v0 = vpop.permute.xlu0 %1815  ;;  %v5433_v16 = vmul.f32 0.17677669, %v1845_v28 }
 0x5d0   : > { %v1838_v38 = vsel %vm1305_vm0, %v1816_v0, %v1828_v5  ;;  %v2030_v2 = vsel %vm1305_vm0, %v1874_v58, %v1816_v0  ;;  %v5442_v5 = vld [vmem:[%s4780_s20 + $0x18] sm:$0xff] }
 0x5d1   : > { %v1842_v7 = vmul.f32 %v1838_v38, %v5052_v36  ;;  %v2034_v56 = vmul.f32 %v2030_v2, %v5052_v36  ;;  %v1854_v1 = vpack.c.bf16 %v5412_v3, %v5418_v42  ;;  %v4308_v36 = vld [vmem:[%s4780_s20] sm:$0xff]  ;;  %1755 = vmatpush.bf16.msrb.mxu3 %v5442_v5  ;;  %v2028_v2 = vmul.f32 %v5197_v48, %v5276_v40 }
 0x5d2   : > { %1793 = vmatpush.bf16.msrb.mxu0 %v4308_v36  ;;  %2259 = vmatpush.bf16.msra.mxu2 %v4308_v36 }
 0x5d3   : > { %v1846_v8 = vadd.f32 %v1842_v7, %v1806_v9  ;;  %2047 = vrot.lane.b32.xlu2 %v2036_v47, %s4632_s22  ;;  %2043 = vrot.lane.b32.xlu0 %v2034_v56, %s4632_s22  ;;  %v2063_v7 = vmul.f32 %v5082_v61, %v5268_v49 }
 0x5d5   : > { %v5435_v15 = vmul.f32 0.17677669, %v1846_v8  ;;  %1756 = vmatpush.bf16.msrb.mxu3 %v5447_v25 }
 0x5d7   : > { %v1853_v58 = vpack.c.bf16 %v5435_v15, %v5433_v16 }
 0x600   : > { %v1499_v26 = vpop.f32.mrf.mxu2 }
 0x608   : > { %v1501_v60 = vpop.f32.mrf.mxu2 }
 0x609   : > { %v1509_v29 = vpack.c.bf16 %v1501_v60, %v1499_v26  ;;  %v2027_v26 = vmul.f32 %v5199_v57, %v5273_v52 }
 0x60b   : > { %4035 = vmatmul.msk.bf16.vlgmr.msrb.gmra.mxu0 %vm1406_vm1, %v1509_v29 }
 0x610   : > { %v1504_v31 = vpop.f32.mrf.mxu2 }
 0x615   : > { %v2084_v51 = vpop.permute.xlu2 %2083 }
 0x616   : > { %v2093_v0 = vadd.f32 %v2084_v51, %v2065_v19 }
 0x618   : > { %v1506_v53 = vpop.f32.mrf.mxu2 }
 0x619   : > { %v1510_v18 = vpack.c.bf16 %v1506_v53, %v1504_v31 }
 0x61b   : > { %4036 = vmatmul.msk.bf16.gmra.mxu0 %vm1406_vm1, %v1510_v18  ;;  %v2026_v18 = vmul.f32 %v5176_v17, %v5271_v34 }
 0x61d   : > { %v1898_v11 = vpop.permute.xlu2 %1897 }
 0x61e   : > { %v1908_v59 = vadd.f32 %v1898_v11, %v1856_v54 }
 0x61f   : > { %v1902_v14 = vpop.permute.xlu1 %1901 }
 0x620   : > { %v1910_v13 = vadd.f32 %v1902_v14, %v1858_v12 }
 0x624   : > { %v1719_v32 = vpop.f32.mrf.mxu2 }
 0x625   : > { %v2042_v23 = vpop.permute.xlu2 %2041 }
 0x626   : > { %v2053_v61 = vadd.f32 %v2042_v23, %v2025_v62 }
 0x628   : > { %v2057_v57 = vmul.f32 0.17677669, %v2053_v61 }
 0x62c   : > { %v1721_v39 = vpop.f32.mrf.mxu2 }
 0x62d   : > { %v1729_v43 = vpack.c.bf16 %v1721_v39, %v1719_v32  ;;  %v1900_v44 = vpop.permute.xlu0 %1899  ;;  %v2048_v38 = vpop.permute.xlu2 %2047 }
 0x62e   : > { %v1909_v35 = vadd.f32 %v1900_v44, %v1857_v37  ;;  %v2056_v8 = vadd.f32 %v2048_v38, %v2028_v2 }
 0x62f   : > { %v1896_v22 = vpop.permute.xlu1 %1895  ;;  %4025 = vmatmul.msk.bf16.vlgmr.msrb.gmra.mxu3 %vm1406_vm1, %v1729_v43 }
 0x630   : > { %v1912_v4 = vpack.c.bf16 %v1910_v13, %v1909_v35  ;;  %v1907_v21 = vadd.f32 %v1896_v22, %v1855_v41  ;;  %v2060_v40 = vmul.f32 0.17677669, %v2056_v8 }
 0x632   : > { %v1911_v33 = vpack.c.bf16 %v1908_v59, %v1907_v21  ;;  %1919 = vrot.lane.b32.xlu0 %v1912_v4, %s4626_s17 }
 0x634   : > { %v1724_v46 = vpop.f32.mrf.mxu2  ;;  %1917 = vrot.lane.b32.xlu2 %v1911_v33, %s4626_s17 }
 0x635   : > { %v2086_v20 = vpop.permute.xlu0 %2085 }
 0x636   : > { %v2094_v47 = vadd.f32 %v2086_v20, %v2066_v27 }
 0x637   : > { %v2082_v30 = vpop.permute.xlu1 %2081 }
 0x638   : > { %v2096_v9 = vpack.c.bf16 %v2094_v47, %v2093_v0  ;;  %v2092_v24 = vadd.f32 %v2082_v30, %v2064_v55 }
 0x63a   : > { %2107 = vrot.lane.b32.xlu1 %v2096_v9, %s4632_s22 }
 0x63c   : > { %v1726_v28 = vpop.f32.mrf.mxu2 }
 0x63d   : > { %v1730_v56 = vpack.c.bf16 %v1726_v28, %v1724_v46  ;;  %v2080_v63 = vpop.permute.xlu0 %2079 }
 0x63e   : > { %v2091_v36 = vadd.f32 %v2080_v63, %v2063_v7 }
 0x63f   : > { %4026 = vmatmul.msk.bf16.gmra.mxu3 %vm1406_vm1, %v1730_v56  ;;  %v2046_v60 = vpop.permute.xlu1 %2045 }
 0x640   : > { %v2095_v29 = vpack.c.bf16 %v2092_v24, %v2091_v36  ;;  %v2055_v48 = vadd.f32 %v2046_v60, %v2027_v26 }
 0x642   : > { %v2059_v31 = vmul.f32 0.17677669, %v2055_v48  ;;  %2105 = vrot.lane.b32.xlu0 %v2095_v29, %s4632_s22  ;;  %s6558_s22 = scalar_lea.vmem %s6516_s7, %s4760_s2 }
 0x644   : > { %v2062_v53 = vpack.c.bf16 %v2060_v40, %v2059_v31 }
 0x645   : > { %v2044_v51 = vpop.permute.xlu0 %2043 }
 0x646   : > { %v2054_v32 = vadd.f32 %v2044_v51, %v2026_v18  ;;  %2101 = vrot.lane.b32.xlu2 %v2062_v53, %s4631_s3 }
 0x648   : > { %v2058_v52 = vmul.f32 0.17677669, %v2054_v32 }
 0x64a   : > { %v2061_v11 = vpack.c.bf16 %v2058_v52, %v2057_v57 }
 0x64c   : > { %2099 = vrot.lane.b32.xlu1 %v2061_v11, %s4631_s3 }
 0x688   : > { %v1795_v31 = vpop.f32.mrf.mxu0 }
 0x68e   : > { %v1918_v49 = vpop.permute.xlu2 %1917 }
 0x68f   : > { %v1928_v39 = vsel %vm1406_vm1, %v1918_v49, 0 }
 0x6a4   : > { %v1920_v14 = vpop.permute.xlu0 %1919 }
 0x6a5   : > { %v1931_v6 = vsel %vm1406_vm1, %v1920_v14, 0 }
 0x6a6   : > { %1939 = vmatpush.bf16.xpose.msra.mxu1 %v1931_v6 }
 0x6ac   : > { %v2108_v12 = vpop.permute.xlu1 %2107 }
 0x6ad   : > { %v2119_v37 = vsel %vm1406_vm1, %v2108_v12, 0  ;;  %v1797_v12 = vpop.f32.mrf.mxu0 }
 0x6ae   : > { %1940 = vmatpush.bf16.xpose.msra.mxu1 %v1928_v39  ;;  %2127 = vmatpush.bf16.xpose.msra.mxu3 %v2119_v37 }
 0x6b4   : > { %v2106_v17 = vpop.permute.xlu0 %2105 }
 0x6b5   : > { %v2116_v34 = vsel %vm1406_vm1, %v2106_v17, 0  ;;  %4037 = vmatmul.msk.bf16.vlgmr.msra.gmra.mxu1 %vm1406_vm1, %v1853_v58 }
 0x6b6   : > { %2233 = vmatpush.bf16.msrb.mxu1 %v5442_v5  ;;  %2128 = vmatpush.bf16.xpose.msra.mxu3 %v2116_v34  ;;  %v2102_v5 = vpop.permute.xlu2 %2101 }
 0x6ba   : > { %2234 = vmatpush.bf16.msrb.mxu1 %v5447_v25  ;;  %v5499_v25 = vpop.f32.mrf.mxu3 }
 0x6be   : > { %v2100_v43 = vpop.permute.xlu1 %2099 }
 0x6bf   : > { %4041 = vmatmul.msk.bf16.vlgmr.msra.gmra.mxu3 %vm1406_vm1, %v2100_v43 }
 0x6c2   : > { %v5501_v44 = vpop.f32.mrf.mxu3 }
 0x6c5   : > { %4038 = vmatmul.msk.bf16.gmra.mxu1 %vm1406_vm1, %v1854_v1 }
 0x6ca   : > { %v5503_v54 = vpop.f32.mrf.mxu3 }
 0x6cf   : > { %4042 = vmatmul.msk.bf16.gmra.mxu3 %vm1406_vm1, %v2102_v5  ;;  %v1800_v5 = vpop.f32.mrf.mxu0 }
 0x6d2   : > { %v5506_v58 = vpop.f32.mrf.mxu3 }
 0x732   : > { %v1942_v16 = vpop.f32.mrf.mxu1 }
 0x733   : > { %v1952_v15 = vsel %vm1406_vm1, %v1942_v16, -inf }
 0x734   : > { %1953 = vmax.xlane.f32.xlu0 %v1952_v15 }
 0x73a   : > { %v1944_v13 = vpop.f32.mrf.mxu1 }
 0x73b   : > { %v1955_v3 = vsel %vm1406_vm1, %v1944_v13, -inf }
 0x73c   : > { %1956 = vmax.xlane.f32.xlu1 %v1955_v3 }
 0x742   : > { %v1947_v42 = vpop.f32.mrf.mxu1  ;;  %v2130_v1 = vpop.f32.mrf.mxu3 }
 0x743   : > { %v2140_v35 = vsel %vm1406_vm1, %v2130_v1, -inf  ;;  %v1958_v4 = vsel %vm1406_vm1, %v1947_v42, -inf }
 0x744   : > { %2141 = vmax.xlane.f32.xlu2 %v2140_v35  ;;  %v1802_v35 = vpop.f32.mrf.mxu0 }
 0x74a   : > { %v1949_v41 = vpop.f32.mrf.mxu1  ;;  %v2132_v22 = vpop.f32.mrf.mxu3 }
 0x74b   : > { %v1961_v59 = vsel %vm1406_vm1, %v1949_v41, -inf  ;;  %v2143_v21 = vsel %vm1406_vm1, %v2132_v22, -inf }
 0x74c   : > { %1962 = vmax.xlane.f32.xlu1 %v1961_v59  ;;  %1959 = vmax.xlane.f32.xlu2 %v1958_v4 }
 0x74d   : > { %2144 = vmax.xlane.f32.xlu0 %v2143_v21 }
 0x752   : > { %v2135_v23 = vpop.f32.mrf.mxu3 }
 0x753   : > { %v2146_v33 = vsel %vm1406_vm1, %v2135_v23, -inf }
 0x755   : > { %2147 = vmax.xlane.f32.xlu0 %v2146_v33  ;;  %v4577_v33 = vld [vmem:[#allocation2] sm:$0xff] }
 0x75a   : > { %v2137_v19 = vpop.f32.mrf.mxu3 }
 0x75b   : > { %v2149_v46 = vsel %vm1406_vm1, %v2137_v19, -inf }
 0x75c   : > { %2150 = vmax.xlane.f32.xlu2 %v2149_v46  ;;  %v4578_v46 = vld [vmem:[#allocation2 + $0x10] sm:$0xff] }
 0x7a7   : > { %v1954_v27 = vpop.xlane.xlu0 %1953 }
 0x7a8   : > { %v1964_v20 = vsub.f32 %v1942_v16, %v1954_v27  ;;  %v1798_v16 = vadd.f32 %v1797_v12, %v5501_v44 }
 0x7aa   : > { %v1968_v0 = vmul.f32 1.442695, %v1964_v20 }
 0x7ac   : > { %4459 = vpow2.f32 %v1968_v0 }
 0x7af   : > { %v1957_v47 = vpop.xlane.xlu1 %1956 }
 0x7b0   : > { %v1965_v30 = vsub.f32 %v1944_v13, %v1957_v47  ;;  %v4575_v13 = vld [vmem:[#allocation2 + $0x8] sm:$0xff] }
 0x7b1   : > { %v2272_v3 = vadd.f32 %v4575_v13, %v1798_v16 }
 0x7b2   : > { %v5515_v9 = vpop.eup %4459  ;;  %v1970_v38 = vmul.f32 1.442695, %v1965_v30 }
 0x7b3   : > { %v1976_v2 = vsel %vm1406_vm1, %v5515_v9, 0.0 }
 0x7b4   : > { %4461 = vpow2.f32 %v1970_v38  ;;  %1977 = vadd.xlane.f32.xlu1 %v1976_v2 }
 0x7b7   : > { %v2142_v55 = vpop.xlane.xlu2 %2141 }
 0x7b8   : > { %v2152_v60 = vsub.f32 %v2130_v1, %v2142_v55  ;;  %v5555_v1 = vld [vmem:[%s6558_s22] ss:$0 sm:$0xff] }
 0x7b9   : > { %v5558_v44 = vadd.f32 %v5555_v1, %v2272_v3 }
 0x7ba   : > { %v5519_v28 = vpop.eup %4461  ;;  %v2156_v40 = vmul.f32 1.442695, %v2152_v60 }
 0x7bb   : > { %v1979_v7 = vsel %vm1406_vm1, %v5519_v28, 0.0  ;;  %v2296_v59 = vsel %vm937_vm2, %v5558_v44, 0.0 }
 0x7bc   : > { %1980 = vadd.xlane.f32.xlu0 %v1979_v7 }
 0x7bf   : > { %v1963_v56 = vpop.xlane.xlu1 %1962  ;;  %v1960_v63 = vpop.xlane.xlu2 %1959 }
 0x7c0   : > { %v1967_v8 = vsub.f32 %v1949_v41, %v1963_v56  ;;  %v1966_v24 = vsub.f32 %v1947_v42, %v1960_v63  ;;  %v2145_v36 = vpop.xlane.xlu0 %2144  ;;  %v1803_v41 = vadd.f32 %v1802_v35, %v5506_v58 }
 0x7c1   : > { %v2153_v26 = vsub.f32 %v2132_v22, %v2145_v36 }
 0x7c2   : > { %v1974_v29 = vmul.f32 1.442695, %v1967_v8  ;;  %v1972_v48 = vmul.f32 1.442695, %v1966_v24 }
 0x7c3   : > { %v2158_v62 = vmul.f32 1.442695, %v2153_v26 }
 0x7c4   : > { %4463 = vpow2.f32 %v1974_v29 }
 0x7c5   : > { %4465 = vpow2.f32 %v1972_v48 }
 0x7c6   : > { %4467 = vpow2.f32 %v2158_v62 }
 0x7c7   : > { %4469 = vpow2.f32 %v2156_v40 }
 0x7c8   : > { %v2148_v61 = vpop.xlane.xlu0 %2147 }
 0x7c9   : > { %v2154_v18 = vsub.f32 %v2135_v23, %v2148_v61  ;;  %v1796_v23 = vadd.f32 %v1795_v31, %v5499_v25 }
 0x7ca   : > { %v5523_v53 = vpop.eup %4463 }
 0x7cb   : > { %v5525_v51 = vpop.eup %4465  ;;  %v1985_v32 = vsel %vm1406_vm1, %v5523_v53, 0.0  ;;  %v2160_v14 = vmul.f32 1.442695, %v2154_v18  ;;  %v2271_v58 = vadd.f32 %v4577_v33, %v1796_v23 }
 0x7cc   : > { %v5529_v57 = vpop.eup %4467  ;;  %v1982_v52 = vsel %vm1406_vm1, %v5525_v51, 0.0  ;;  %1986 = vadd.xlane.f32.xlu2 %v1985_v32 }
 0x7cd   : > { %1983 = vadd.xlane.f32.xlu0 %v1982_v52  ;;  %v2167_v11 = vsel %vm1406_vm1, %v5529_v57, 0.0  ;;  %v5535_v49 = vpop.eup %4469  ;;  %4471 = vpow2.f32 %v2160_v14 }
 0x7ce   : > { %2168 = vadd.xlane.f32.xlu1 %v2167_v11  ;;  %v2164_v37 = vsel %vm1406_vm1, %v5535_v49, 0.0 }
 0x7cf   : > { %v2151_v6 = vpop.xlane.xlu2 %2150 }
 0x7d0   : > { %v2155_v39 = vsub.f32 %v2137_v19, %v2151_v6  ;;  %v1801_v19 = vadd.f32 %v1800_v5, %v5503_v54 }
 0x7d2   : > { %v2162_v17 = vmul.f32 1.442695, %v2155_v39  ;;  %v2273_v27 = vadd.f32 %v4578_v46, %v1801_v19 }
 0x7d3   : > { %v5539_v34 = vpop.eup %4471 }
 0x7d4   : > { %2165 = vadd.xlane.f32.xlu2 %v2164_v37  ;;  %4473 = vpow2.f32 %v2162_v17  ;;  %v2170_v43 = vsel %vm1406_vm1, %v5539_v34, 0.0  ;;  %v5578_v0 = vadd.f32 %v5555_v1, %v2273_v27  ;;  %v4580_v27 = vld [vmem:[#allocation2 + $0x28] sm:$0xff] }
 0x7d6   : > { %v2299_v47 = vsel %vm937_vm2, %v5578_v0, 0.0 }
 0x7da   : > { %v5544_v15 = vpop.eup %4473 }
 0x7db   : > { %v2173_v42 = vsel %vm1406_vm1, %v5544_v15, 0.0 }
 0x7dc   : > { %2171 = vadd.xlane.f32.xlu2 %v2170_v43 }
 0x7e1   : > { %2188 = vrot.lane.b32.xlu0 %v5358_v10, %s4631_s3  ;;  %v4576_v10 = vld [vmem:[#allocation2 + $0x18] sm:$0xff] }
 0x7e2   : > { %v2274_v22 = vadd.f32 %v4576_v10, %v1803_v41  ;;  %v4579_v41 = vld [vmem:[#allocation2 + $0x20] sm:$0xff] }
 0x7e4   : > { %2174 = vadd.xlane.f32.xlu2 %v2173_v42  ;;  %v5566_v4 = vadd.f32 %v5555_v1, %v2274_v22 }
 0x7e6   : > { %v2302_v21 = vsel %vm937_vm2, %v5566_v4, 0.0 }
 0x7e7   : > { %2190 = vrot.lane.b32.xlu1 %v5354_v50, %s4631_s3  ;;  %v5573_v50 = vadd.f32 %v5555_v1, %v2271_v58 }
 0x7e9   : > { %v2293_v20 = vsel %vm937_vm2, %v5573_v50, 0.0 }
 0x7ec   : > { %2297 = vadd.xlane.f32.xlu2 %v2296_v59 }
 0x7f4   : > { %2303 = vadd.xlane.f32.xlu2 %v2302_v21 }
 0x80b   : > { %2294 = vadd.xlane.f32.xlu0 %v2293_v20 }
 0x811   : > { %2300 = vadd.xlane.f32.xlu1 %v2299_v47 }
 0x827   : > { %v1978_v25 = vpop.xlane.xlu1 %1977 }
 0x828   : > { %4475 = vrcp.f32 %v1978_v25 }
 0x82e   : > { %v4476_v54 = vpop.eup %4475 }
 0x82f   : > { %v1981_v30 = vpop.xlane.xlu0 %1980  ;;  %v1992_v2 = vmul.f32 %v4476_v54, %v5515_v9 }
 0x830   : > { %4477 = vrcp.f32 %v1981_v30 }
 0x836   : > { %v4478_v38 = vpop.eup %4477 }
 0x837   : > { %v1993_v55 = vmul.f32 %v4478_v38, %v5519_v28 }
 0x839   : > { %v1996_v7 = vpack.c.bf16 %v1993_v55, %v1992_v2 }
 0x83b   : > { %4039 = vmatmul.msk.bf16.vlgmr.msrb.gmra.mxu2 %vm1406_vm1, %v1996_v7 }
 0x83f   : > { %v1987_v56 = vpop.xlane.xlu2 %1986 }
 0x840   : > { %4479 = vrcp.f32 %v1987_v56  ;;  %v1984_v63 = vpop.xlane.xlu0 %1983  ;;  %v4581_v56 = vld [vmem:[#allocation2 + $0x30] sm:$0xff] }
 0x841   : > { %4481 = vrcp.f32 %v1984_v63  ;;  %v2169_v9 = vpop.xlane.xlu1 %2168 }
 0x846   : > { %v4480_v8 = vpop.eup %4479 }
 0x847   : > { %v4482_v24 = vpop.eup %4481  ;;  %v1995_v36 = vmul.f32 %v4480_v8, %v5523_v53  ;;  %v2166_v29 = vpop.xlane.xlu2 %2165 }
 0x848   : > { %v1994_v26 = vmul.f32 %v4482_v24, %v5525_v51  ;;  %4483 = vrcp.f32 %v2166_v29 }
 0x849   : > { %4485 = vrcp.f32 %v2169_v9 }
 0x84a   : > { %v1997_v60 = vpack.c.bf16 %v1995_v36, %v1994_v26 }
 0x84c   : > { %4040 = vmatmul.msk.bf16.gmra.mxu2 %vm1406_vm1, %v1997_v60 }
 0x84e   : > { %v4484_v48 = vpop.eup %4483 }
 0x84f   : > { %v2172_v28 = vpop.xlane.xlu2 %2171  ;;  %v4486_v40 = vpop.eup %4485  ;;  %v2180_v31 = vmul.f32 %v4484_v48, %v5535_v49 }
 0x850   : > { %v2181_v61 = vmul.f32 %v4486_v40, %v5529_v57 }
 0x852   : > { %v2184_v53 = vpack.c.bf16 %v2181_v61, %v2180_v31  ;;  %v4582_v31 = vld [vmem:[#allocation2 + $0x38] sm:$0xff] }
 0x853   : > { %v2189_v18 = vpop.permute.xlu0 %2188 }
 0x857   : > { %v2175_v51 = vpop.xlane.xlu2 %2174 }
 0x858   : > { %4487 = vrcp.f32 %v2175_v51 }
 0x859   : > { %v2191_v62 = vpop.permute.xlu1 %2190  ;;  %4489 = vrcp.f32 %v2172_v28 }
 0x85a   : > { %2206 = vmatpush.bf16.msra.mxu0 %v2191_v62 }
 0x85e   : > { %2207 = vmatpush.bf16.msra.mxu0 %v2189_v18  ;;  %v4488_v32 = vpop.eup %4487 }
 0x85f   : > { %v4490_v52 = vpop.eup %4489  ;;  %v2183_v11 = vmul.f32 %v4488_v32, %v5544_v15  ;;  %v2298_v21 = vpop.xlane.xlu2 %2297 }
 0x860   : > { %v2182_v14 = vmul.f32 %v4490_v52, %v5539_v34  ;;  %v2318_v24 = vmul.f32 %v2298_v21, %v4861_v45 }
 0x861   : > { %4043 = vmatmul.msk.bf16.vlgmr.msra.gmra.mxu0 %vm1406_vm1, %v2184_v53 }
 0x862   : > { %v2185_v6 = vpack.c.bf16 %v2183_v11, %v2182_v14  ;;  %v5626_v9 = vsub.f32 %v5558_v44, %v2318_v24  ;;  %v4318_v24 = vld [vmem:[%s4798_s5 + $0x2c] sm:$0xf0] }
 0x864   : > { %v2334_v51 = vmul.f32 %v5626_v9, %v5626_v9 }
 0x867   : > { %v2304_v38 = vpop.xlane.xlu2 %2303 }
 0x868   : > { %v2320_v7 = vmul.f32 %v2304_v38, %v4861_v45 }
 0x86a   : > { %v5620_v26 = vsub.f32 %v5566_v4, %v2320_v7  ;;  %v4093_v7 = vld [vmem:[%s4798_s5 + $0x58] sm:$0xf0] }
 0x86c   : > { %v2336_v18 = vmul.f32 %v5620_v26, %v5620_v26 }
 0x86e   : > { %v2350_v52 = vsel %vm937_vm2, %v2336_v18, 0.0  ;;  %v4319_v18 = vld [vmem:[%s4798_s5 + $0x34] sm:$0xf0] }
 0x871   : > { %4044 = vmatmul.msk.bf16.gmra.mxu0 %vm1406_vm1, %v2185_v6  ;;  %v2344_v6 = vsel %vm937_vm2, %v2334_v51, 0.0  ;;  %v4077_v51 = vld [vmem:[%s4798_s5 + $0x38] sm:$0xf0] }
 0x87e   : > { %v2295_v33 = vpop.xlane.xlu0 %2294 }
 0x87f   : > { %v2317_v46 = vmul.f32 %v2295_v33, %v4861_v45  ;;  %v4083_v33 = vld [vmem:[%s4798_s5 + $0x40] sm:$0xf] }
 0x881   : > { %v5608_v30 = vsub.f32 %v5573_v50, %v2317_v46 }
 0x883   : > { %v2333_v8 = vmul.f32 %v5608_v30, %v5608_v30 }
 0x884   : > { %v2301_v62 = vpop.xlane.xlu1 %2300 }
 0x885   : > { %v2341_v29 = vsel %vm937_vm2, %v2333_v8, 0.0  ;;  %v2319_v53 = vmul.f32 %v2301_v62, %v4861_v45  ;;  %v4067_v8 = vld [vmem:[%s4798_s5 + $0x20] sm:$0xf]  ;;  %v4075_v62 = vld [vmem:[%s4798_s5 + $0x28] sm:$0xf] }
 0x887   : > { %v5640_v14 = vsub.f32 %v5578_v0, %v2319_v53  ;;  %v4317_v53 = vld [vmem:[%s4798_s5 + $0x2c] sm:$0xf] }
 0x8be   : > { %v2013_v49 = vpop.f32.mrf.mxu2 }
 0x8c6   : > { %v2015_v12 = vpop.f32.mrf.mxu2 }
 0x8c7   : > { %v2023_v57 = vpack.c.bf16 %v2015_v12, %v2013_v49 }
 0x8c9   : > { %4047 = vmatmul.msk.bf16.vlgmr.msra.gmra.mxu2 %vm1406_vm1, %v2023_v57 }
 0x8cf   : > { %v2018_v39 = vpop.f32.mrf.mxu2 }
 0x8d7   : > { %v2020_v37 = vpop.f32.mrf.mxu2 }
 0x8d8   : > { %v2024_v17 = vpack.c.bf16 %v2020_v37, %v2018_v39 }
 0x8da   : > { %4048 = vmatmul.msk.bf16.gmra.mxu2 %vm1406_vm1, %v2024_v17  ;;  %v4099_v17 = vld [vmem:[%s4798_s5 + $0x60] sm:$0xf] }
 0x8de   : > { %v2209_v43 = vpop.f32.mrf.mxu0 }
 0x8e6   : > { %v2211_v5 = vpop.f32.mrf.mxu0 }
 0x8e7   : > { %v2219_v16 = vpack.c.bf16 %v2211_v5, %v2209_v43  ;;  %v4326_v43 = vld [vmem:[%s4798_s5 + $0x6c] sm:$0xf0]  ;;  %v4324_v5 = vld [vmem:[%s4798_s5 + $0x64] sm:$0xf] }
 0x8e9   : > { %4045 = vmatmul.msk.bf16.vlgmr.msrb.gmra.mxu1 %vm1406_vm1, %v2219_v16 }
 0x8ee   : > { %v2214_v15 = vpop.f32.mrf.mxu0 }
 0x8f6   : > { %v2216_v34 = vpop.f32.mrf.mxu0 }
 0x8f7   : > { %v2220_v13 = vpack.c.bf16 %v2216_v34, %v2214_v15  ;;  %v4100_v15 = vor.u32 %v4326_v43, %v4099_v17  ;;  %v4101_v34 = vld [vmem:[%s4798_s5 + $0x70] sm:$0xf0] }
 0x8f9   : > { %4046 = vmatmul.msk.bf16.gmra.mxu1 %vm1406_vm1, %v2220_v13  ;;  %v4107_v13 = vld [vmem:[%s4798_s5 + $0x68] sm:$0xf]  ;;  %2617 = vmatpush.bf16.msrb.mxu3 %v4100_v15 }
 0x94c   : > { %v2261_v3 = vpop.f32.mrf.mxu2 }
 0x954   : > { %v2263_v22 = vpop.f32.mrf.mxu2 }
 0x95d   : > { %v2266_v25 = vpop.f32.mrf.mxu2 }
 0x965   : > { %v2268_v28 = vpop.f32.mrf.mxu2 }
 0x966   : > { %v2236_v42 = vpop.f32.mrf.mxu1 }
 0x967   : > { %v2262_v35 = vadd.f32 %v2261_v3, %v2236_v42  ;;  %v4104_v42 = vor.u32 %v4324_v5, %v4101_v34  ;;  %v4053_v5 = vld [vmem:[%s4798_s5 + $0x10] sm:$0xf0]  ;;  %v4315_v34 = vld [vmem:[%s4798_s5 + $0x14] sm:$0xf0] }
 0x969   : > { %v2275_v10 = vadd.f32 %v4579_v41, %v2262_v35  ;;  %v4327_v35 = vld [vmem:[%s4798_s5 + $0x74] sm:$0xf0]  ;;  %v4325_v41 = vld [vmem:[%s4798_s5 + $0x6c] sm:$0xf]  ;;  %2646 = vmatpush.bf16.msrb.mxu0 %v4104_v42 }
 0x96a   : > { %v4108_v21 = vor.u32 %v4327_v35, %v4107_v13  ;;  %v4313_v13 = vld [vmem:[%s4798_s5 + $0xc] sm:$0xf] }
 0x96b   : > { %v5599_v59 = vadd.f32 %v5555_v1, %v2275_v10  ;;  %v4109_v10 = vld [vmem:[%s4798_s5 + $0x78] sm:$0xf0] }
 0x96c   : > { %2675 = vmatpush.bf16.msra.mxu1 %v4108_v21 }
 0x96d   : > { %v2305_v23 = vsel %vm937_vm2, %v5599_v59, 0.0 }
 0x96e   : > { %2306 = vadd.xlane.f32.xlu2 %v2305_v23  ;;  %v2238_v58 = vpop.f32.mrf.mxu1  ;;  %v4112_v23 = vor.u32 %v4325_v41, %v4109_v10 }
 0x96f   : > { %v2264_v19 = vadd.f32 %v2263_v22, %v2238_v58  ;;  %v4322_v58 = vld [vmem:[%s4798_s5 + $0x4c] sm:$0xf0] }
 0x970   : > { %2704 = vmatpush.bf16.msrb.mxu2 %v4112_v23 }
 0x971   : > { %v2276_v20 = vadd.f32 %v4580_v27, %v2264_v19  ;;  %v4320_v19 = vld [vmem:[%s4798_s5 + $0x44] sm:$0xf]  ;;  %v4084_v27 = vor.u32 %v4322_v58, %v4083_v33 }
 0x973   : > { %v5605_v47 = vadd.f32 %v5555_v1, %v2276_v20  ;;  %v4085_v20 = vld [vmem:[%s4798_s5 + $0x50] sm:$0xf0]  ;;  %2618 = vmatpush.bf16.msrb.mxu3 %v4084_v27 }
 0x974   : > { %v4088_v38 = vor.u32 %v4320_v19, %v4085_v20 }
 0x975   : > { %v2308_v54 = vsel %vm937_vm2, %v5605_v47, 0.0 }
 0x976   : > { %2309 = vadd.xlane.f32.xlu2 %v2308_v54  ;;  %v2241_v2 = vpop.f32.mrf.mxu1  ;;  %v4323_v54 = vld [vmem:[%s4798_s5 + $0x54] sm:$0xf0]  ;;  %2647 = vmatpush.bf16.msrb.mxu0 %v4088_v38 }
 0x977   : > { %v2267_v55 = vadd.f32 %v2266_v25, %v2241_v2  ;;  %v4091_v25 = vld [vmem:[%s4798_s5 + $0x48] sm:$0xf] }
 0x978   : > { %v4092_v2 = vor.u32 %v4323_v54, %v4091_v25 }
 0x979   : > { %v2277_v63 = vadd.f32 %v4581_v56, %v2267_v55  ;;  %v4321_v55 = vld [vmem:[%s4798_s5 + $0x4c] sm:$0xf] }
 0x97a   : > { %2676 = vmatpush.bf16.msra.mxu1 %v4092_v2 }
 0x97b   : > { %v5617_v36 = vadd.f32 %v5555_v1, %v2277_v63  ;;  %v4096_v63 = vor.u32 %v4321_v55, %v4093_v7 }
 0x97d   : > { %v2311_v60 = vsel %vm937_vm2, %v5617_v36, 0.0  ;;  %2705 = vmatpush.bf16.msrb.mxu2 %v4096_v63 }
 0x97e   : > { %2312 = vadd.xlane.f32.xlu0 %v2311_v60  ;;  %v2243_v48 = vpop.f32.mrf.mxu1  ;;  %2342 = vadd.xlane.f32.xlu2 %v2341_v29  ;;  %v4316_v60 = vld [vmem:[%s4798_s5 + $0x24] sm:$0xf] }
 0x97f   : > { %v2269_v40 = vadd.f32 %v2268_v28, %v2243_v48  ;;  %v4068_v28 = vor.u32 %v4318_v24, %v4067_v8  ;;  %v4069_v48 = vld [vmem:[%s4798_s5 + $0x30] sm:$0xf0] }
 0x981   : > { %v2278_v61 = vadd.f32 %v4582_v31, %v2269_v40  ;;  %2619 = vmatpush.bf16.msrb.mxu3 %v4068_v28 }
 0x983   : > { %v5634_v32 = vadd.f32 %v5555_v1, %v2278_v61  ;;  %v2335_v1 = vmul.f32 %v5640_v14, %v5640_v14  ;;  %v4072_v61 = vor.u32 %v4316_v60, %v4069_v48 }
 0x985   : > { %v2314_v11 = vsel %vm937_vm2, %v5634_v32, 0.0  ;;  %v2347_v49 = vsel %vm937_vm2, %v2335_v1, 0.0  ;;  %v4080_v1 = vor.u32 %v4317_v53, %v4077_v51  ;;  %2648 = vmatpush.bf16.msrb.mxu0 %v4072_v61 }
 0x986   : > { %2351 = vadd.xlane.f32.xlu0 %v2350_v52  ;;  %2315 = vadd.xlane.f32.xlu1 %v2314_v11 }
 0x987   : > { %2345 = vadd.xlane.f32.xlu2 %v2344_v6  ;;  %v4076_v6 = vor.u32 %v4319_v18, %v4075_v62  ;;  %2706 = vmatpush.bf16.msrb.mxu2 %v4080_v1 }
 0x989   : > { %2677 = vmatpush.bf16.msra.mxu1 %v4076_v6 }
 0x98f   : > { %2348 = vadd.xlane.f32.xlu2 %v2347_v49  ;;  %v4051_v49 = vld [vmem:[%s4798_s5] sm:$0xf] }
 0x9e1   : > { %v2307_v12 = vpop.xlane.xlu2 %2306 }
 0x9e2   : > { %v2321_v57 = vmul.f32 %v2307_v12, %v4861_v45  ;;  %v4314_v12 = vld [vmem:[%s4798_s5 + $0xc] sm:$0xf0] }
 0x9e3   : > { %v4052_v43 = vor.u32 %v4314_v12, %v4051_v49 }
 0x9e4   : > { %v5648_v39 = vsub.f32 %v5599_v59, %v2321_v57  ;;  %v4312_v57 = vld [vmem:[%s4798_s5 + $0x4] sm:$0xf] }
 0x9e5   : > { %v4056_v15 = vor.u32 %v4312_v57, %v4053_v5  ;;  %2620 = vmatpush.bf16.msrb.mxu3 %v4052_v43  ;;  %v5723_v43 = vld [vmem:[%s6560_s21] ss:$0 sm:$0xff]  ;;  %s6582_s21 = sld [smem:[#allocation13_spill]] (!%p4209_p6) }
 0x9e6   : > { %v2337_v37 = vmul.f32 %v5648_v39, %v5648_v39 }
 0x9e7   : > { %2649 = vmatpush.bf16.msrb.mxu0 %v4056_v15 }
 0x9e8   : > { %v2353_v16 = vsel %vm937_vm2, %v2337_v37, 0.0 }
 0x9e9   : > { %v2310_v3 = vpop.xlane.xlu2 %2309  ;;  %2354 = vadd.xlane.f32.xlu1 %v2353_v16  ;;  %v4059_v16 = vld [vmem:[%s4798_s5 + $0x8] sm:$0xf] }
 0x9ea   : > { %v2322_v22 = vmul.f32 %v2310_v3, %v4861_v45  ;;  %v4061_v3 = vld [vmem:[%s4798_s5 + $0x18] sm:$0xf0]  ;;  %v4060_v35 = vor.u32 %v4315_v34, %v4059_v16 }
 0x9eb   : > { %v4064_v41 = vor.u32 %v4313_v13, %v4061_v3 }
 0x9ec   : > { %v5666_v46 = vsub.f32 %v5605_v47, %v2322_v22  ;;  %2678 = vmatpush.bf16.msra.mxu1 %v4060_v35 }
 0x9ed   : > { %2707 = vmatpush.bf16.msrb.mxu2 %v4064_v41 }
 0x9ee   : > { %v2338_v56 = vmul.f32 %v5666_v46, %v5666_v46 }
 0x9f0   : > { %v2356_v29 = vsel %vm937_vm2, %v2338_v56, 0.0 }
 0x9f1   : > { %2357 = vadd.xlane.f32.xlu2 %v2356_v29  ;;  %v2343_v40 = vpop.xlane.xlu2 %2342  ;;  %v2313_v31 = vpop.xlane.xlu0 %2312 }
 0x9f2   : > { %v2365_v52 = vmul.f32 %v2343_v40, %v4861_v45  ;;  %v2323_v11 = vmul.f32 %v2313_v31, %v4861_v45 }
 0x9f4   : > { %v2373_v37 = vadd.f32 1e-05, %v2365_v52  ;;  %v5690_v17 = vsub.f32 %v5617_v36, %v2323_v11  ;;  %v5715_v11 = vld [vmem:[%s6559_s25] ss:$0 sm:$0xff]  ;;  %s6581_s25 = sld [smem:[#allocation12_spill]] (!%p4209_p6) }
 0x9f6   : > { %4491 = vrsqrt.f32 %v2373_v37  ;;  %v2339_v42 = vmul.f32 %v5690_v17, %v5690_v17  ;;  %vm2387_vm0 = vweird.f32 %v2373_v37 }
 0x9f8   : > { %v2359_v10 = vsel %vm937_vm2, %v2339_v42, 0.0 }
 0x9f9   : > { %v2316_v22 = vpop.xlane.xlu1 %2315  ;;  %2360 = vadd.xlane.f32.xlu0 %v2359_v10  ;;  %v2352_v21 = vpop.xlane.xlu0 %2351 }
 0x9fa   : > { %v2324_v23 = vmul.f32 %v2316_v22, %v4861_v45  ;;  %v2346_v33 = vpop.xlane.xlu2 %2345  ;;  %v2368_v58 = vmul.f32 %v2352_v21, %v4861_v45 }
 0x9fb   : > { %v2366_v19 = vmul.f32 %v2346_v33, %v4861_v45 }
 0x9fc   : > { %v4492_v27 = vpop.eup %4491  ;;  %v5704_v20 = vsub.f32 %v5634_v32, %v2324_v23  ;;  %v2376_v25 = vadd.f32 1e-05, %v2368_v58 }
 0x9fd   : > { %v2382_v54 = vmul.f32 %v4492_v27, %v2373_v37  ;;  %v2374_v38 = vadd.f32 1e-05, %v2366_v19  ;;  %vm2388_vm15 = vweird.f32 %v4492_v27 }
 0x9fe   : > { %4493 = vrsqrt.f32 %v2376_v25  ;;  %v2340_v2 = vmul.f32 %v5704_v20, %v5704_v20  ;;  %vm2389_vm1 = vmor %vm2387_vm0, %vm2388_vm15  ;;  %vm2417_vm10 = vweird.f32 %v2376_v25 }
 0x9ff   : > { %v2383_v55 = vmul.f32 %v4492_v27, %v2382_v54  ;;  %4495 = vrsqrt.f32 %v2374_v38  ;;  %vm2397_vm4 = vweird.f32 %v2374_v38 }
 0xa00   : > { %v2362_v7 = vsel %vm937_vm2, %v2340_v2, 0.0 }
 0xa01   : > { %v2384_v56 = vmul.f32 0.5, %v2383_v55  ;;  %2363 = vadd.xlane.f32.xlu1 %v2362_v7 }
 0xa02   : > { %v2349_v63 = vpop.xlane.xlu2 %2348 }
 0xa03   : > { %v2385_v8 = vsub.f32 1.5, %v2384_v56  ;;  %v2367_v24 = vmul.f32 %v2349_v63, %v4861_v45 }
 0xa04   : > { %v4494_v60 = vpop.eup %4493 }
 0xa05   : > { %v4496_v29 = vpop.eup %4495  ;;  %v2375_v28 = vadd.f32 1e-05, %v2367_v24  ;;  %v2386_v48 = vmul.f32 %v4492_v27, %v2385_v8  ;;  %v2412_v40 = vmul.f32 %v4494_v60, %v2376_v25  ;;  %vm2418_vm7 = vweird.f32 %v4494_v60 }
 0xa06   : > { %v2392_v62 = vmul.f32 %v4496_v29, %v2374_v38  ;;  %vm2398_vm3 = vweird.f32 %v4496_v29  ;;  %vm2419_vm11 = vmor %vm2417_vm10, %vm2418_vm7 }
 0xa07   : > { %4497 = vrsqrt.f32 %v2375_v28  ;;  %v2390_v61 = vsel %vm2389_vm1, %v4492_v27, %v2386_v48  ;;  %v2413_v53 = vmul.f32 %v4494_v60, %v2412_v40  ;;  %vm2399_vm5 = vmor %vm2397_vm4, %vm2398_vm3  ;;  %vm2407_vm8 = vweird.f32 %v2375_v28 }
 0xa08   : > { %v2393_v31 = vmul.f32 %v4496_v29, %v2392_v62  ;;  %v2461_v6 = vmul.f32 %v2390_v61, %v5608_v30 }
 0xa09   : > { %v2414_v49 = vmul.f32 0.5, %v2413_v53 }
 0xa0a   : > { %v2394_v18 = vmul.f32 0.5, %v2393_v31  ;;  %v2472_v5 = vmul.f32 %v5715_v11, %v2461_v6 }
 0xa0b   : > { %v2415_v15 = vsub.f32 1.5, %v2414_v49 }
 0xa0c   : > { %v2395_v51 = vsub.f32 1.5, %v2394_v18  ;;  %v2483_v3 = vadd.f32 %v5723_v43, %v2472_v5 }
 0xa0d   : > { %v4498_v52 = vpop.eup %4497  ;;  %v2416_v35 = vmul.f32 %v4494_v60, %v2415_v15 }
 0xa0e   : > { %v2396_v1 = vmul.f32 %v4496_v29, %v2395_v51  ;;  %v2402_v12 = vmul.f32 %v4498_v52, %v2375_v28  ;;  %vm2408_vm6 = vweird.f32 %v4498_v52 }
 0xa0f   : > { %vm2409_vm9 = vmor %vm2407_vm8, %vm2408_vm6 }
 0xa10   : > { %v2400_v57 = vsel %vm2399_vm5, %v4496_v29, %v2396_v1  ;;  %v2403_v37 = vmul.f32 %v4498_v52, %v2402_v12 }
 0xa11   : > { %v2462_v16 = vmul.f32 %v2400_v57, %v5626_v9  ;;  %v2420_v9 = vsel %vm2419_vm11, %v4494_v60, %v2416_v35 }
 0xa12   : > { %v2404_v34 = vmul.f32 0.5, %v2403_v37  ;;  %v2464_v23 = vmul.f32 %v2420_v9, %v5620_v26 }
 0xa13   : > { %v2473_v30 = vmul.f32 %v5715_v11, %v2462_v16 }
 0xa14   : > { %v2405_v13 = vsub.f32 1.5, %v2404_v34  ;;  %v2475_v58 = vmul.f32 %v5715_v11, %v2464_v23 }
 0xa15   : > { %v2484_v42 = vadd.f32 %v5723_v43, %v2473_v30 }
 0xa16   : > { %v2406_v41 = vmul.f32 %v4498_v52, %v2405_v13  ;;  %v2486_v27 = vadd.f32 %v5723_v43, %v2475_v58 }
 0xa17   : > { %v2491_v10 = vpack.c.bf16 %v2484_v42, %v2483_v3 }
 0xa18   : > { %v2410_v22 = vsel %vm2409_vm9, %v4498_v52, %v2406_v41 }
 0xa19   : > { %4113 = vmatmul.msk.bf16.vlgmr.msrb.gmra.mxu3 %vm937_vm2, %v2491_v10  ;;  %4117 = vmatmul.msk.bf16.vlgmr.msrb.gmra.mxu0 %vm937_vm2, %v2491_v10  ;;  %v2463_v21 = vmul.f32 %v2410_v22, %v5640_v14 }
 0xa1a   : > { %4121 = vmatmul.msk.bf16.vlgmr.msra.gmra.mxu1 %vm937_vm2, %v2491_v10  ;;  %4125 = vmatmul.msk.bf16.vlgmr.msrb.gmra.mxu2 %vm937_vm2, %v2491_v10 }
 0xa1b   : > { %v2474_v33 = vmul.f32 %v5715_v11, %v2463_v21  ;;  %v4335_v21 = vld [vmem:[%s4809_s14 + $0x38] sm:$0xff] }
 0xa1c   : > { %3201 = vmatpush.bf16.msra.mxu3 %v4335_v21 }
 0xa1d   : > { %v2485_v19 = vadd.f32 %v5723_v43, %v2474_v33 }
 0xa1f   : > { %v2492_v25 = vpack.c.bf16 %v2486_v27, %v2485_v19  ;;  %v4334_v19 = vld [vmem:[%s4809_s14 + $0x30] sm:$0xff] }
 0xa20   : > { %3202 = vmatpush.bf16.msra.mxu3 %v4334_v19 }
 0xa29   : > { %4114 = vmatmul.msk.bf16.gmra.mxu3 %vm937_vm2, %v2492_v25  ;;  %4118 = vmatmul.msk.bf16.gmra.mxu0 %vm937_vm2, %v2492_v25 }
 0xa2a   : > { %4122 = vmatmul.msk.bf16.gmra.mxu1 %vm937_vm2, %v2492_v25  ;;  %4126 = vmatmul.msk.bf16.gmra.mxu2 %vm937_vm2, %v2492_v25 }
 0xa5c   : > { %v2355_v14 = vpop.xlane.xlu1 %2354 }
 0xa5d   : > { %v2369_v26 = vmul.f32 %v2355_v14, %v4861_v45 }
 0xa5f   : > { %v2377_v54 = vadd.f32 1e-05, %v2369_v26  ;;  %v4343_v26 = vld [vmem:[%s4809_s14 + $0x78] sm:$0xff] }
 0xa60   : > { %3230 = vmatpush.bf16.msra.mxu0 %v4343_v26 }
 0xa61   : > { %4499 = vrsqrt.f32 %v2377_v54  ;;  %vm2427_vm13 = vweird.f32 %v2377_v54 }
 0xa64   : > { %v2358_v38 = vpop.xlane.xlu2 %2357 }
 0xa65   : > { %v2370_v2 = vmul.f32 %v2358_v38, %v4861_v45 }
 0xa67   : > { %v4500_v55 = vpop.eup %4499  ;;  %v2378_v7 = vadd.f32 1e-05, %v2370_v2  ;;  %v4333_v2 = vld [vmem:[%s4809_s14 + $0x28] sm:$0xff] }
 0xa68   : > { %v2422_v56 = vmul.f32 %v4500_v55, %v2377_v54  ;;  %vm2428_vm12 = vweird.f32 %v4500_v55  ;;  %3203 = vmatpush.bf16.msra.mxu3 %v4333_v2 }
 0xa69   : > { %4501 = vrsqrt.f32 %v2378_v7  ;;  %vm2429_vm14 = vmor %vm2427_vm13, %vm2428_vm12  ;;  %vm2437_vm0 = vweird.f32 %v2378_v7 }
 0xa6a   : > { %v2423_v63 = vmul.f32 %v4500_v55, %v2422_v56 }
 0xa6c   : > { %v2424_v8 = vmul.f32 0.5, %v2423_v63  ;;  %v2361_v24 = vpop.xlane.xlu0 %2360  ;;  %v4341_v63 = vld [vmem:[%s4809_s14 + $0x68] sm:$0xff] }
 0xa6d   : > { %v2371_v60 = vmul.f32 %v2361_v24, %v4861_v45 }
 0xa6e   : > { %v2425_v29 = vsub.f32 1.5, %v2424_v8 }
 0xa6f   : > { %v4502_v28 = vpop.eup %4501  ;;  %v2379_v48 = vadd.f32 1e-05, %v2371_v60 }
 0xa70   : > { %v2426_v62 = vmul.f32 %v4500_v55, %v2425_v29  ;;  %v2432_v40 = vmul.f32 %v4502_v28, %v2378_v7  ;;  %vm2438_vm15 = vweird.f32 %v4502_v28  ;;  %v5769_v7 = vld [vmem:[%s4804_s15] sm:$0xf]  ;;  %v4331_v29 = vld [vmem:[%s4809_s14 + $0x18] sm:$0xff] }
 0xa71   : > { %4503 = vrsqrt.f32 %v2379_v48  ;;  %vm2439_vm1 = vmor %vm2437_vm0, %vm2438_vm15  ;;  %vm2447_vm4 = vweird.f32 %v2379_v48  ;;  %v5786_v60 = vperm.slane %v5769_v7, 3 }
 0xa72   : > { %v2433_v31 = vmul.f32 %v4502_v28, %v2432_v40  ;;  %v2430_v61 = vsel %vm2429_vm14, %v4500_v55, %v2426_v62  ;;  %v4330_v40 = vld [vmem:[%s4809_s14 + $0x10] sm:$0xff] }
 0xa73   : > { %v2465_v1 = vmul.f32 %v2430_v61, %v5648_v39 }
 0xa74   : > { %v2434_v18 = vmul.f32 0.5, %v2433_v31  ;;  %v2364_v53 = vpop.xlane.xlu1 %2363 }
 0xa75   : > { %v2372_v51 = vmul.f32 %v2364_v53, %v4861_v45  ;;  %v2476_v15 = vmul.f32 %v5715_v11, %v2465_v1  ;;  %v4339_v53 = vld [vmem:[%s4809_s14 + $0x58] sm:$0xff] }
 0xa76   : > { %v2435_v52 = vsub.f32 1.5, %v2434_v18 }
 0xa77   : > { %v4504_v6 = vpop.eup %4503  ;;  %v2380_v49 = vadd.f32 1e-05, %v2372_v51  ;;  %v2487_v39 = vadd.f32 %v5723_v43, %v2476_v15 }
 0xa78   : > { %v2436_v12 = vmul.f32 %v4502_v28, %v2435_v52  ;;  %v2442_v57 = vmul.f32 %v4504_v6, %v2379_v48  ;;  %vm2448_vm3 = vweird.f32 %v4504_v6 }
 0xa79   : > { %4505 = vrsqrt.f32 %v2380_v49  ;;  %vm2449_vm5 = vmor %vm2447_vm4, %vm2448_vm3  ;;  %vm2457_vm7 = vweird.f32 %v2380_v49 }
 0xa7a   : > { %v2440_v37 = vsel %vm2439_vm1, %v4502_v28, %v2436_v12  ;;  %v2443_v5 = vmul.f32 %v4504_v6, %v2442_v57  ;;  %v4340_v28 = vld [vmem:[%s4809_s14 + $0x60] sm:$0xff] }
 0xa7b   : > { %v2466_v16 = vmul.f32 %v2440_v37, %v5666_v46  ;;  %v4328_v37 = vld [vmem:[%s4809_s14] sm:$0xff] }
 0xa7c   : > { %v2444_v34 = vmul.f32 0.5, %v2443_v5 }
 0xa7d   : > { %v2477_v30 = vmul.f32 %v5715_v11, %v2466_v16 }
 0xa7e   : > { %v2445_v13 = vsub.f32 1.5, %v2444_v34 }
 0xa7f   : > { %v4506_v3 = vpop.eup %4505  ;;  %v2488_v42 = vadd.f32 %v5723_v43, %v2477_v30  ;;  %v4337_v30 = vld [vmem:[%s4809_s14 + $0x48] sm:$0xff] }
 0xa80   : > { %v2446_v35 = vmul.f32 %v4504_v6, %v2445_v13  ;;  %v2452_v41 = vmul.f32 %v4506_v3, %v2380_v49  ;;  %vm2458_vm6 = vweird.f32 %v4506_v3  ;;  %v4338_v49 = vld [vmem:[%s4809_s14 + $0x50] sm:$0xff] }
 0xa81   : > { %v2493_v10 = vpack.c.bf16 %v2488_v42, %v2487_v39  ;;  %vm2459_vm8 = vmor %vm2457_vm7, %vm2458_vm6 }
 0xa82   : > { %v2453_v22 = vmul.f32 %v4506_v3, %v2452_v41  ;;  %v2450_v46 = vsel %vm2449_vm5, %v4504_v6, %v2446_v35  ;;  %v4329_v6 = vld [vmem:[%s4809_s14 + $0x8] sm:$0xff] }
 0xa83   : > { %4115 = vmatmul.msk.bf16.gmra.mxu3 %vm937_vm2, %v2493_v10  ;;  %4119 = vmatmul.msk.bf16.gmra.mxu0 %vm937_vm2, %v2493_v10  ;;  %v2467_v33 = vmul.f32 %v2450_v46, %v5690_v17 }
 0xa84   : > { %v2454_v9 = vmul.f32 0.5, %v2453_v22  ;;  %4123 = vmatmul.msk.bf16.gmra.mxu1 %vm937_vm2, %v2493_v10  ;;  %4127 = vmatmul.msk.bf16.gmra.mxu2 %vm937_vm2, %v2493_v10  ;;  %v4336_v10 = vld [vmem:[%s4809_s14 + $0x40] sm:$0xff] }
 0xa85   : > { %v2478_v14 = vmul.f32 %v5715_v11, %v2467_v33 }
 0xa86   : > { %v2455_v23 = vsub.f32 1.5, %v2454_v9  ;;  %v5820_v9 = vperm.slane %v5769_v7, 0 }
 0xa87   : > { %v2489_v17 = vadd.f32 %v5723_v43, %v2478_v14 }
 0xa88   : > { %v2456_v58 = vmul.f32 %v4506_v3, %v2455_v23 }
 0xa8a   : > { %v2460_v27 = vsel %vm2459_vm8, %v4506_v3, %v2456_v58 }
 0xa8b   : > { %v2468_v25 = vmul.f32 %v2460_v27, %v5704_v20  ;;  %v4342_v20 = vld [vmem:[%s4809_s14 + $0x70] sm:$0xff] }
 0xa8c   : > { %3231 = vmatpush.bf16.msra.mxu0 %v4342_v20 }
 0xa8d   : > { %v2479_v54 = vmul.f32 %v5715_v11, %v2468_v25  ;;  %v5777_v11 = vperm.slane %v5769_v7, 2 }
 0xa8f   : > { %v2490_v38 = vadd.f32 %v5723_v43, %v2479_v54  ;;  %v4332_v43 = vld [vmem:[%s4809_s14 + $0x20] sm:$0xff] }
 0xa90   : > { %3204 = vmatpush.bf16.msra.mxu3 %v4332_v43  ;;  %3232 = vmatpush.bf16.msra.mxu0 %v4341_v63 }
 0xa91   : > { %v2494_v55 = vpack.c.bf16 %v2490_v38, %v2489_v17  ;;  %v5834_v38 = vperm.slane %v5769_v7, 1 }
 0xa93   : > { %4116 = vmatmul.msk.bf16.gmra.mxu3 %vm937_vm2, %v2494_v55  ;;  %4120 = vmatmul.msk.bf16.gmra.mxu0 %vm937_vm2, %v2494_v55 }
 0xa94   : > { %4124 = vmatmul.msk.bf16.gmra.mxu1 %vm937_vm2, %v2494_v55  ;;  %4128 = vmatmul.msk.bf16.gmra.mxu2 %vm937_vm2, %v2494_v55 }
 0xa95   : > { %3205 = vmatpush.bf16.msra.mxu3 %v4331_v29  ;;  %3233 = vmatpush.bf16.msra.mxu0 %v4340_v28 }
 0xa97   : > { %v2680_v56 = vpop.f32.mrf.mxu1 }
 0xa98   : > { %v5782_v8 = vadd.f32 %v2680_v56, %v5777_v11 }
 0xa99   : > { %3206 = vmatpush.bf16.msra.mxu3 %v4330_v40  ;;  %3234 = vmatpush.bf16.msra.mxu0 %v4339_v53 }
 0xa9a   : > { %v4129_v24 = vmul.f32 -1.442695, %v5782_v8 }
 0xa9c   : > { %4507 = vpow2.f32 %v4129_v24  ;;  %v2622_v19 = vpop.f32.mrf.mxu3 }
 0xa9d   : > { %v2709_v48 = vpop.f32.mrf.mxu2  ;;  %3207 = vmatpush.bf16.msra.mxu3 %v4329_v6  ;;  %3235 = vmatpush.bf16.msra.mxu0 %v4338_v49  ;;  %v5839_v43 = vadd.f32 %v2622_v19, %v5820_v9 }
 0xa9e   : > { %v5791_v62 = vadd.f32 %v2709_v48, %v5786_v60 }
 0xa9f   : > { %v2682_v31 = vpop.f32.mrf.mxu1 }
 0xaa0   : > { %v4130_v61 = vmul.f32 -1.442695, %v5791_v62  ;;  %v5796_v18 = vadd.f32 %v2682_v31, %v5777_v11 }
 0xaa1   : > { %3208 = vmatpush.bf16.msra.mxu3 %v4328_v37  ;;  %3236 = vmatpush.bf16.msra.mxu0 %v4337_v30 }
 0xaa2   : > { %v4508_v51 = vpop.eup %4507  ;;  %4509 = vpow2.f32 %v4130_v61  ;;  %v4131_v52 = vmul.f32 -1.442695, %v5796_v18 }
 0xaa3   : > { %v2777_v1 = vadd.f32 1.0, %v4508_v51 }
 0xaa4   : > { %4511 = vpow2.f32 %v4131_v52  ;;  %v2651_v52 = vpop.f32.mrf.mxu0 }
 0xaa5   : > { %4513 = vrcp.f32 %v2777_v1  ;;  %v2711_v12 = vpop.f32.mrf.mxu2  ;;  %3237 = vmatpush.bf16.msra.mxu0 %v4336_v10  ;;  %v2802_v14 = vand.u32 2147483647, %v2777_v1  ;;  %v2804_v2 = vand.u32 2147483648, %v2777_v1  ;;  %vm2798_vm10 = vweird.f32 %v2777_v1 }
 0xaa6   : > { %v5803_v57 = vadd.f32 %v2711_v12, %v5786_v60 }
 0xaa7   : > { %v2685_v5 = vpop.f32.mrf.mxu1  ;;  %vm5845_vm11 = vcmp.eq.f32.partialorder %v2802_v14, 8.507059e+37  ;;  %v2805_v31 = vor.u32 1.1754944e-38, %v2804_v2 }
 0xaa8   : > { %v4510_v16 = vpop.eup %4509  ;;  %v4132_v15 = vmul.f32 -1.442695, %v5803_v57  ;;  %v5808_v34 = vadd.f32 %v2685_v5, %v5777_v11 }
 0xaa9   : > { %v5811_v13 = vadd.f32 1.0, %v4510_v16 }
 0xaaa   : > { %v4512_v3 = vpop.eup %4511  ;;  %4515 = vpow2.f32 %v4132_v15  ;;  %v4133_v39 = vmul.f32 -1.442695, %v5808_v34 }
 0xaab   : > { %v4514_v42 = vpop.eup %4513  ;;  %4517 = vrcp.f32 %v5811_v13  ;;  %v5815_v41 = vadd.f32 1.0, %v4512_v3  ;;  %v2817_v28 = vand.u32 2147483647, %v5811_v13  ;;  %v2819_v53 = vand.u32 2147483648, %v5811_v13 }
 0xaac   : > { %v2794_v35 = vmul.f32 %v4514_v42, %v2777_v1  ;;  %4519 = vpow2.f32 %v4133_v39  ;;  %vm2799_vm9 = vweird.f32 %v4514_v42  ;;  %vm2813_vm13 = vweird.f32 %v5811_v13 }
 0xaad   : > { %v2714_v22 = vpop.f32.mrf.mxu2  ;;  %4521 = vrcp.f32 %v5815_v41  ;;  %vm5851_vm12 = vmor %vm2798_vm10, %vm2799_vm9  ;;  %v2832_v49 = vand.u32 2147483647, %v5815_v41  ;;  %v2834_v12 = vand.u32 2147483648, %v5815_v41  ;;  %vm5865_vm15 = vcmp.eq.f32.partialorder %v2817_v28, 8.507059e+37 }
 0xaae   : > { %v2795_v46 = vsub.f32 1.0, %v2794_v35  ;;  %v5823_v21 = vadd.f32 %v2714_v22, %v5786_v60  ;;  %vm2828_vm1 = vweird.f32 %v5815_v41 }
 0xaaf   : > { %v2687_v23 = vpop.f32.mrf.mxu1  ;;  %vm2833_vm4 = vcmp.eq.f32.partialorder %v2832_v49, 8.507059e+37  ;;  %v2835_v22 = vor.u32 1.1754944e-38, %v2834_v12  ;;  %v2652_v12 = vadd.f32 %v2651_v52, %v5834_v38 }
 0xab0   : > { %v4516_v33 = vpop.eup %4515  ;;  %v2796_v58 = vmul.f32 %v4514_v42, %v2795_v46  ;;  %v5826_v27 = vadd.f32 %v2687_v23, %v5777_v11  ;;  %v4134_v54 = vmul.f32 -1.442695, %v5823_v21 }
 0xab1   : > { %v5828_v25 = vpop.eup %4517  ;;  %v5830_v26 = vadd.f32 1.0, %v4516_v33 }
 0xab2   : > { %v4520_v17 = vpop.eup %4519  ;;  %v2809_v55 = vmul.f32 %v5828_v25, %v5811_v13  ;;  %v2797_v20 = vadd.f32 %v4514_v42, %v2796_v58  ;;  %v4135_v29 = vmul.f32 -1.442695, %v5826_v27  ;;  %vm2814_vm14 = vweird.f32 %v5828_v25  ;;  %v2624_v58 = vpop.f32.mrf.mxu3 }
 0xab3   : > { %4523 = vrcp.f32 %v5830_v26  ;;  %v4522_v56 = vpop.eup %4521  ;;  %v5842_v24 = vadd.f32 1.0, %v4520_v17  ;;  %vm5876_vm3 = vmor %vm2813_vm13, %vm2814_vm14  ;;  %v2849_v19 = vand.u32 2147483648, %v5830_v26  ;;  %v2625_v28 = vadd.f32 %v2624_v58, %v5820_v9 }
 0xab4   : > { %v2810_v63 = vsub.f32 1.0, %v2809_v55  ;;  %4525 = vpow2.f32 %v4134_v54  ;;  %v2824_v48 = vmul.f32 %v4522_v56, %v5815_v41  ;;  %v2801_v6 = vsel %vm5851_vm12, %v4514_v42, %v2797_v20 }
 0xab5   : > { %4527 = vrcp.f32 %v5842_v24  ;;  %v2716_v51 = vpop.f32.mrf.mxu2  ;;  %vm2829_vm0 = vweird.f32 %v4522_v56  ;;  %v2806_v39 = vsel %vm5845_vm11, %v2805_v31, %v2801_v6  ;;  %v2820_v42 = vor.u32 1.1754944e-38, %v2819_v53  ;;  %v2653_v31 = vpop.f32.mrf.mxu0 }
 0xab6   : > { %v2811_v61 = vmul.f32 %v5828_v25, %v2810_v63  ;;  %v2825_v1 = vsub.f32 1.0, %v2824_v48  ;;  %4529 = vpow2.f32 %v4135_v29  ;;  %v5870_v30 = vadd.f32 %v2716_v51, %v5786_v60  ;;  %vm2830_vm5 = vmor %vm2828_vm1, %vm2829_vm0 }
 0xab7   : > { %v3033_v54 = vmul.f32 %v2806_v39, %v5782_v8  ;;  %vm2843_vm7 = vweird.f32 %v5830_v26  ;;  %v2850_v53 = vor.u32 1.1754944e-38, %v2849_v19  ;;  %vm2858_vm11 = vweird.f32 %v5842_v24 }
 0xab8   : > { %v2812_v37 = vadd.f32 %v5828_v25, %v2811_v61  ;;  %v2826_v15 = vmul.f32 %v4522_v56, %v2825_v1  ;;  %v4136_v14 = vmul.f32 -1.442695, %v5870_v30 }
 0xab9   : > { %v4524_v5 = vpop.eup %4523  ;;  %v3049_v40 = vmul.f32 %v3033_v54, %v5839_v43  ;;  %v2654_v43 = vadd.f32 %v2653_v31, %v5834_v38 }
 0xaba   : > { %v4526_v3 = vpop.eup %4525  ;;  %v2839_v13 = vmul.f32 %v4524_v5, %v5830_v26  ;;  %v2827_v10 = vadd.f32 %v4522_v56, %v2826_v15  ;;  %v2816_v33 = vsel %vm5876_vm3, %v5828_v25, %v2812_v37  ;;  %vm2844_vm6 = vweird.f32 %v4524_v5 }
 0xabb   : > { %v5880_v46 = vadd.f32 1.0, %v4526_v3  ;;  %v5882_v23 = vpop.eup %4527  ;;  %v2847_v25 = vand.u32 2147483647, %v5830_v26  ;;  %v2821_v29 = vsel %vm5865_vm15, %v2820_v42, %v2816_v33  ;;  %vm2845_vm8 = vmor %vm2843_vm7, %vm2844_vm6  ;;  %v2627_v3 = vpop.f32.mrf.mxu3 }
 0xabc   : > { %v2840_v41 = vsub.f32 1.0, %v2839_v13  ;;  %v2831_v17 = vsel %vm2830_vm5, %v4522_v56, %v2827_v10  ;;  %v2854_v2 = vmul.f32 %v5882_v23, %v5842_v24  ;;  %v4530_v55 = vpop.eup %4529  ;;  %v3034_v51 = vmul.f32 %v2821_v29, %v5791_v62 }
 0xabd   : > { %4531 = vrcp.f32 %v5880_v46  ;;  %v2836_v20 = vsel %vm2833_vm4, %v2835_v22, %v2831_v17  ;;  %v5899_v48 = vadd.f32 1.0, %v4530_v55  ;;  %vm2848_vm9 = vcmp.eq.f32.partialorder %v2847_v25, 8.507059e+37  ;;  %v2656_v54 = vpop.f32.mrf.mxu0 }
 0xabe   : > { %v2841_v63 = vmul.f32 %v4524_v5, %v2840_v41  ;;  %v3035_v7 = vmul.f32 %v2836_v20, %v5796_v18  ;;  %v2855_v8 = vsub.f32 1.0, %v2854_v2  ;;  %4533 = vpow2.f32 %v4136_v14 }
 0xabf   : > { %4535 = vrcp.f32 %v5899_v48  ;;  %vm2859_vm10 = vweird.f32 %v5882_v23  ;;  %v2864_v10 = vand.u32 2147483648, %v5842_v24  ;;  %v2894_v14 = vand.u32 2147483648, %v5899_v48 }
 0xac0   : > { %v2842_v56 = vadd.f32 %v4524_v5, %v2841_v63  ;;  %v3051_v61 = vmul.f32 %v3035_v7, %v2625_v28  ;;  %v2856_v26 = vmul.f32 %v5882_v23, %v2855_v8  ;;  %vm2860_vm12 = vmor %vm2858_vm11, %vm2859_vm10  ;;  %v2892_v2 = vand.u32 2147483647, %v5899_v48 }
 0xac1   : > { %v2865_v19 = vor.u32 1.1754944e-38, %v2864_v10  ;;  %v2879_v63 = vand.u32 2147483648, %v5880_v46  ;;  %vm2888_vm0 = vweird.f32 %v5899_v48  ;;  %vm2873_vm1 = vweird.f32 %v5880_v46 }
 0xac2   : > { %v2846_v6 = vsel %vm2845_vm8, %v4524_v5, %v2842_v56  ;;  %v3065_v1 = vpack.c.bf16 %v3051_v61, %v3049_v40  ;;  %v3050_v5 = vmul.f32 %v3034_v51, %v2652_v12  ;;  %v2857_v42 = vadd.f32 %v5882_v23, %v2856_v26 }
 0xac3   : > { %v5904_v18 = vpop.eup %4531  ;;  %v2851_v49 = vsel %vm2848_vm9, %v2850_v53, %v2846_v6  ;;  %v2895_v29 = vor.u32 1.1754944e-38, %v2894_v14  ;;  %v2629_v7 = vpop.f32.mrf.mxu3  ;;  %vm2893_vm5 = vcmp.eq.f32.partialorder %v2892_v2, 8.507059e+37  ;;  %v2628_v31 = vadd.f32 %v2627_v3, %v5820_v9 }
 0xac4   : > { %v3036_v37 = vmul.f32 %v2851_v49, %v5803_v57  ;;  %v2869_v16 = vmul.f32 %v5904_v18, %v5880_v46  ;;  %3209 = vmatmul.bf16.vlgmr.msra.gmra.mxu3 %v3065_v1  ;;  %v4534_v62 = vpop.eup %4533  ;;  %v2862_v57 = vand.u32 2147483647, %v5842_v24  ;;  %v2861_v58 = vsel %vm2860_vm12, %v5882_v23, %v2857_v42 }
 0xac5   : > { %v2784_v13 = vadd.f32 1.0, %v4534_v62  ;;  %v4536_v35 = vpop.eup %4535  ;;  %vm2874_vm15 = vweird.f32 %v5904_v18  ;;  %v2877_v23 = vand.u32 2147483647, %v5880_v46  ;;  %v2880_v53 = vor.u32 1.1754944e-38, %v2879_v63 }
 0xac6   : > { %v3052_v15 = vmul.f32 %v3036_v37, %v2654_v43  ;;  %v2870_v39 = vsub.f32 1.0, %v2869_v16  ;;  %v2884_v22 = vmul.f32 %v4536_v35, %v5899_v48  ;;  %vm2863_vm13 = vcmp.eq.f32.partialorder %v2862_v57, 8.507059e+37  ;;  %vm5929_vm4 = vmor %vm2873_vm1, %vm2874_vm15  ;;  %v2658_v16 = vpop.f32.mrf.mxu0 }
 0xac7   : > { %4537 = vrcp.f32 %v2784_v13  ;;  %vm2889_vm14 = vweird.f32 %v4536_v35  ;;  %v2866_v24 = vsel %vm2863_vm13, %v2865_v19, %v2861_v58  ;;  %v2630_v6 = vadd.f32 %v2629_v7, %v5820_v9 }
 0xac8   : > { %v3066_v52 = vpack.c.bf16 %v3052_v15, %v3050_v5  ;;  %v2871_v33 = vmul.f32 %v5904_v18, %v2870_v39  ;;  %v2885_v41 = vsub.f32 1.0, %v2884_v22  ;;  %vm2890_vm3 = vmor %vm2888_vm0, %vm2889_vm14  ;;  %v3037_v8 = vmul.f32 %v2866_v24, %v5808_v34 }
 0xac9   : > { %v2909_v34 = vand.u32 2147483648, %v2784_v13  ;;  %vm2878_vm6 = vcmp.eq.f32.partialorder %v2877_v23, 8.507059e+37  ;;  %v2907_v49 = vand.u32 2147483647, %v2784_v13  ;;  %vm2903_vm8 = vweird.f32 %v2784_v13 }
 0xaca   : > { %3238 = vmatmul.bf16.vlgmr.msra.gmra.mxu0 %v3066_v52  ;;  %v2886_v17 = vmul.f32 %v4536_v35, %v2885_v41  ;;  %v2872_v55 = vadd.f32 %v5904_v18, %v2871_v33  ;;  %v3053_v26 = vmul.f32 %v3037_v8, %v2628_v31  ;;  %v2657_v3 = vadd.f32 %v2656_v54, %v5834_v38 }
 0xacb   : > { %vm2908_vm10 = vcmp.eq.f32.partialorder %v2907_v49, 8.507059e+37  ;;  %v2659_v39 = vadd.f32 %v2658_v16, %v5834_v38 }
 0xacc   : > { %v2887_v25 = vadd.f32 %v4536_v35, %v2886_v17  ;;  %v2876_v48 = vsel %vm5929_vm4, %v5904_v18, %v2872_v55  ;;  %v2910_v18 = vor.u32 1.1754944e-38, %v2909_v34 }
 0xacd   : > { %v4538_v20 = vpop.eup %4537  ;;  %v2881_v12 = vsel %vm2878_vm6, %v2880_v53, %v2876_v48 }
 0xace   : > { %v2899_v28 = vmul.f32 %v4538_v20, %v2784_v13  ;;  %v2891_v40 = vsel %vm2890_vm3, %v4536_v35, %v2887_v25  ;;  %vm2904_vm7 = vweird.f32 %v4538_v20  ;;  %v3038_v5 = vmul.f32 %v2881_v12, %v5823_v21 }
 0xacf   : > { %v2896_v61 = vsel %vm2893_vm5, %v2895_v29, %v2891_v40  ;;  %vm2905_vm9 = vmor %vm2903_vm8, %vm2904_vm7 }
 0xad0   : > { %v2900_v46 = vsub.f32 1.0, %v2899_v28  ;;  %v3039_v51 = vmul.f32 %v2896_v61, %v5826_v27  ;;  %v3054_v35 = vmul.f32 %v3038_v5, %v2657_v3 }
 0xad2   : > { %v2901_v1 = vmul.f32 %v4538_v20, %v2900_v46  ;;  %v3055_v43 = vmul.f32 %v3039_v51, %v2630_v6 }
 0xad4   : > { %v2902_v37 = vadd.f32 %v4538_v20, %v2901_v1  ;;  %v3067_v62 = vpack.c.bf16 %v3055_v43, %v3053_v26 }
 0xad6   : > { %v2906_v15 = vsel %vm2905_vm9, %v4538_v20, %v2902_v37  ;;  %3214 = vmatmul.bf16.gmra.mxu3 %v3067_v62 }
 0xad7   : > { %v2911_v27 = vsel %vm2908_vm10, %v2910_v18, %v2906_v15 }
 0xad8   : > { %v3040_v42 = vmul.f32 %v2911_v27, %v5870_v30 }
 0xada   : > { %v3056_v52 = vmul.f32 %v3040_v42, %v2659_v39 }
 0xadc   : > { %v3068_v10 = vpack.c.bf16 %v3056_v52, %v3054_v35 }
 0xade   : > { %3243 = vmatmul.bf16.gmra.mxu0 %v3068_v10 }
 0xb01   : > { %v2690_v13 = vpop.f32.mrf.mxu1 }
 0xb02   : > { %v5944_v57 = vadd.f32 %v2690_v13, %v5777_v11  ;;  %v2661_v13 = vpop.f32.mrf.mxu0 }
 0xb04   : > { %v4137_v21 = vmul.f32 -1.442695, %v5944_v57 }
 0xb06   : > { %4539 = vpow2.f32 %v4137_v21  ;;  %v2632_v53 = vpop.f32.mrf.mxu3 }
 0xb07   : > { %v2719_v22 = vpop.f32.mrf.mxu2  ;;  %v5983_v16 = vadd.f32 %v2632_v53, %v5820_v9 }
 0xb08   : > { %v5948_v33 = vadd.f32 %v2719_v22, %v5786_v60 }
 0xb09   : > { %v2692_v58 = vpop.f32.mrf.mxu1 }
 0xb0a   : > { %v4138_v41 = vmul.f32 -1.442695, %v5948_v33  ;;  %v5952_v30 = vadd.f32 %v2692_v58, %v5777_v11 }
 0xb0c   : > { %v4540_v19 = vpop.eup %4539  ;;  %4541 = vpow2.f32 %v4138_v41  ;;  %v4139_v14 = vmul.f32 -1.442695, %v5952_v30 }
 0xb0d   : > { %v2785_v54 = vadd.f32 1.0, %v4540_v19 }
 0xb0e   : > { %4543 = vpow2.f32 %v4139_v14 }
 0xb0f   : > { %4545 = vrcp.f32 %v2785_v54  ;;  %v2721_v17 = vpop.f32.mrf.mxu2  ;;  %v2922_v34 = vand.u32 2147483647, %v2785_v54  ;;  %v2924_v12 = vand.u32 2147483648, %v2785_v54  ;;  %vm2918_vm12 = vweird.f32 %v2785_v54 }
 0xb10   : > { %v5956_v2 = vadd.f32 %v2721_v17, %v5786_v60 }
 0xb11   : > { %v2695_v24 = vpop.f32.mrf.mxu1  ;;  %vm5989_vm13 = vcmp.eq.f32.partialorder %v2922_v34, 8.507059e+37  ;;  %v2925_v42 = vor.u32 1.1754944e-38, %v2924_v12 }
 0xb12   : > { %v4542_v55 = vpop.eup %4541  ;;  %v4140_v20 = vmul.f32 -1.442695, %v5956_v2  ;;  %v5960_v63 = vadd.f32 %v2695_v24, %v5777_v11 }
 0xb13   : > { %v5962_v25 = vadd.f32 1.0, %v4542_v55 }
 0xb14   : > { %v4544_v23 = vpop.eup %4543  ;;  %4547 = vpow2.f32 %v4140_v20  ;;  %v4141_v29 = vmul.f32 -1.442695, %v5960_v63 }
 0xb15   : > { %v4546_v7 = vpop.eup %4545  ;;  %4549 = vrcp.f32 %v5962_v25  ;;  %v5966_v8 = vadd.f32 1.0, %v4544_v23  ;;  %v2937_v27 = vand.u32 2147483647, %v5962_v25  ;;  %v2939_v52 = vand.u32 2147483648, %v5962_v25 }
 0xb16   : > { %v2914_v28 = vmul.f32 %v4546_v7, %v2785_v54  ;;  %4551 = vpow2.f32 %v4141_v29  ;;  %vm2919_vm11 = vweird.f32 %v4546_v7  ;;  %vm2933_vm15 = vweird.f32 %v5962_v25 }
 0xb17   : > { %v2724_v56 = vpop.f32.mrf.mxu2  ;;  %4553 = vrcp.f32 %v5966_v8  ;;  %vm5995_vm14 = vmor %vm2918_vm12, %vm2919_vm11  ;;  %v2952_v58 = vand.u32 2147483647, %v5966_v8  ;;  %v2954_v41 = vand.u32 2147483648, %v5966_v8  ;;  %vm6009_vm1 = vcmp.eq.f32.partialorder %v2937_v27, 8.507059e+37 }
 0xb18   : > { %v2915_v40 = vsub.f32 1.0, %v2914_v28  ;;  %v5970_v31 = vadd.f32 %v2724_v56, %v5786_v60  ;;  %v2940_v23 = vor.u32 1.1754944e-38, %v2939_v52  ;;  %vm2948_vm4 = vweird.f32 %v5966_v8 }
 0xb19   : > { %v2697_v48 = vpop.f32.mrf.mxu1  ;;  %vm2953_vm6 = vcmp.eq.f32.partialorder %v2952_v58, 8.507059e+37  ;;  %v2955_v28 = vor.u32 1.1754944e-38, %v2954_v41 }
 0xb1a   : > { %v4548_v61 = vpop.eup %4547  ;;  %v2916_v46 = vmul.f32 %v4546_v7, %v2915_v40  ;;  %v5973_v51 = vadd.f32 %v2697_v48, %v5777_v11  ;;  %v4142_v49 = vmul.f32 -1.442695, %v5970_v31  ;;  %v2634_v48 = vpop.f32.mrf.mxu3 }
 0xb1b   : > { %v5975_v6 = vpop.eup %4549  ;;  %v5977_v1 = vadd.f32 1.0, %v4548_v61 }
 0xb1c   : > { %v4552_v26 = vpop.eup %4551  ;;  %v2929_v43 = vmul.f32 %v5975_v6, %v5962_v25  ;;  %v2917_v37 = vadd.f32 %v4546_v7, %v2916_v46  ;;  %v4143_v5 = vmul.f32 -1.442695, %v5973_v51  ;;  %vm2934_vm0 = vweird.f32 %v5975_v6 }
 0xb1d   : > { %4555 = vrcp.f32 %v5977_v1  ;;  %v4554_v11 = vpop.eup %4553  ;;  %v5986_v62 = vadd.f32 1.0, %v4552_v26  ;;  %vm6020_vm5 = vmor %vm2933_vm15, %vm2934_vm0  ;;  %v2969_v61 = vand.u32 2147483648, %v5977_v1  ;;  %vm2963_vm9 = vweird.f32 %v5977_v1 }
 0xb1e   : > { %v2930_v18 = vsub.f32 1.0, %v2929_v43  ;;  %4557 = vpow2.f32 %v4142_v49  ;;  %v2944_v3 = vmul.f32 %v4554_v11, %v5966_v8  ;;  %v2921_v21 = vsel %vm5995_vm14, %v4546_v7, %v2917_v37 }
 0xb1f   : > { %4559 = vrcp.f32 %v5986_v62  ;;  %v2726_v10 = vpop.f32.mrf.mxu2  ;;  %vm2949_vm3 = vweird.f32 %v4554_v11  ;;  %v2926_v20 = vsel %vm5989_vm13, %v2925_v42, %v2921_v21  ;;  %v2970_v42 = vor.u32 1.1754944e-38, %v2969_v61 }
 0xb20   : > { %v2931_v35 = vmul.f32 %v5975_v6, %v2930_v18  ;;  %v2945_v22 = vsub.f32 1.0, %v2944_v3  ;;  %4561 = vpow2.f32 %v4143_v5  ;;  %v6014_v24 = vadd.f32 %v2726_v10, %v5786_v60  ;;  %vm2950_vm7 = vmor %vm2948_vm4, %vm2949_vm3  ;;  %v2663_v3 = vpop.f32.mrf.mxu0 }
 0xb21   : > { %v3041_v53 = vmul.f32 %v2926_v20, %v5944_v57  ;;  %v2635_v5 = vadd.f32 %v2634_v48, %v5820_v9  ;;  %vm2978_vm13 = vweird.f32 %v5986_v62 }
 0xb22   : > { %v2932_v19 = vadd.f32 %v5975_v6, %v2931_v35  ;;  %v2946_v17 = vmul.f32 %v4554_v11, %v2945_v22  ;;  %v4144_v46 = vmul.f32 -1.442695, %v6014_v24  ;;  %v2662_v22 = vadd.f32 %v2661_v13, %v5834_v38  ;;  %v2637_v54 = vpop.f32.mrf.mxu3 }
 0xb23   : > { %v4556_v14 = vpop.eup %4555  ;;  %v3057_v27 = vmul.f32 %v3041_v53, %v5983_v16  ;;  %v2664_v16 = vadd.f32 %v2663_v3, %v5834_v38  ;;  %v2984_v13 = vand.u32 2147483648, %v5986_v62 }
 0xb24   : > { %v4558_v55 = vpop.eup %4557  ;;  %v2959_v25 = vmul.f32 %v4556_v14, %v5977_v1  ;;  %v2947_v7 = vadd.f32 %v4554_v11, %v2946_v17  ;;  %v2936_v40 = vsel %vm6020_vm5, %v5975_v6, %v2932_v19  ;;  %vm2964_vm8 = vweird.f32 %v4556_v14 }
 0xb25   : > { %v6024_v56 = vadd.f32 1.0, %v4558_v55  ;;  %v6026_v60 = vpop.eup %4559  ;;  %v2967_v6 = vand.u32 2147483647, %v5977_v1  ;;  %v2941_v37 = vsel %vm6009_vm1, %v2940_v23, %v2936_v40  ;;  %vm2965_vm10 = vmor %vm2963_vm9, %vm2964_vm8 }
 0xb26   : > { %v2960_v8 = vsub.f32 1.0, %v2959_v25  ;;  %v2951_v34 = vsel %vm2950_vm7, %v4554_v11, %v2947_v7  ;;  %v2974_v49 = vmul.f32 %v6026_v60, %v5986_v62  ;;  %v4562_v26 = vpop.eup %4561  ;;  %v3042_v35 = vmul.f32 %v2941_v37, %v5948_v33 }
 0xb27   : > { %4563 = vrcp.f32 %v6024_v56  ;;  %v2956_v12 = vsel %vm2953_vm6, %v2955_v28, %v2951_v34  ;;  %v6043_v15 = vadd.f32 1.0, %v4562_v26  ;;  %vm2968_vm11 = vcmp.eq.f32.partialorder %v2967_v6, 8.507059e+37 }
 0xb28   : > { %v2961_v43 = vmul.f32 %v4556_v14, %v2960_v8  ;;  %v3043_v18 = vmul.f32 %v2956_v12, %v5952_v30  ;;  %v2975_v57 = vsub.f32 1.0, %v2974_v49  ;;  %4565 = vpow2.f32 %v4144_v46  ;;  %v2666_v28 = vpop.f32.mrf.mxu0 }
 0xb29   : > { %4567 = vrcp.f32 %v6043_v15  ;;  %v3058_v19 = vmul.f32 %v3042_v35, %v2662_v22  ;;  %vm2979_vm12 = vweird.f32 %v6026_v60  ;;  %v2985_v8 = vor.u32 1.1754944e-38, %v2984_v13 }
 0xb2a   : > { %v2962_v11 = vadd.f32 %v4556_v14, %v2961_v43  ;;  %v3059_v39 = vmul.f32 %v3043_v18, %v2635_v5  ;;  %v2976_v1 = vmul.f32 %v6026_v60, %v2975_v57  ;;  %vm2980_vm14 = vmor %vm2978_vm13, %vm2979_vm12  ;;  %v3014_v61 = vand.u32 2147483648, %v6043_v15  ;;  %v2639_v6 = vpop.f32.mrf.mxu3 }
 0xb2b   : > { %v3012_v53 = vand.u32 2147483647, %v6043_v15  ;;  %v2999_v26 = vand.u32 2147483648, %v6024_v56  ;;  %vm3008_vm3 = vweird.f32 %v6043_v15  ;;  %vm2993_vm4 = vweird.f32 %v6024_v56 }
 0xb2c   : > { %v2966_v52 = vsel %vm2965_vm10, %v4556_v14, %v2962_v11  ;;  %v3069_v21 = vpack.c.bf16 %v3059_v39, %v3057_v27  ;;  %v2977_v55 = vadd.f32 %v6026_v60, %v2976_v1  ;;  %v3015_v43 = vor.u32 1.1754944e-38, %v3014_v61 }
 0xb2d   : > { %v6048_v30 = vpop.eup %4563  ;;  %v2971_v10 = vsel %vm2968_vm11, %v2970_v42, %v2966_v52  ;;  %vm3013_vm7 = vcmp.eq.f32.partialorder %v3012_v53, 8.507059e+37  ;;  %v2638_v11 = vadd.f32 %v2637_v54, %v5820_v9  ;;  %v3000_v3 = vor.u32 1.1754944e-38, %v2999_v26 }
 0xb2e   : > { %v3044_v58 = vmul.f32 %v2971_v10, %v5956_v2  ;;  %v2989_v41 = vmul.f32 %v6048_v30, %v6024_v56  ;;  %3219 = vmatmul.bf16.gmra.mxu3 %v3069_v21  ;;  %v4566_v33 = vpop.eup %4565  ;;  %v2982_v2 = vand.u32 2147483647, %v5986_v62  ;;  %v2981_v40 = vsel %vm2980_vm14, %v6026_v60, %v2977_v55 }
 0xb2f   : > { %v2792_v20 = vadd.f32 1.0, %v4566_v33  ;;  %v4568_v23 = vpop.eup %4567  ;;  %vm2994_vm1 = vweird.f32 %v6048_v30  ;;  %v2997_v60 = vand.u32 2147483647, %v6024_v56  ;;  %v2640_v42 = vadd.f32 %v2639_v6, %v5820_v9 }
 0xb30   : > { %v3060_v14 = vmul.f32 %v3044_v58, %v2664_v16  ;;  %v2990_v17 = vsub.f32 1.0, %v2989_v41  ;;  %v3004_v29 = vmul.f32 %v4568_v23, %v6043_v15  ;;  %vm2983_vm15 = vcmp.eq.f32.partialorder %v2982_v2, 8.507059e+37  ;;  %vm6073_vm6 = vmor %vm2993_vm4, %vm2994_vm1  ;;  %v2668_v21 = vpop.f32.mrf.mxu0 }
 0xb31   : > { %4569 = vrcp.f32 %v2792_v20  ;;  %vm3009_vm0 = vweird.f32 %v4568_v23  ;;  %v2986_v62 = vsel %vm2983_vm15, %v2985_v8, %v2981_v40  ;;  %vm2998_vm8 = vcmp.eq.f32.partialorder %v2997_v60, 8.507059e+37 }
 0xb32   : > { %v3070_v25 = vpack.c.bf16 %v3060_v14, %v3058_v19  ;;  %v2991_v7 = vmul.f32 %v6048_v30, %v2990_v17  ;;  %v3005_v48 = vsub.f32 1.0, %v3004_v29  ;;  %vm3010_vm5 = vmor %vm3008_vm3, %vm3009_vm0  ;;  %v3045_v18 = vmul.f32 %v2986_v62, %v5960_v63 }
 0xb33   : > { %v3029_v63 = vand.u32 2147483648, %v2792_v20  ;;  %v3027_v52 = vand.u32 2147483647, %v2792_v20  ;;  %vm3023_vm10 = vweird.f32 %v2792_v20  ;;  %v2667_v33 = vadd.f32 %v2666_v28, %v5834_v38 }
 0xb34   : > { %3248 = vmatmul.bf16.gmra.mxu0 %v3070_v25  ;;  %v3006_v46 = vmul.f32 %v4568_v23, %v3005_v48  ;;  %v2992_v34 = vadd.f32 %v6048_v30, %v2991_v7  ;;  %v3061_v10 = vmul.f32 %v3045_v18, %v2638_v11  ;;  %v2669_v19 = vadd.f32 %v2668_v21, %v5834_v38 }
 0xb35   : > { %vm3028_vm12 = vcmp.eq.f32.partialorder %v3027_v52, 8.507059e+37 }
 0xb36   : > { %v3007_v12 = vadd.f32 %v4568_v23, %v3006_v46  ;;  %v2996_v15 = vsel %vm6073_vm6, %v6048_v30, %v2992_v34  ;;  %v3030_v30 = vor.u32 1.1754944e-38, %v3029_v63 }
 0xb37   : > { %v4570_v49 = vpop.eup %4569  ;;  %v3001_v1 = vsel %vm2998_vm8, %v3000_v3, %v2996_v15 }
 0xb38   : > { %v3019_v37 = vmul.f32 %v4570_v49, %v2792_v20  ;;  %v3011_v57 = vsel %vm3010_vm5, %v4568_v23, %v3007_v12  ;;  %vm3024_vm9 = vweird.f32 %v4570_v49  ;;  %v3046_v41 = vmul.f32 %v3001_v1, %v5970_v31  ;;  %v4408_v31 = vld [vmem:[%s823_s29] ss:$0 sm:$0xff] }
 0xb39   : > { %v3016_v27 = vsel %vm3013_vm7, %v3015_v43, %v3011_v57  ;;  %vm3025_vm11 = vmor %vm3023_vm10, %vm3024_vm9 }
 0xb3a   : > { %v3020_v56 = vsub.f32 1.0, %v3019_v37  ;;  %v3047_v39 = vmul.f32 %v3016_v27, %v5973_v51  ;;  %v3062_v54 = vmul.f32 %v3046_v41, %v2667_v33 }
 0xb3c   : > { %v3021_v35 = vmul.f32 %v4570_v49, %v3020_v56  ;;  %v3063_v22 = vmul.f32 %v3047_v39, %v2640_v42 }
 0xb3e   : > { %v3022_v16 = vadd.f32 %v4570_v49, %v3021_v35  ;;  %v3071_v58 = vpack.c.bf16 %v3063_v22, %v3061_v10 }
 0xb40   : > { %v3026_v51 = vsel %vm3025_vm11, %v4570_v49, %v3022_v16  ;;  %3224 = vmatmul.bf16.gmra.mxu3 %v3071_v58 }
 0xb41   : > { %v3031_v9 = vsel %vm3028_vm12, %v3030_v30, %v3026_v51 }
 0xb42   : > { %v3048_v14 = vmul.f32 %v3031_v9, %v6014_v24 }
 0xb44   : > { %v3064_v17 = vmul.f32 %v3048_v14, %v2669_v19 }
 0xb46   : > { %v3072_v20 = vpack.c.bf16 %v3064_v17, %v3062_v54 }
 0xb47   : > { %v3239_v55 = vpop.f32.mrf.mxu0  ;;  %v3210_v23 = vpop.f32.mrf.mxu3 }
 0xb48   : > { %v3240_v13 = vadd.f32 %v3239_v55, %v3210_v23  ;;  %3253 = vmatmul.bf16.gmra.mxu0 %v3072_v20 }
 0xb4a   : > { %v3259_v25 = vadd.f32 %v3240_v13, %v5573_v50 }
 0xb4c   : > { %v6093_v2 = vadd.f32 %v4408_v31, %v3259_v25 }
 0xb4e   : > { %3279 = vst.msk [vmem:[#allocation2] sm:$0xff] %vm937_vm2, %v6093_v2 }
 0xb4f   : > { %v3241_v38 = vpop.f32.mrf.mxu0  ;;  %v3212_v24 = vpop.f32.mrf.mxu3 }
 0xb50   : > { %v3242_v29 = vadd.f32 %v3241_v38, %v3212_v24 }
 0xb52   : > { %v3260_v7 = vadd.f32 %v3242_v29, %v5558_v44 }
 0xb54   : > { %v6098_v28 = vadd.f32 %v4408_v31, %v3260_v7 }
 0xb56   : > { %3280 = vst.msk [vmem:[#allocation2 + $0x8] sm:$0xff] %vm937_vm2, %v6098_v28 }
 0xb59   : > { %v3215_v40 = vpop.f32.mrf.mxu3 }
 0xb5b   : > { %v3244_v48 = vpop.f32.mrf.mxu0 }
 0xb5c   : > { %v3245_v8 = vadd.f32 %v3244_v48, %v3215_v40 }
 0xb5e   : > { %v3261_v50 = vadd.f32 %v3245_v8, %v5578_v0 }
 0xb60   : > { %v6103_v61 = vadd.f32 %v4408_v31, %v3261_v50 }
 0xb61   : > { %v3217_v46 = vpop.f32.mrf.mxu3 }
 0xb62   : > { %3281 = vst.msk [vmem:[#allocation2 + $0x10] sm:$0xff] %vm937_vm2, %v6103_v61 }
 0xb63   : > { %v3246_v53 = vpop.f32.mrf.mxu0 }
 0xb64   : > { %v3247_v62 = vadd.f32 %v3246_v53, %v3217_v46 }
 0xb66   : > { %v3262_v44 = vadd.f32 %v3247_v62, %v5566_v4 }
 0xb68   : > { %v3274_v34 = vadd.f32 %v4408_v31, %v3262_v44 }
 0xb6a   : > { %3282 = vst.msk [vmem:[#allocation2 + $0x18] sm:$0xff] %vm937_vm2, %v3274_v34 }
 0xbb1   : > { %v3249_v49 = vpop.f32.mrf.mxu0  ;;  %v3220_v26 = vpop.f32.mrf.mxu3 }
 0xbb2   : > { %v3250_v12 = vadd.f32 %v3249_v49, %v3220_v26 }
 0xbb4   : > { %v3263_v60 = vadd.f32 %v3250_v12, %v5599_v59 }
 0xbb6   : > { %v3275_v43 = vadd.f32 %v4408_v31, %v3263_v60 }
 0xbb8   : > { %3283 = vst.msk [vmem:[#allocation2 + $0x20] sm:$0xff] %vm937_vm2, %v3275_v43 }
 0xbb9   : > { %v3251_v0 = vpop.f32.mrf.mxu0  ;;  %v3222_v6 = vpop.f32.mrf.mxu3 }
 0xbba   : > { %v3252_v37 = vadd.f32 %v3251_v0, %v3222_v6 }
 0xbbc   : > { %v3264_v18 = vadd.f32 %v3252_v37, %v5605_v47 }
 0xbbe   : > { %v6112_v5 = vadd.f32 %v4408_v31, %v3264_v18 }
 0xbc0   : > { %3284 = vst.msk [vmem:[#allocation2 + $0x28] sm:$0xff] %vm937_vm2, %v6112_v5 }
 0xbc3   : > { %v3225_v4 = vpop.f32.mrf.mxu3 }
 0xbc5   : > { %v3254_v57 = vpop.f32.mrf.mxu0 }
 0xbc6   : > { %v3255_v11 = vadd.f32 %v3254_v57, %v3225_v4 }
 0xbc8   : > { %v3265_v15 = vadd.f32 %v3255_v11, %v5617_v36 }
 0xbca   : > { %v3277_v27 = vadd.f32 %v4408_v31, %v3265_v15 }
 0xbcb   : > { %v3227_v59 = vpop.f32.mrf.mxu3 }
 0xbcc   : > { %3285 = vst.msk [vmem:[#allocation2 + $0x30] sm:$0xff] %vm937_vm2, %v3277_v27 }
 0xbcd   : > { %v3256_v56 = vpop.f32.mrf.mxu0 }
 0xbce   : > { %v3257_v3 = vadd.f32 %v3256_v56, %v3227_v59 }
 0xbd0   : > { %v3266_v39 = vadd.f32 %v3257_v3, %v5634_v32  ;;  %3290 = sbr.rel (%p4209_p6) target bundleno = 3576 (0xdf8), region = 108 }
 0xbd2   : > { %v6119_v42 = vadd.f32 %v4408_v31, %v3266_v39 }
 0xbd4   : > { %3286 = vst.msk [vmem:[#allocation2 + $0x38] sm:$0xff] %vm937_vm2, %v6119_v42 }
 0xbd5   : > { %v3305_v47 = vsel %vm937_vm2, %v3275_v43, 0.0  ;;  %v3299_v36 = vsel %vm937_vm2, %v6103_v61, 0.0  ;;  %v3293_v63 = vsel %vm937_vm2, %v6093_v2, 0.0  ;;  %v3308_v32 = vsel %vm937_vm2, %v6112_v5, 0.0  ;;  %v4260_v49 = vld [vmem:[%s6525_s16 + $0x60] sm:$0xf] }
 0xbd6   : > { %3306 = vadd.xlane.f32.xlu2 %v3305_v47  ;;  %3300 = vadd.xlane.f32.xlu1 %v3299_v36  ;;  %v3302_v35 = vsel %vm937_vm2, %v3274_v34, 0.0  ;;  %v3296_v52 = vsel %vm937_vm2, %v6098_v28, 0.0  ;;  %v3311_v10 = vsel %vm937_vm2, %v3277_v27, 0.0  ;;  %v3314_v25 = vsel %vm937_vm2, %v6119_v42, 0.0  ;;  %v4358_v26 = vld [vmem:[%s6525_s16 + $0x6c] sm:$0xf0] }
 0xbd7   : > { %3294 = vadd.xlane.f32.xlu0 %v3293_v63  ;;  %v4356_v12 = vld [vmem:[%s6525_s16 + $0x64] sm:$0xf]  ;;  %v4261_v60 = vor.u32 %v4358_v26, %v4260_v49  ;;  %v4268_v0 = vld [vmem:[%s6525_s16 + $0x68] sm:$0xf]  ;;  %v4359_v37 = vld [vmem:[%s6525_s16 + $0x74] sm:$0xf0] }
 0xbd8   : > { %v4357_v18 = vld [vmem:[%s6525_s16 + $0x6c] sm:$0xf]  ;;  %v4269_v4 = vor.u32 %v4359_v37, %v4268_v0  ;;  %v4244_v11 = vld [vmem:[%s6525_s16 + $0x40] sm:$0xf]  ;;  %v4354_v15 = vld [vmem:[%s6525_s16 + $0x4c] sm:$0xf0] }
 0xbd9   : > { %3617 = vmatpush.bf16.msra.mxu0 %v4261_v60  ;;  %v4245_v59 = vor.u32 %v4354_v15, %v4244_v11  ;;  %v4246_v56 = vld [vmem:[%s6525_s16 + $0x50] sm:$0xf0]  ;;  %v4252_v3 = vld [vmem:[%s6525_s16 + $0x48] sm:$0xf]  ;;  %v4355_v39 = vld [vmem:[%s6525_s16 + $0x54] sm:$0xf0] }
 0xbda   : > { %3675 = vmatpush.bf16.msra.mxu2 %v4269_v4  ;;  %v4253_v36 = vor.u32 %v4355_v39, %v4252_v3  ;;  %v4353_v63 = vld [vmem:[%s6525_s16 + $0x4c] sm:$0xf] }
 0xbdd   : > { %3618 = vmatpush.bf16.msra.mxu0 %v4245_v59 }
 0xbde   : > { %3309 = vadd.xlane.f32.xlu2 %v3308_v32  ;;  %3303 = vadd.xlane.f32.xlu1 %v3302_v35  ;;  %v4254_v32 = vld [vmem:[%s6525_s16 + $0x58] sm:$0xf0] }
 0xbdf   : > { %3297 = vadd.xlane.f32.xlu0 %v3296_v52  ;;  %v4257_v35 = vor.u32 %v4353_v63, %v4254_v32  ;;  %v4228_v52 = vld [vmem:[%s6525_s16 + $0x20] sm:$0xf]  ;;  %3676 = vmatpush.bf16.msra.mxu2 %v4253_v36 }
 0xbe6   : > { %3312 = vadd.xlane.f32.xlu2 %v3311_v10  ;;  %v4350_v10 = vld [vmem:[%s6525_s16 + $0x2c] sm:$0xf0] }
 0xc49   : > { %v3307_v1 = vpop.xlane.xlu2 %3306  ;;  %v3301_v21 = vpop.xlane.xlu1 %3300 }
 0xc4a   : > { %v3295_v22 = vpop.xlane.xlu0 %3294  ;;  %v3321_v14 = vmul.f32 %v3307_v1, %v4861_v45  ;;  %v3319_v54 = vmul.f32 %v3301_v21, %v4861_v45  ;;  %v4348_v1 = vld [vmem:[%s6525_s16 + $0x24] sm:$0xf]  ;;  %v4229_v21 = vor.u32 %v4350_v10, %v4228_v52 }
 0xc4b   : > { %v3317_v16 = vmul.f32 %v3295_v22, %v4861_v45  ;;  %v4230_v22 = vld [vmem:[%s6525_s16 + $0x30] sm:$0xf0] }
 0xc4c   : > { %v6153_v13 = vsub.f32 %v3275_v43, %v3321_v14  ;;  %v6156_v31 = vsub.f32 %v6103_v61, %v3319_v54  ;;  %v4262_v43 = vld [vmem:[%s6525_s16 + $0x70] sm:$0xf0]  ;;  %3619 = vmatpush.bf16.msra.mxu0 %v4229_v21 }
 0xc4d   : > { %v6137_v30 = vsub.f32 %v6093_v2, %v3317_v16  ;;  %v4265_v6 = vor.u32 %v4356_v12, %v4262_v43  ;;  %v4236_v16 = vld [vmem:[%s6525_s16 + $0x28] sm:$0xf] }
 0xc4e   : > { %v3337_v40 = vmul.f32 %v6153_v13, %v6153_v13  ;;  %v3335_v48 = vmul.f32 %v6156_v31, %v6156_v31 }
 0xc4f   : > { %v3333_v58 = vmul.f32 %v6137_v30, %v6137_v30  ;;  %3646 = vmatpush.bf16.msra.mxu1 %v4265_v6 }
 0xc50   : > { %v3353_v46 = vsel %vm937_vm2, %v3337_v40, 0.0  ;;  %v3347_v53 = vsel %vm937_vm2, %v3335_v48, 0.0  ;;  %v4345_v40 = vld [vmem:[%s6525_s16 + $0xc] sm:$0xf]  ;;  %v4222_v48 = vld [vmem:[%s6525_s16 + $0x18] sm:$0xf0] }
 0xc51   : > { %v3310_v41 = vpop.xlane.xlu2 %3309  ;;  %v3304_v51 = vpop.xlane.xlu1 %3303  ;;  %v3341_v9 = vsel %vm937_vm2, %v3333_v58, 0.0  ;;  %v4351_v58 = vld [vmem:[%s6525_s16 + $0x34] sm:$0xf0] }
 0xc52   : > { %v3320_v33 = vmul.f32 %v3304_v51, %v4861_v45  ;;  %3342 = vadd.xlane.f32.xlu0 %v3341_v9  ;;  %v3298_v19 = vpop.xlane.xlu0 %3297  ;;  %v4233_v51 = vor.u32 %v4348_v1, %v4230_v22  ;;  %v4237_v9 = vor.u32 %v4351_v58, %v4236_v16 }
 0xc53   : > { %v3318_v17 = vmul.f32 %v3298_v19, %v4861_v45  ;;  %v4238_v19 = vld [vmem:[%s6525_s16 + $0x38] sm:$0xf0] }
 0xc54   : > { %v6146_v55 = vsub.f32 %v3274_v34, %v3320_v33  ;;  %v4349_v33 = vld [vmem:[%s6525_s16 + $0x2c] sm:$0xf]  ;;  %3677 = vmatpush.bf16.msra.mxu2 %v4237_v9  ;;  %v6306_v9 = vld [vmem:[%s6581_s25] ss:$0 sm:$0xff] }
 0xc55   : > { %v6149_v20 = vsub.f32 %v6098_v28, %v3318_v17  ;;  %v3322_v28 = vmul.f32 %v3310_v41, %v4861_v45  ;;  %v4241_v54 = vor.u32 %v4349_v33, %v4238_v19  ;;  %v4212_v17 = vld [vmem:[%s6525_s16] sm:$0xf] }
 0xc56   : > { %v3336_v23 = vmul.f32 %v6146_v55, %v6146_v55 }
 0xc57   : > { %v3334_v2 = vmul.f32 %v6149_v20, %v6149_v20  ;;  %v6175_v61 = vsub.f32 %v6112_v5, %v3322_v28  ;;  %v4270_v5 = vld [vmem:[%s6525_s16 + $0x78] sm:$0xf0]  ;;  %v4347_v28 = vld [vmem:[%s6525_s16 + $0x14] sm:$0xf0] }
 0xc58   : > { %v3350_v38 = vsel %vm937_vm2, %v3336_v23, 0.0  ;;  %v4273_v57 = vor.u32 %v4357_v18, %v4270_v5  ;;  %v4346_v23 = vld [vmem:[%s6525_s16 + $0xc] sm:$0xf0] }
 0xc59   : > { %v3313_v24 = vpop.xlane.xlu2 %3312  ;;  %3351 = vadd.xlane.f32.xlu2 %v3350_v38  ;;  %v3344_v29 = vsel %vm937_vm2, %v3334_v2, 0.0  ;;  %v3338_v44 = vmul.f32 %v6175_v61, %v6175_v61  ;;  %v4213_v38 = vor.u32 %v4346_v23, %v4212_v17 }
 0xc5a   : > { %v3323_v7 = vmul.f32 %v3313_v24, %v4861_v45  ;;  %3315 = vadd.xlane.f32.xlu0 %v3314_v25  ;;  %3345 = vadd.xlane.f32.xlu1 %v3344_v29  ;;  %v4344_v25 = vld [vmem:[%s6525_s16 + $0x4] sm:$0xf]  ;;  %v4214_v24 = vld [vmem:[%s6525_s16 + $0x10] sm:$0xf0]  ;;  %v4220_v29 = vld [vmem:[%s6525_s16 + $0x8] sm:$0xf] }
 0xc5b   : > { %v3356_v34 = vsel %vm937_vm2, %v3338_v44, 0.0  ;;  %3704 = vmatpush.bf16.msra.mxu3 %v4273_v57  ;;  %3620 = vmatpush.bf16.msra.mxu0 %v4213_v38 }
 0xc5c   : > { %v6170_v8 = vsub.f32 %v3277_v27, %v3323_v7  ;;  %v4352_v27 = vld [vmem:[%s6525_s16 + $0x44] sm:$0xf]  ;;  %v4217_v7 = vor.u32 %v4344_v25, %v4214_v24 }
 0xc5d   : > { %v4249_v47 = vor.u32 %v4352_v27, %v4246_v56 }
 0xc5e   : > { %v3339_v50 = vmul.f32 %v6170_v8, %v6170_v8 }
 0xc5f   : > { %3647 = vmatpush.bf16.msra.mxu1 %v4249_v47  ;;  %3705 = vmatpush.bf16.msra.mxu3 %v4257_v35 }
 0xc60   : > { %v3359_v62 = vsel %vm937_vm2, %v3339_v50, 0.0  ;;  %v4221_v50 = vor.u32 %v4347_v28, %v4220_v29 }
 0xc61   : > { %3360 = vadd.xlane.f32.xlu2 %v3359_v62 }
 0xc62   : > { %3354 = vadd.xlane.f32.xlu0 %v3353_v46  ;;  %3348 = vadd.xlane.f32.xlu1 %v3347_v53  ;;  %v4225_v46 = vor.u32 %v4345_v40, %v4222_v48 }
 0xc63   : > { %3648 = vmatpush.bf16.msra.mxu1 %v4233_v51  ;;  %3706 = vmatpush.bf16.msra.mxu3 %v4241_v54 }
 0xc64   : > { %3678 = vmatpush.bf16.msra.mxu2 %v4221_v50 }
 0xc67   : > { %3649 = vmatpush.bf16.msra.mxu1 %v4217_v7  ;;  %3707 = vmatpush.bf16.msra.mxu3 %v4225_v46 }
 0xc6a   : > { %3357 = vadd.xlane.f32.xlu1 %v3356_v34 }
 0xcc5   : > { %v3343_v41 = vpop.xlane.xlu0 %3342 }
 0xcc6   : > { %v3365_v14 = vmul.f32 %v3343_v41, %v4861_v45 }
 0xcc8   : > { %v3373_v2 = vadd.f32 1e-05, %v3365_v14 }
 0xcca   : > { %4585 = vrsqrt.f32 %v3373_v2  ;;  %vm3387_vm14 = vweird.f32 %v3373_v2 }
 0xccc   : > { %v3352_v53 = vpop.xlane.xlu2 %3351 }
 0xccd   : > { %v3368_v62 = vmul.f32 %v3352_v53, %v4861_v45  ;;  %v3346_v44 = vpop.xlane.xlu1 %3345  ;;  %v3316_v34 = vpop.xlane.xlu0 %3315 }
 0xcce   : > { %v3366_v49 = vmul.f32 %v3346_v44, %v4861_v45  ;;  %v3324_v26 = vmul.f32 %v3316_v34, %v4861_v45 }
 0xccf   : > { %v6283_v12 = vadd.f32 1e-05, %v3368_v62 }
 0xcd0   : > { %v4586_v60 = vpop.eup %4585  ;;  %v3374_v43 = vadd.f32 1e-05, %v3366_v49  ;;  %v6286_v0 = vsub.f32 %v6119_v42, %v3324_v26 }
 0xcd1   : > { %v3382_v6 = vmul.f32 %v4586_v60, %v3373_v2  ;;  %4587 = vrsqrt.f32 %v6283_v12  ;;  %vm3388_vm13 = vweird.f32 %v4586_v60  ;;  %vm3417_vm6 = vweird.f32 %v6283_v12 }
 0xcd2   : > { %4589 = vrsqrt.f32 %v3374_v43  ;;  %v3340_v37 = vmul.f32 %v6286_v0, %v6286_v0  ;;  %vm3389_vm15 = vmor %vm3387_vm14, %vm3388_vm13  ;;  %vm3397_vm0 = vweird.f32 %v3374_v43 }
 0xcd3   : > { %v3383_v18 = vmul.f32 %v4586_v60, %v3382_v6 }
 0xcd4   : > { %v3362_v5 = vsel %vm937_vm2, %v3340_v37, 0.0 }
 0xcd5   : > { %v3384_v4 = vmul.f32 0.5, %v3383_v18  ;;  %v3349_v57 = vpop.xlane.xlu1 %3348  ;;  %3363 = vadd.xlane.f32.xlu0 %v3362_v5  ;;  %v3355_v15 = vpop.xlane.xlu0 %3354 }
 0xcd6   : > { %v3367_v11 = vmul.f32 %v3349_v57, %v4861_v45  ;;  %v3369_v39 = vmul.f32 %v3355_v15, %v4861_v45 }
 0xcd7   : > { %v6293_v27 = vpop.eup %4587  ;;  %v3385_v42 = vsub.f32 1.5, %v3384_v4 }
 0xcd8   : > { %v4590_v59 = vpop.eup %4589  ;;  %v3375_v56 = vadd.f32 1e-05, %v3367_v11  ;;  %v3412_v36 = vmul.f32 %v6293_v27, %v6283_v12  ;;  %v6298_v35 = vadd.f32 1e-05, %v3369_v39  ;;  %vm3418_vm7 = vweird.f32 %v6293_v27 }
 0xcd9   : > { %v3392_v3 = vmul.f32 %v4590_v59, %v3374_v43  ;;  %v3386_v47 = vmul.f32 %v4586_v60, %v3385_v42  ;;  %vm3398_vm1 = vweird.f32 %v4590_v59  ;;  %vm3419_vm9 = vmor %vm3417_vm6, %vm3418_vm7 }
 0xcda   : > { %4591 = vrsqrt.f32 %v3375_v56  ;;  %v3413_v1 = vmul.f32 %v6293_v27, %v3412_v36  ;;  %vm3399_vm3 = vmor %vm3397_vm0, %vm3398_vm1  ;;  %vm3407_vm4 = vweird.f32 %v3375_v56  ;;  %vm3427_vm12 = vweird.f32 %v6298_v35 }
 0xcdb   : > { %v3393_v63 = vmul.f32 %v4590_v59, %v3392_v3  ;;  %v3390_v10 = vsel %vm3389_vm15, %v4586_v60, %v3386_v47  ;;  %4593 = vrsqrt.f32 %v6298_v35 }
 0xcdc   : > { %v3461_v41 = vmul.f32 %v3390_v10, %v6137_v30  ;;  %v3414_v19 = vmul.f32 0.5, %v3413_v1  ;;  %v6314_v30 = vld [vmem:[%s6582_s21] ss:$0 sm:$0xff] }
 0xcdd   : > { %v3394_v32 = vmul.f32 0.5, %v3393_v63  ;;  %v3358_v52 = vpop.xlane.xlu1 %3357 }
 0xcde   : > { %v3370_v21 = vmul.f32 %v3358_v52, %v4861_v45  ;;  %v3472_v25 = vmul.f32 %v6306_v9, %v3461_v41  ;;  %v3415_v2 = vsub.f32 1.5, %v3414_v19 }
 0xcdf   : > { %v3395_v22 = vsub.f32 1.5, %v3394_v32 }
 0xce0   : > { %v4592_v16 = vpop.eup %4591  ;;  %v3378_v58 = vadd.f32 1e-05, %v3370_v21  ;;  %v3483_v40 = vadd.f32 %v6314_v30, %v3472_v25  ;;  %v3416_v48 = vmul.f32 %v6293_v27, %v3415_v2 }
 0xce1   : > { %v3396_v51 = vmul.f32 %v4590_v59, %v3395_v22  ;;  %v3402_v33 = vmul.f32 %v4592_v16, %v3375_v56  ;;  %vm3408_vm5 = vweird.f32 %v4592_v16  ;;  %v4594_v24 = vpop.eup %4593 }
 0xce2   : > { %4595 = vrsqrt.f32 %v3378_v58  ;;  %vm3409_vm8 = vmor %vm3407_vm4, %vm3408_vm5  ;;  %v3422_v50 = vmul.f32 %v4594_v24, %v6298_v35  ;;  %v3420_v34 = vsel %vm3419_vm9, %v6293_v27, %v3416_v48  ;;  %vm3437_vm10 = vweird.f32 %v3378_v58 }
 0xce3   : > { %v3400_v14 = vsel %vm3399_vm3, %v4590_v59, %v3396_v51  ;;  %v3403_v54 = vmul.f32 %v4592_v16, %v3402_v33  ;;  %v3464_v60 = vmul.f32 %v3420_v34, %v6146_v55  ;;  %vm3428_vm13 = vweird.f32 %v4594_v24 }
 0xce4   : > { %v3462_v17 = vmul.f32 %v3400_v14, %v6149_v20  ;;  %v3423_v49 = vmul.f32 %v4594_v24, %v3422_v50  ;;  %vm3429_vm15 = vmor %vm3427_vm12, %vm3428_vm13 }
 0xce5   : > { %v3404_v23 = vmul.f32 0.5, %v3403_v54  ;;  %v3475_v18 = vmul.f32 %v6306_v9, %v3464_v60 }
 0xce6   : > { %v3473_v38 = vmul.f32 %v6306_v9, %v3462_v17  ;;  %v3424_v43 = vmul.f32 0.5, %v3423_v49 }
 0xce7   : > { %v3405_v29 = vsub.f32 1.5, %v3404_v23 }
 0xce8   : > { %v3484_v20 = vadd.f32 %v6314_v30, %v3473_v38  ;;  %v4596_v7 = vpop.eup %4595  ;;  %v3425_v5 = vsub.f32 1.5, %v3424_v43 }
 0xce9   : > { %v3406_v28 = vmul.f32 %v4592_v16, %v3405_v29  ;;  %v3432_v46 = vmul.f32 %v4596_v7, %v3378_v58  ;;  %vm3438_vm11 = vweird.f32 %v4596_v7 }
 0xcea   : > { %v3491_v53 = vpack.c.bf16 %v3484_v20, %v3483_v40  ;;  %vm3439_vm14 = vmor %vm3437_vm10, %vm3438_vm11  ;;  %v3426_v11 = vmul.f32 %v4594_v24, %v3425_v5  ;;  %v3511_v20 = vld [vmem:[%s6583_s1] sm:$0xf] }
 0xceb   : > { %v3410_v62 = vsel %vm3409_vm8, %v4592_v16, %v3406_v28  ;;  %v3433_v44 = vmul.f32 %v4596_v7, %v3432_v46  ;;  %v6364_v28 = vperm.slane %v3511_v20, 1  ;;  %v6376_v48 = vperm.slane %v3511_v20, 2 }
 0xcec   : > { %4274 = vmatmul.msk.bf16.vlgmr.msra.gmra.mxu0 %vm937_vm2, %v3491_v53  ;;  %4278 = vmatmul.msk.bf16.vlgmr.msra.gmra.mxu1 %vm937_vm2, %v3491_v53  ;;  %v3463_v26 = vmul.f32 %v3410_v62, %v6156_v31  ;;  %v3486_v31 = vadd.f32 %v6314_v30, %v3475_v18  ;;  %v3430_v27 = vsel %vm3429_vm15, %v4594_v24, %v3426_v11  ;;  %v6378_v50 = vperm.slane %v3511_v20, 3 }
 0xced   : > { %4282 = vmatmul.msk.bf16.vlgmr.msra.gmra.mxu2 %vm937_vm2, %v3491_v53  ;;  %4286 = vmatmul.msk.bf16.vlgmr.msra.gmra.mxu3 %vm937_vm2, %v3491_v53  ;;  %v3434_v12 = vmul.f32 0.5, %v3433_v44  ;;  %v3465_v59 = vmul.f32 %v3430_v27, %v6153_v13 }
 0xcee   : > { %v3474_v6 = vmul.f32 %v6306_v9, %v3463_v26 }
 0xcef   : > { %v3435_v37 = vsub.f32 1.5, %v3434_v12  ;;  %v3476_v3 = vmul.f32 %v6306_v9, %v3465_v59 }
 0xcf0   : > { %v3485_v4 = vadd.f32 %v6314_v30, %v3474_v6 }
 0xcf1   : > { %v3436_v57 = vmul.f32 %v4596_v7, %v3435_v37  ;;  %v3487_v47 = vadd.f32 %v6314_v30, %v3476_v3 }
 0xcf2   : > { %v3492_v55 = vpack.c.bf16 %v3486_v31, %v3485_v4 }
 0xcf3   : > { %v3440_v15 = vsel %vm3439_vm14, %v4596_v7, %v3436_v57 }
 0xcf4   : > { %v3466_v42 = vmul.f32 %v3440_v15, %v6175_v61  ;;  %v3361_v61 = vpop.xlane.xlu2 %3360 }
 0xcf5   : > { %v3371_v13 = vmul.f32 %v3361_v61, %v4861_v45 }
 0xcf6   : > { %v3477_v56 = vmul.f32 %v6306_v9, %v3466_v42 }
 0xcf7   : > { %v3379_v63 = vadd.f32 1e-05, %v3371_v13 }
 0xcf8   : > { %v3488_v39 = vadd.f32 %v6314_v30, %v3477_v56 }
 0xcf9   : > { %4597 = vrsqrt.f32 %v3379_v63  ;;  %vm3447_vm0 = vweird.f32 %v3379_v63 }
 0xcfa   : > { %v3493_v36 = vpack.c.bf16 %v3488_v39, %v3487_v47 }
 0xcfc   : > { %4275 = vmatmul.msk.bf16.gmra.mxu0 %vm937_vm2, %v3492_v55  ;;  %4279 = vmatmul.msk.bf16.gmra.mxu1 %vm937_vm2, %v3492_v55 }
 0xcfd   : > { %4283 = vmatmul.msk.bf16.gmra.mxu2 %vm937_vm2, %v3492_v55  ;;  %4287 = vmatmul.msk.bf16.gmra.mxu3 %vm937_vm2, %v3492_v55 }
 0xcff   : > { %v4598_v32 = vpop.eup %4597 }
 0xd00   : > { %v3442_v35 = vmul.f32 %v4598_v32, %v3379_v63  ;;  %vm3448_vm1 = vweird.f32 %v4598_v32 }
 0xd01   : > { %vm3449_vm3 = vmor %vm3447_vm0, %vm3448_vm1 }
 0xd02   : > { %v3443_v52 = vmul.f32 %v4598_v32, %v3442_v35 }
 0xd04   : > { %v3444_v22 = vmul.f32 0.5, %v3443_v52 }
 0xd06   : > { %v3445_v16 = vsub.f32 1.5, %v3444_v22 }
 0xd08   : > { %v3446_v41 = vmul.f32 %v4598_v32, %v3445_v16 }
 0xd0a   : > { %v3450_v19 = vsel %vm3449_vm3, %v4598_v32, %v3446_v41 }
 0xd0b   : > { %v3467_v17 = vmul.f32 %v3450_v19, %v6170_v8  ;;  %v6362_v8 = vperm.slane %v3511_v20, 0 }
 0xd0c   : > { %4276 = vmatmul.msk.bf16.gmra.mxu0 %vm937_vm2, %v3493_v36  ;;  %4280 = vmatmul.msk.bf16.gmra.mxu1 %vm937_vm2, %v3493_v36 }
 0xd0d   : > { %4284 = vmatmul.msk.bf16.gmra.mxu2 %vm937_vm2, %v3493_v36  ;;  %4288 = vmatmul.msk.bf16.gmra.mxu3 %vm937_vm2, %v3493_v36  ;;  %v3478_v25 = vmul.f32 %v6306_v9, %v3467_v17 }
 0xd0f   : > { %v3489_v24 = vadd.f32 %v6314_v30, %v3478_v25 }
 0xd48   : > { %v3364_v10 = vpop.xlane.xlu0 %3363 }
 0xd49   : > { %v3372_v1 = vmul.f32 %v3364_v10, %v4861_v45 }
 0xd4b   : > { %v3380_v21 = vadd.f32 1e-05, %v3372_v1 }
 0xd4d   : > { %4599 = vrsqrt.f32 %v3380_v21  ;;  %vm3457_vm5 = vweird.f32 %v3380_v21 }
 0xd53   : > { %v4600_v58 = vpop.eup %4599 }
 0xd54   : > { %v3452_v51 = vmul.f32 %v4600_v58, %v3380_v21  ;;  %vm3458_vm4 = vweird.f32 %v4600_v58 }
 0xd55   : > { %vm3459_vm6 = vmor %vm3457_vm5, %vm3458_vm4 }
 0xd56   : > { %v3453_v33 = vmul.f32 %v4600_v58, %v3452_v51 }
 0xd58   : > { %v3454_v14 = vmul.f32 0.5, %v3453_v33 }
 0xd5a   : > { %v3455_v54 = vsub.f32 1.5, %v3454_v14 }
 0xd5c   : > { %v3456_v23 = vmul.f32 %v4600_v58, %v3455_v54 }
 0xd5e   : > { %v3460_v45 = vsel %vm3459_vm6, %v4600_v58, %v3456_v23 }
 0xd5f   : > { %v3468_v2 = vmul.f32 %v3460_v45, %v6286_v0 }
 0xd61   : > { %v3479_v38 = vmul.f32 %v6306_v9, %v3468_v2 }
 0xd63   : > { %v3490_v29 = vadd.f32 %v6314_v30, %v3479_v38 }
 0xd65   : > { %v3494_v7 = vpack.c.bf16 %v3490_v29, %v3489_v24 }
 0xd67   : > { %4277 = vmatmul.msk.bf16.gmra.mxu0 %vm937_vm2, %v3494_v7  ;;  %4281 = vmatmul.msk.bf16.gmra.mxu1 %vm937_vm2, %v3494_v7 }
 0xd68   : > { %4285 = vmatmul.msk.bf16.gmra.mxu2 %vm937_vm2, %v3494_v7  ;;  %4289 = vmatmul.msk.bf16.gmra.mxu3 %vm937_vm2, %v3494_v7 }
 0xd69   : > { %v3622_v0 = vpop.f32.mrf.mxu0  ;;  %v3651_v9 = vpop.f32.mrf.mxu1 }
 0xd6a   : > { %v3623_v30 = vadd.f32 %v3622_v0, %v6362_v8  ;;  %v3652_v40 = vadd.f32 %v3651_v9, %v6364_v28 }
 0xd6c   : > { %3729 = vst [vmem:[%s6584_s23] sm:$0xff] %v3623_v30 }
 0xd6d   : > { %3730 = vst [vmem:[%s6585_s27 + $0x8] sm:$0xff] %v3652_v40 }
 0xd70   : > { %v3680_v46 = vpop.f32.mrf.mxu2  ;;  %v3709_v53 = vpop.f32.mrf.mxu3 }
 0xd71   : > { %v3681_v62 = vadd.f32 %v3680_v46, %v6376_v48  ;;  %v3710_v44 = vadd.f32 %v3709_v53, %v6378_v50  ;;  %v3624_v34 = vpop.f32.mrf.mxu0  ;;  %v3653_v49 = vpop.f32.mrf.mxu1 }
 0xd72   : > { %v3625_v26 = vadd.f32 %v3624_v34, %v6362_v8  ;;  %v3654_v12 = vadd.f32 %v3653_v49, %v6364_v28 }
 0xd73   : > { %3731 = vst [vmem:[%s6585_s27 + $0x10] sm:$0xff] %v3681_v62 }
 0xd74   : > { %3732 = vst [vmem:[%s6585_s27 + $0x18] sm:$0xff] %v3710_v44 }
 0xd75   : > { %3733 = vst [vmem:[%s6585_s27 + $0x20] sm:$0xff] %v3625_v26 }
 0xd76   : > { %3734 = vst [vmem:[%s6585_s27 + $0x28] sm:$0xff] %v3654_v12 }
 0xd78   : > { %v3682_v60 = vpop.f32.mrf.mxu2  ;;  %v3711_v43 = vpop.f32.mrf.mxu3 }
 0xd79   : > { %v3683_v6 = vadd.f32 %v3682_v60, %v6376_v48  ;;  %v3712_v37 = vadd.f32 %v3711_v43, %v6378_v50  ;;  %v3627_v18 = vpop.f32.mrf.mxu0  ;;  %v3656_v5 = vpop.f32.mrf.mxu1 }
 0xd7a   : > { %v3628_v4 = vadd.f32 %v3627_v18, %v6362_v8  ;;  %v3657_v57 = vadd.f32 %v3656_v5, %v6364_v28 }
 0xd7b   : > { %3735 = vst [vmem:[%s6585_s27 + $0x30] sm:$0xff] %v3683_v6 }
 0xd7c   : > { %3736 = vst [vmem:[%s6585_s27 + $0x38] sm:$0xff] %v3712_v37 }
 0xd7d   : > { %3737 = vst [vmem:[%s6585_s27 + $0x40] sm:$0xff] %v3628_v4 }
 0xd7e   : > { %3738 = vst [vmem:[%s6585_s27 + $0x48] sm:$0xff] %v3657_v57 }
 0xd80   : > { %v3685_v31 = vpop.f32.mrf.mxu2  ;;  %v3714_v11 = vpop.f32.mrf.mxu3 }
 0xd81   : > { %v3686_v55 = vadd.f32 %v3685_v31, %v6376_v48  ;;  %v3715_v15 = vadd.f32 %v3714_v11, %v6378_v50  ;;  %v3629_v27 = vpop.f32.mrf.mxu0  ;;  %v3658_v42 = vpop.f32.mrf.mxu1 }
 0xd82   : > { %v3630_v59 = vadd.f32 %v3629_v27, %v6362_v8  ;;  %v3659_v56 = vadd.f32 %v3658_v42, %v6364_v28 }
 0xd83   : > { %3739 = vst [vmem:[%s6585_s27 + $0x50] sm:$0xff] %v3686_v55 }
 0xd84   : > { %3740 = vst [vmem:[%s6585_s27 + $0x58] sm:$0xff] %v3715_v15 }
 0xd85   : > { %3741 = vst [vmem:[%s6585_s27 + $0x60] sm:$0xff] %v3630_v59 }
 0xd86   : > { %3742 = vst [vmem:[%s6585_s27 + $0x68] sm:$0xff] %v3659_v56 }
 0xd88   : > { %v3687_v3 = vpop.f32.mrf.mxu2  ;;  %v3716_v39 = vpop.f32.mrf.mxu3 }
 0xd89   : > { %v3688_v47 = vadd.f32 %v3687_v3, %v6376_v48  ;;  %v3717_v36 = vadd.f32 %v3716_v39, %v6378_v50  ;;  %v3632_v61 = vpop.f32.mrf.mxu0  ;;  %v3661_v13 = vpop.f32.mrf.mxu1 }
 0xd8a   : > { %v3633_v63 = vadd.f32 %v3632_v61, %v6362_v8  ;;  %v3662_v32 = vadd.f32 %v3661_v13, %v6364_v28 }
 0xd8b   : > { %3743 = vst [vmem:[%s6585_s27 + $0x70] sm:$0xff] %v3688_v47 }
 0xd8c   : > { %3744 = vst [vmem:[%s6585_s27 + $0x78] sm:$0xff] %v3717_v36 }
 0xd8d   : > { %3745 = vst [vmem:[%s6585_s27 + $0x80] sm:$0xff] %v3633_v63 }
 0xd8e   : > { %3746 = vst [vmem:[%s6585_s27 + $0x88] sm:$0xff] %v3662_v32 }
 0xd90   : > { %v3690_v35 = vpop.f32.mrf.mxu2  ;;  %v3719_v52 = vpop.f32.mrf.mxu3 }
 0xd91   : > { %v3691_v10 = vadd.f32 %v3690_v35, %v6376_v48  ;;  %v3720_v1 = vadd.f32 %v3719_v52, %v6378_v50  ;;  %v3634_v21 = vpop.f32.mrf.mxu0  ;;  %v3663_v22 = vpop.f32.mrf.mxu1 }
 0xd92   : > { %v3635_v16 = vadd.f32 %v3634_v21, %v6362_v8  ;;  %v3664_v58 = vadd.f32 %v3663_v22, %v6364_v28 }
 0xd93   : > { %3747 = vst [vmem:[%s6585_s27 + $0x90] sm:$0xff] %v3691_v10 }
 0xd94   : > { %3748 = vst [vmem:[%s6585_s27 + $0x98] sm:$0xff] %v3720_v1 }
 0xd95   : > { %3749 = vst [vmem:[%s6585_s27 + $0xa0] sm:$0xff] %v3635_v16 }
 0xd96   : > { %3750 = vst [vmem:[%s6585_s27 + $0xa8] sm:$0xff] %v3664_v58 }
 0xd98   : > { %v3692_v41 = vpop.f32.mrf.mxu2  ;;  %v3721_v51 = vpop.f32.mrf.mxu3 }
 0xd99   : > { %v3693_v33 = vadd.f32 %v3692_v41, %v6376_v48  ;;  %v3722_v19 = vadd.f32 %v3721_v51, %v6378_v50 }
 0xd9b   : > { %3751 = vst [vmem:[%s6585_s27 + $0xb0] sm:$0xff] %v3693_v33 }
 0xd9c   : > { %3752 = vst [vmem:[%s6585_s27 + $0xb8] sm:$0xff] %v3722_v19 }
 0xde4   : > { %v3637_v14 = vpop.f32.mrf.mxu0  ;;  %v3666_v54 = vpop.f32.mrf.mxu1 }
 0xde5   : > { %v3638_v17 = vadd.f32 %v3637_v14, %v6362_v8  ;;  %v3667_v23 = vadd.f32 %v3666_v54, %v6364_v28 }
 0xde7   : > { %3753 = vst [vmem:[%s6585_s27 + $0xc0] sm:$0xff] %v3638_v17 }
 0xde8   : > { %3754 = vst [vmem:[%s6585_s27 + $0xc8] sm:$0xff] %v3667_v23 }
 0xdeb   : > { %v3695_v45 = vpop.f32.mrf.mxu2  ;;  %v3724_v25 = vpop.f32.mrf.mxu3 }
 0xdec   : > { %v3696_v2 = vadd.f32 %v3695_v45, %v6376_v48  ;;  %v3725_v38 = vadd.f32 %v3724_v25, %v6378_v50  ;;  %v3639_v24 = vpop.f32.mrf.mxu0  ;;  %v3668_v29 = vpop.f32.mrf.mxu1 }
 0xded   : > { %v3640_v20 = vadd.f32 %v3639_v24, %v6362_v8  ;;  %v3669_v7 = vadd.f32 %v3668_v29, %v6364_v28 }
 0xdee   : > { %3755 = vst [vmem:[%s6585_s27 + $0xd0] sm:$0xff] %v3696_v2 }
 0xdef   : > { %3756 = vst [vmem:[%s6585_s27 + $0xd8] sm:$0xff] %v3725_v38 }
 0xdf0   : > { %3757 = vst [vmem:[%s6585_s27 + $0xe0] sm:$0xff] %v3640_v20 }
 0xdf1   : > { %3758 = vst [vmem:[%s6585_s27 + $0xe8] sm:$0xff] %v3669_v7 }
 0xdf3   : > { %v3697_v0 = vpop.f32.mrf.mxu2  ;;  %v3726_v8 = vpop.f32.mrf.mxu3 }
 0xdf4   : > { %v3698_v28 = vadd.f32 %v3697_v0, %v6376_v48  ;;  %v3727_v9 = vadd.f32 %v3726_v8, %v6378_v50 }
 0xdf6   : > { %3759 = vst [vmem:[%s6585_s27 + $0xf0] sm:$0xff] %v3698_v28 }
 0xdf7   : > { %3760 = vst [vmem:[%s6585_s27 + $0xf8] sm:$0xff] %v3727_v9 }
 0xdf8 PF: > { %s6586_s15 = sld [smem:[#allocation4_spill]] }
 0xdf9   : > { %s6587_s1 = sld [smem:[#allocation3_spill]] }
 0xdfa   : > { %s6588_s22 = sld [smem:[#allocation5_spill]] }
 0xdfe   : > { %s30_s23 = sadd.s32 1, %s6586_s15  }
 0xdff   : > { %p27_p7 = scmp.ge.s32.totalorder %s30_s23, 4  }
 0xe01   :  { %29 = sbr.rel (!%p27_p7) target bundleno = 11 (0xb), region = 171 }

</bundles_post_ra>
